<compile_context>
chip_gen: v6e
topology: v6e:2x2x1
jax: 0.10.0
libtpu: 0.0.40
codegen_flags: <defaults>
</compile_context>

<pallas_src>
import functools

import jax
import jax.numpy as jnp
from jax.experimental import pallas as pl
from jax.experimental.pallas import tpu as pltpu

_BF16 = jnp.bfloat16
_F32 = jnp.float32


# ----------------------------------------------------------------------------
# Single fused kernel: q/k/v projection (fc1 folded), fc_delta pos-enc, fc_gamma,
# softmax over K, weighted sum, fc2 + residual.     grid = (TB, N // tile_n)
# ----------------------------------------------------------------------------
def _block_kernel(pre_ref, nbr_ref, rel_ref,
                  wqkv_ref, bqkv_ref, wd1_ref, wsq_ref, w2_ref, bstk_ref, b2_ref,
                  out_ref, attn_ref):
    K, tn, dp = nbr_ref.shape[1], nbr_ref.shape[2], nbr_ref.shape[3]
    D = wsq_ref.shape[-1]
    c_rel = rel_ref.shape[3]

    wqkv = wqkv_ref[...]                               # (dp, 3D) bf16, columns [k | v | q]
    bqkv = bqkv_ref[...]                               # (1, 3D)  f32
    bst = bstk_ref[...]                                # (4, D)   f32
    bd1, bd2, bg1, bg2 = bst[0:1], bst[1:2], bst[2:3], bst[3:4]

    # ---- q from the centre point (fc1 folded into the projection) -----------------
    pre = pre_ref[0]                                   # (tn, dp) f32 residual
    q = (jnp.dot(pre.astype(_BF16), wqkv[:, 2 * D:], preferred_element_type=_F32)
         + bqkv[:, 2 * D:])                            # (tn, D) f32

    # ---- k/v projected from the raw gathered neighbour features (linear => exact) --
    nbr = nbr_ref[0].reshape(K * tn, dp)               # (K*tn, dp) bf16
    kv = (jnp.dot(nbr, wqkv[:, :2 * D], preferred_element_type=_F32)
          + bqkv[:, :2 * D]).reshape(K, tn, 2 * D)     # f32
    kg = kv[:, :, :D]
    vg = kv[:, :, D:]

    # ---- fc_delta: Conv2d(3,D,1)+BN -> ReLU -> Conv2d(D,D,1)+BN --------------------
    rel = rel_ref[0].reshape(K * tn, c_rel)            # (K*tn, 8) bf16 (3 ch zero-padded)
    h = jnp.maximum(jnp.dot(rel, wd1_ref[...], preferred_element_type=_F32) + bd1, 0.0)
    pos = (jnp.dot(h.astype(_BF16), wsq_ref[0], preferred_element_type=_F32)
           + bd2).reshape(K, tn, D)                    # (K, tn, D) f32

    # ---- fc_gamma (1/sqrt(D) softmax scale pre-folded into wsq[2]/bg2) --------------
    pre_attn = q[None, :, :] - kg + pos                # (K, tn, D) f32 elementwise
    g = jnp.maximum(
        jnp.dot(pre_attn.reshape(K * tn, D).astype(_BF16), wsq_ref[1],
                preferred_element_type=_F32) + bg1, 0.0)
    logits = (jnp.dot(g.astype(_BF16), wsq_ref[2], preferred_element_type=_F32)
              + bg2).reshape(K, tn, D)

    # ---- softmax over the K neighbours (f32; EUP approx reciprocal) -----------------
    m = jnp.max(logits, axis=0, keepdims=True)
    e = jnp.exp(logits - m)
    attn = e * pl.reciprocal(jnp.sum(e, axis=0, keepdims=True), approx=True)

    # lane-dense aux store: per-K 2-D transposes -> (K, D, tn) bf16
    for kk in range(K):
        attn_ref[0, kk] = jnp.transpose(attn[kk], (1, 0)).astype(_BF16)

    # ---- einsum('bcnm,bcnm->bcn'): weighted sum over K, then fc2 + residual ---------
    res = jnp.sum(attn * (vg + pos), axis=0)           # (tn, D) f32
    out = (jnp.dot(res.astype(_BF16), w2_ref[...], preferred_element_type=_F32)
           + b2_ref[...] + pre)                        # (tn, dp) f32
    out_ref[0] = jnp.transpose(out, (1, 0))            # lane-dense (dp, tn) store


# ----------------------------------------------------------------------------
# pallas_call wrapper
# ----------------------------------------------------------------------------
def _full_spec(arr):
    zeros = (0,) * arr.ndim
    return pl.BlockSpec(arr.shape, lambda b, n, _z=zeros: _z)


_VMEM_FALLBACK = 48 * 1024 * 1024


def _vmem_limit_bytes():
    # ~0.75x of the physical VMEM of the current generation (v5e/v6e: 128 MiB, v7x: 64 MiB)
    try:
        return int(0.75 * pltpu.get_tpu_info().vmem_capacity_bytes)
    except Exception:
        return _VMEM_FALLBACK


def _pick_n_tile(n, tb, k, d_model, d_points, vmem_limit):
    """Largest point-tile that divides N, fits a conservative VMEM estimate (v7x: 64 MiB),
    and keeps >=2 grid steps on a parallel axis so v7x's second TensorCore is used."""
    c_rel = 8

    def est(t):
        live_f32 = 8 * k * t * d_model * 4                  # kv/pos/pre_attn/g/logits/e/attn/...
        io = 2 * (k * t * (d_points + c_rel) * 2            # nbr + rel blocks (bf16, 2x buffered)
                  + k * d_model * t * 2                     # attn output block (bf16)
                  + t * d_points * 8)                       # pre in + out (f32)
        return live_f32 + io

    budget = max(int(0.5 * vmem_limit), 4 * 1024 * 1024)
    cands = [t for t in (1024, 512, 256, 128, 64, 32, 16, 8) if n % t == 0] or [n]
    fits = [t for t in cands if est(t) <= budget] or [cands[-1]]
    if tb < 2:
        multi = [t for t in fits if n // t >= 2]
        if multi:
            fits = multi
    return fits[0]


def run_block(pre, nbr, rel, params, tile_n, vmem_limit):
    TB, K, N, dp = nbr.shape
    D = params["wsq"].shape[-1]
    c_rel = rel.shape[-1]
    weight_names = ("wqkv", "bqkv", "wd1", "wsq", "w2", "bstk", "b2")
    in_specs = [
        pl.BlockSpec((1, tile_n, dp), lambda b, n: (b, n, 0)),            # pre (f32 residual)
        pl.BlockSpec((1, K, tile_n, dp), lambda b, n: (b, 0, n, 0)),      # gathered nbr feats (bf16)
        pl.BlockSpec((1, K, tile_n, c_rel), lambda b, n: (b, 0, n, 0)),   # rel xyz (bf16, padded)
    ] + [_full_spec(params[name]) for name in weight_names]
    out_specs = [
        pl.BlockSpec((1, dp, tile_n), lambda b, n: (b, 0, n)),            # result, lane-dense
        pl.BlockSpec((1, K, D, tile_n), lambda b, n: (b, 0, 0, n)),       # attn, lane-dense bf16
    ]
    out_shape = [
        jax.ShapeDtypeStruct((TB, dp, N), _F32),
        jax.ShapeDtypeStruct((TB, K, D, N), _BF16),
    ]
    grid_spec = pltpu.PrefetchScalarGridSpec(
        num_scalar_prefetch=0, grid=(TB, N // tile_n),
        in_specs=in_specs, out_specs=out_specs)
    return pl.pallas_call(
        _block_kernel, out_shape=out_shape, grid_spec=grid_spec,
        compiler_params=pltpu.CompilerParams(
            dimension_semantics=("parallel", "parallel"),
            vmem_limit_bytes=vmem_limit),
    )(pre, nbr, rel, *(params[n] for n in weight_names))


# ----------------------------------------------------------------------------
# Full forward (use_encoder=False path)
# ----------------------------------------------------------------------------
def transformer_block_pallas(xyz, features, params, *, knn_k):
    T, B, N, _ = xyz.shape
    TB = T * B
    d_points = features.shape[-1]
    D = params["wsq"].shape[-1]
    assert N % 8 == 0, "pad the point count to a multiple of 8"

    # --- JAX glue: square_distance + argsort (kNN) -- data-dependent ----------------
    loc = xyz[0]                                                     # (B, N, 3)
    sq = jnp.sum(loc ** 2, axis=-1)
    d2 = sq[:, :, None] + sq[:, None, :] - 2.0 * jnp.einsum("bnc,bmc->bnm", loc, loc)
    knn_idx = jnp.argsort(d2, axis=-1)[:, :, :knn_k]                 # (B, N, K)
    knn_t = jnp.transpose(knn_idx, (0, 2, 1))                        # (B, K, N)
    knn_xyz_t = loc[jnp.arange(B)[:, None, None], knn_t]             # (B, K, N, 3)

    pre = features.reshape(TB, N, d_points).astype(_F32)             # residual, f32

    # narrow (d_points-wide) bf16 neighbour-feature gather, already in kernel layout
    knn_rep = jnp.broadcast_to(knn_t[None], (T, B, knn_k, N)).reshape(TB, knn_k, N)
    nbr = pre.astype(_BF16)[jnp.arange(TB)[:, None, None], knn_rep]  # (TB, K, N, dp) bf16

    # relative positions, built directly as (TB, K, N, 3), channel-padded to 8, bf16
    rel = (xyz[:, :, None, :, :] - knn_xyz_t[None]).reshape(TB, knn_k, N, 3)
    rel = jnp.pad(rel, ((0, 0), (0, 0), (0, 0),
                        (0, params["wd1"].shape[0] - 3))).astype(_BF16)

    vmem_limit = _vmem_limit_bytes()
    tile_n = _pick_n_tile(N, TB, knn_k, D, d_points, vmem_limit)
    out, attn_b = run_block(pre, nbr, rel, params, tile_n, vmem_limit)

    res = jnp.transpose(out, (0, 2, 1)).reshape(T, B, N, d_points)   # (T, B, N, dp) f32
    attn = jnp.transpose(attn_b, (0, 2, 3, 1))                       # (TB, D, N, K), stays bf16
    return res, attn


# ----------------------------------------------------------------------------
# Deterministic parameter construction (Conv 1x1 weights with BN folded in)
# ----------------------------------------------------------------------------
def _conv_bn(key, cin, cout, eps=1e-5):
    k1, k2, k3, k4, k5, k6 = jax.random.split(key, 6)
    w = jax.random.normal(k1, (cin, cout), _F32) / jnp.sqrt(jnp.float32(cin))
    b = 0.05 * jax.random.normal(k2, (cout,), _F32)
    gamma = 1.0 + 0.1 * jax.random.normal(k3, (cout,), _F32)
    beta = 0.05 * jax.random.normal(k4, (cout,), _F32)
    mean = 0.05 * jax.random.normal(k5, (cout,), _F32)
    var = 0.9 + 0.1 * jnp.abs(jax.random.normal(k6, (cout,), _F32))
    scale = gamma / jnp.sqrt(var + eps)
    return w * scale[None, :], ((b - mean) * scale + beta).reshape(1, cout)


def init_params(key, d_points, d_model, rel_pad=8):
    """Raw per-layer folded Conv+BN weights (f32), mirroring the module layers."""
    ks = jax.random.split(key, 9)
    w1, b1 = _conv_bn(ks[0], d_points, d_model)
    wq, bq = _conv_bn(ks[1], d_model, d_model)
    wk, bk = _conv_bn(ks[2], d_model, d_model)
    wv, bv = _conv_bn(ks[3], d_model, d_model)
    wd1, bd1 = _conv_bn(ks[4], 3, d_model)
    wd1 = jnp.concatenate([wd1, jnp.zeros((rel_pad - 3, d_model), _F32)], axis=0)
    wd2, bd2 = _conv_bn(ks[5], d_model, d_model)
    wg1, bg1 = _conv_bn(ks[6], d_model, d_model)
    wg2, bg2 = _conv_bn(ks[7], d_model, d_model)
    w2, b2 = _conv_bn(ks[8], d_model, d_points)
    return dict(w1=w1, b1=b1, wq=wq, bq=bq, wk=wk, bk=bk, wv=wv, bv=bv,
                wd1=wd1, bd1=bd1, wd2=wd2, bd2=bd2,
                wg1=wg1, bg1=bg1, wg2=wg2, bg2=bg2, w2=w2, b2=b2)


def prepare_params(raw, d_model):
    """Fuse / stack the weights for the kernel:
       - fc1 folded into w_qs/w_ks/w_vs (no nonlinearity between them on the eval path):
         wX_f = w1 @ wX (f32, then bf16), bX_f = b1 @ wX + bX
       - fused (d_points, 3D) projection weight ordered [k | v | q]
       - 1/sqrt(D) softmax scale folded into wg2 / bg2
       - square (D,D) weights stacked into (3,D,D); small biases into (4,D)
       - MXU operands pre-cast to bf16 (biases and all accumulation stay f32)."""
    scale = float(d_model) ** -0.5
    wq_f = raw["w1"] @ raw["wq"]
    wk_f = raw["w1"] @ raw["wk"]
    wv_f = raw["w1"] @ raw["wv"]
    bq_f = raw["b1"] @ raw["wq"] + raw["bq"]
    bk_f = raw["b1"] @ raw["wk"] + raw["bk"]
    bv_f = raw["b1"] @ raw["wv"] + raw["bv"]
    return dict(
        wqkv=jnp.concatenate([wk_f, wv_f, wq_f], axis=1).astype(_BF16),
        bqkv=jnp.concatenate([bk_f, bv_f, bq_f], axis=1).astype(_F32),
        wd1=raw["wd1"].astype(_BF16),
        wsq=jnp.stack([raw["wd2"], raw["wg1"], raw["wg2"] * scale]).astype(_BF16),
        bstk=jnp.concatenate(
            [raw["bd1"], raw["bd2"], raw["bg1"], raw["bg2"] * scale], axis=0),
        w2=raw["w2"].astype(_BF16),
        b2=raw["b2"],
    )


# ----------------------------------------------------------------------------
# Pure-JAX reference: same math as the PyTorch module (eval, BN folded, Identity
# spike nodes), with bf16 rounding applied at the same points as the kernel so
# the comparison tolerance stays tight.
# ----------------------------------------------------------------------------
def reference_forward(xyz, features, params, knn_k):
    T, B, N, _ = xyz.shape
    TB = T * B
    dp = features.shape[-1]
    D = params["wsq"].shape[-1]

    loc = xyz[0]
    sq = jnp.sum(loc ** 2, axis=-1)
    d2 = sq[:, :, None] + sq[:, None, :] - 2.0 * jnp.einsum("bnc,bmc->bnm", loc, loc)
    knn_idx = jnp.argsort(d2, axis=-1)[:, :, :knn_k]                 # (B, N, K)
    bidx = jnp.arange(B)[:, None, None]
    knn_xyz = loc[bidx, knn_idx]                                     # (B, N, K, 3)
    knn_rep = jnp.broadcast_to(knn_idx[None], (T, B, N, knn_k)).reshape(TB, N, knn_k)

    feats = features.reshape(TB, N, dp).astype(_F32)
    feats_b = feats.astype(_BF16)
    wqkv, bqkv = params["wqkv"], params["bqkv"]

    q = jnp.dot(feats_b, wqkv[:, 2 * D:], preferred_element_type=_F32) + bqkv[:, 2 * D:]

    tbidx = jnp.arange(TB)[:, None, None]
    nbr = feats_b[tbidx, knn_rep]                                    # (TB, N, K, dp) bf16
    kv = jnp.dot(nbr, wqkv[:, :2 * D], preferred_element_type=_F32) + bqkv[:, :2 * D]
    kg, vg = kv[..., :D], kv[..., D:]

    rel = (xyz[:, :, :, None, :] - knn_xyz[None]).reshape(TB, N, knn_k, 3)
    rel = jnp.pad(rel, ((0, 0), (0, 0), (0, 0),
                        (0, params["wd1"].shape[0] - 3))).astype(_BF16)

    wd2, wg1, wg2 = params["wsq"][0], params["wsq"][1], params["wsq"][2]
    bd1, bd2, bg1, bg2 = (params["bstk"][0], params["bstk"][1],
                          params["bstk"][2], params["bstk"][3])

    h = jnp.maximum(jnp.dot(rel, params["wd1"], preferred_element_type=_F32) + bd1, 0.0)
    pos = jnp.dot(h.astype(_BF16), wd2, preferred_element_type=_F32) + bd2

    pre_attn = q[:, :, None, :] - kg + pos
    g = jnp.maximum(
        jnp.dot(pre_attn.astype(_BF16), wg1, preferred_element_type=_F32) + bg1, 0.0)
    logits = jnp.dot(g.astype(_BF16), wg2, preferred_element_type=_F32) + bg2  # scale folded
    attn = jax.nn.softmax(logits, axis=2)

    res = jnp.sum(attn * (vg + pos), axis=2)
    out = (jnp.dot(res.astype(_BF16), params["w2"], preferred_element_type=_F32)
           + params["b2"] + feats)
    return out.reshape(T, B, N, dp), jnp.transpose(attn, (0, 3, 1, 2))


if __name__ == "__main__":
    T, B, N = 2, 2, 128
    d_points, d_model, knn_k = 8, 32, 4

    key = jax.random.PRNGKey(0)
    k_xyz, k_feat, k_par = jax.random.split(key, 3)
    xyz = jax.random.normal(k_xyz, (T, B, N, 3), jnp.float32)
    features = jax.random.normal(k_feat, (T, B, N, d_points), jnp.float32)
    params = prepare_params(init_params(k_par, d_points, d_model), d_model)

    fwd = jax.jit(functools.partial(transformer_block_pallas, knn_k=knn_k))
    res, attn = fwd(xyz, features, params)
    jax.block_until_ready((res, attn))

    res_ref, attn_ref = reference_forward(xyz, features, params, knn_k)
    assert res.shape == (T, B, N, d_points)
    assert attn.shape == (T * B, d_model, N, knn_k)
    # bf16 MXU operands + approx-reciprocal softmax + bf16 attn -> bf16-level tolerance
    assert jnp.allclose(res, res_ref, atol=2e-2, rtol=2e-2), \
        float(jnp.max(jnp.abs(res - res_ref)))
    assert jnp.allclose(attn.astype(_F32), attn_ref, atol=2e-2, rtol=2e-2), \
        float(jnp.max(jnp.abs(attn.astype(_F32) - attn_ref)))
    print("KERNEL_OK")
</pallas_src>

<mosaic_0001>
module attributes {stable_mosaic.version = 11 : i64} {
  func.func @_block_kernel(%arg0: i32, %arg1: i32, %arg2: memref<1x128x8xf32, #tpu.memory_space<vmem>>, %arg3: memref<1x4x128x8xbf16, #tpu.memory_space<vmem>>, %arg4: memref<1x4x128x8xbf16, #tpu.memory_space<vmem>>, %arg5: memref<8x96xbf16, #tpu.memory_space<vmem>>, %arg6: memref<1x96xf32, #tpu.memory_space<vmem>>, %arg7: memref<8x32xbf16, #tpu.memory_space<vmem>>, %arg8: memref<3x32x32xbf16, #tpu.memory_space<vmem>>, %arg9: memref<32x8xbf16, #tpu.memory_space<vmem>>, %arg10: memref<4x32xf32, #tpu.memory_space<vmem>>, %arg11: memref<1x8xf32, #tpu.memory_space<vmem>>, %arg12: memref<1x8x128xf32, #tpu.memory_space<vmem>>, %arg13: memref<1x4x32x128xbf16, #tpu.memory_space<vmem>>) attributes {dimension_semantics = [#tpu.dimension_semantics<parallel>, #tpu.dimension_semantics<parallel>], iteration_bounds = array<i64: 4, 1>, scalar_prefetch = 0 : i64, scratch_operands = 0 : i64, tpu.core_type = #tpu.core_type<tc>, window_params = [{transform_indices = @transform_0, window_bounds = array<i64: 1, 128, 8>}, {transform_indices = @transform_1, window_bounds = array<i64: 1, 4, 128, 8>}, {transform_indices = @transform_2, window_bounds = array<i64: 1, 4, 128, 8>}, {pipeline_mode = #tpu.pipeline_mode<synchronous>, transform_indices = @transform_3, window_bounds = array<i64: 8, 96>}, {pipeline_mode = #tpu.pipeline_mode<synchronous>, transform_indices = @transform_4, window_bounds = array<i64: 1, 96>}, {pipeline_mode = #tpu.pipeline_mode<synchronous>, transform_indices = @transform_5, window_bounds = array<i64: 8, 32>}, {pipeline_mode = #tpu.pipeline_mode<synchronous>, transform_indices = @transform_6, window_bounds = array<i64: 3, 32, 32>}, {pipeline_mode = #tpu.pipeline_mode<synchronous>, transform_indices = @transform_7, window_bounds = array<i64: 32, 8>}, {pipeline_mode = #tpu.pipeline_mode<synchronous>, transform_indices = @transform_8, window_bounds = array<i64: 4, 32>}, {pipeline_mode = #tpu.pipeline_mode<synchronous>, transform_indices = @transform_9, window_bounds = array<i64: 1, 8>}, {transform_indices = @transform_10, window_bounds = array<i64: 1, 8, 128>}, {transform_indices = @transform_11, window_bounds = array<i64: 1, 4, 32, 128>}]} {
    %c0 = arith.constant 0 : index
    %c0_0 = arith.constant 0 : index
    %0 = vector.load %arg5[%c0, %c0_0] : memref<8x96xbf16, #tpu.memory_space<vmem>>, vector<8x96xbf16>
    %c0_1 = arith.constant 0 : index
    %c0_2 = arith.constant 0 : index
    %1 = vector.load %arg6[%c0_1, %c0_2] : memref<1x96xf32, #tpu.memory_space<vmem>>, vector<1x96xf32>
    %c0_3 = arith.constant 0 : index
    %c0_4 = arith.constant 0 : index
    %2 = vector.load %arg10[%c0_3, %c0_4] : memref<4x32xf32, #tpu.memory_space<vmem>>, vector<4x32xf32>
    %3 = vector.extract_strided_slice %2 {offsets = [0, 0], sizes = [1, 32], strides = [1, 1]} : vector<4x32xf32> to vector<1x32xf32>
    %4 = vector.extract_strided_slice %2 {offsets = [1, 0], sizes = [1, 32], strides = [1, 1]} : vector<4x32xf32> to vector<1x32xf32>
    %5 = vector.extract_strided_slice %2 {offsets = [2, 0], sizes = [1, 32], strides = [1, 1]} : vector<4x32xf32> to vector<1x32xf32>
    %6 = vector.extract_strided_slice %2 {offsets = [3, 0], sizes = [1, 32], strides = [1, 1]} : vector<4x32xf32> to vector<1x32xf32>
    %c0_5 = arith.constant 0 : index
    %c0_6 = arith.constant 0 : index
    %c0_7 = arith.constant 0 : index
    %7 = vector.load %arg2[%c0_5, %c0_6, %c0_7] : memref<1x128x8xf32, #tpu.memory_space<vmem>>, vector<1x128x8xf32>
    %8 = vector.shape_cast %7 : vector<1x128x8xf32> to vector<128x8xf32>
    %9 = arith.truncf %8 : vector<128x8xf32> to vector<128x8xbf16>
    %10 = vector.extract_strided_slice %0 {offsets = [0, 64], sizes = [8, 32], strides = [1, 1]} : vector<8x96xbf16> to vector<8x32xbf16>
    %cst = arith.constant dense<0.000000e+00> : vector<128x32xf32>
    %11 = tpu.matmul %9, %10, %cst {dimension_numbers = #tpu.dot_dimension_numbers<[1], [0], [0], [1], [0, 0, 1, 1], [], []>} : vector<128x8xbf16>, vector<8x32xbf16>, vector<128x32xf32> -> vector<128x32xf32>
    %12 = vector.extract_strided_slice %1 {offsets = [0, 64], sizes = [1, 32], strides = [1, 1]} : vector<1x96xf32> to vector<1x32xf32>
    %13 = vector.broadcast %12 : vector<1x32xf32> to vector<128x32xf32>
    %14 = arith.addf %11, %13 : vector<128x32xf32>
    %c0_8 = arith.constant 0 : index
    %c0_9 = arith.constant 0 : index
    %c0_10 = arith.constant 0 : index
    %c0_11 = arith.constant 0 : index
    %15 = vector.load %arg3[%c0_8, %c0_9, %c0_10, %c0_11] : memref<1x4x128x8xbf16, #tpu.memory_space<vmem>>, vector<1x4x128x8xbf16>
    %16 = vector.shape_cast %15 : vector<1x4x128x8xbf16> to vector<4x128x8xbf16>
    %17 = vector.shape_cast %16 : vector<4x128x8xbf16> to vector<512x8xbf16>
    %18 = vector.extract_strided_slice %0 {offsets = [0, 0], sizes = [8, 64], strides = [1, 1]} : vector<8x96xbf16> to vector<8x64xbf16>
    %cst_12 = arith.constant dense<0.000000e+00> : vector<512x64xf32>
    %19 = tpu.matmul %17, %18, %cst_12 {dimension_numbers = #tpu.dot_dimension_numbers<[1], [0], [0], [1], [0, 0, 1, 1], [], []>} : vector<512x8xbf16>, vector<8x64xbf16>, vector<512x64xf32> -> vector<512x64xf32>
    %20 = vector.extract_strided_slice %1 {offsets = [0, 0], sizes = [1, 64], strides = [1, 1]} : vector<1x96xf32> to vector<1x64xf32>
    %21 = vector.broadcast %20 : vector<1x64xf32> to vector<512x64xf32>
    %22 = arith.addf %19, %21 : vector<512x64xf32>
    %23 = vector.shape_cast %22 : vector<512x64xf32> to vector<4x128x64xf32>
    %24 = vector.extract_strided_slice %23 {offsets = [0, 0, 0], sizes = [4, 128, 32], strides = [1, 1, 1]} : vector<4x128x64xf32> to vector<4x128x32xf32>
    %25 = vector.extract_strided_slice %23 {offsets = [0, 0, 32], sizes = [4, 128, 32], strides = [1, 1, 1]} : vector<4x128x64xf32> to vector<4x128x32xf32>
    %c0_13 = arith.constant 0 : index
    %c0_14 = arith.constant 0 : index
    %c0_15 = arith.constant 0 : index
    %c0_16 = arith.constant 0 : index
    %26 = vector.load %arg4[%c0_13, %c0_14, %c0_15, %c0_16] : memref<1x4x128x8xbf16, #tpu.memory_space<vmem>>, vector<1x4x128x8xbf16>
    %27 = vector.shape_cast %26 : vector<1x4x128x8xbf16> to vector<4x128x8xbf16>
    %28 = vector.shape_cast %27 : vector<4x128x8xbf16> to vector<512x8xbf16>
    %c0_17 = arith.constant 0 : index
    %c0_18 = arith.constant 0 : index
    %29 = vector.load %arg7[%c0_17, %c0_18] : memref<8x32xbf16, #tpu.memory_space<vmem>>, vector<8x32xbf16>
    %cst_19 = arith.constant dense<0.000000e+00> : vector<512x32xf32>
    %30 = tpu.matmul %28, %29, %cst_19 {dimension_numbers = #tpu.dot_dimension_numbers<[1], [0], [0], [1], [0, 0, 1, 1], [], []>} : vector<512x8xbf16>, vector<8x32xbf16>, vector<512x32xf32> -> vector<512x32xf32>
    %31 = vector.broadcast %3 : vector<1x32xf32> to vector<512x32xf32>
    %32 = arith.addf %30, %31 : vector<512x32xf32>
    %cst_20 = arith.constant 0.000000e+00 : f32
    %33 = vector.broadcast %cst_20 : f32 to vector<512x32xf32>
    %34 = arith.maximumf %32, %33 : vector<512x32xf32>
    %35 = arith.truncf %34 : vector<512x32xf32> to vector<512x32xbf16>
    %c0_21 = arith.constant 0 : index
    %c0_22 = arith.constant 0 : index
    %c0_23 = arith.constant 0 : index
    %36 = vector.load %arg8[%c0_21, %c0_22, %c0_23] : memref<3x32x32xbf16, #tpu.memory_space<vmem>>, vector<1x32x32xbf16>
    %37 = vector.shape_cast %36 : vector<1x32x32xbf16> to vector<32x32xbf16>
    %cst_24 = arith.constant dense<0.000000e+00> : vector<512x32xf32>
    %38 = tpu.matmul %35, %37, %cst_24 {dimension_numbers = #tpu.dot_dimension_numbers<[1], [0], [0], [1], [0, 0, 1, 1], [], []>} : vector<512x32xbf16>, vector<32x32xbf16>, vector<512x32xf32> -> vector<512x32xf32>
    %39 = vector.broadcast %4 : vector<1x32xf32> to vector<512x32xf32>
    %40 = arith.addf %38, %39 : vector<512x32xf32>
    %41 = vector.shape_cast %40 : vector<512x32xf32> to vector<4x128x32xf32>
    %42 = vector.shape_cast %14 : vector<128x32xf32> to vector<1x128x32xf32>
    %43 = vector.broadcast %42 : vector<1x128x32xf32> to vector<4x128x32xf32>
    %44 = arith.subf %43, %24 : vector<4x128x32xf32>
    %45 = arith.addf %44, %41 : vector<4x128x32xf32>
    %46 = vector.shape_cast %45 : vector<4x128x32xf32> to vector<512x32xf32>
    %47 = arith.truncf %46 : vector<512x32xf32> to vector<512x32xbf16>
    %c1 = arith.constant 1 : index
    %c0_25 = arith.constant 0 : index
    %c0_26 = arith.constant 0 : index
    %48 = vector.load %arg8[%c1, %c0_25, %c0_26] : memref<3x32x32xbf16, #tpu.memory_space<vmem>>, vector<1x32x32xbf16>
    %49 = vector.shape_cast %48 : vector<1x32x32xbf16> to vector<32x32xbf16>
    %cst_27 = arith.constant dense<0.000000e+00> : vector<512x32xf32>
    %50 = tpu.matmul %47, %49, %cst_27 {dimension_numbers = #tpu.dot_dimension_numbers<[1], [0], [0], [1], [0, 0, 1, 1], [], []>} : vector<512x32xbf16>, vector<32x32xbf16>, vector<512x32xf32> -> vector<512x32xf32>
    %51 = vector.broadcast %5 : vector<1x32xf32> to vector<512x32xf32>
    %52 = arith.addf %50, %51 : vector<512x32xf32>
    %cst_28 = arith.constant 0.000000e+00 : f32
    %53 = vector.broadcast %cst_28 : f32 to vector<512x32xf32>
    %54 = arith.maximumf %52, %53 : vector<512x32xf32>
    %55 = arith.truncf %54 : vector<512x32xf32> to vector<512x32xbf16>
    %c2 = arith.constant 2 : index
    %c0_29 = arith.constant 0 : index
    %c0_30 = arith.constant 0 : index
    %56 = vector.load %arg8[%c2, %c0_29, %c0_30] : memref<3x32x32xbf16, #tpu.memory_space<vmem>>, vector<1x32x32xbf16>
    %57 = vector.shape_cast %56 : vector<1x32x32xbf16> to vector<32x32xbf16>
    %cst_31 = arith.constant dense<0.000000e+00> : vector<512x32xf32>
    %58 = tpu.matmul %55, %57, %cst_31 {dimension_numbers = #tpu.dot_dimension_numbers<[1], [0], [0], [1], [0, 0, 1, 1], [], []>} : vector<512x32xbf16>, vector<32x32xbf16>, vector<512x32xf32> -> vector<512x32xf32>
    %59 = vector.broadcast %6 : vector<1x32xf32> to vector<512x32xf32>
    %60 = arith.addf %58, %59 : vector<512x32xf32>
    %61 = vector.shape_cast %60 : vector<512x32xf32> to vector<4x128x32xf32>
    %cst_32 = arith.constant dense<0xFF800000> : vector<128x32xf32>
    %62 = vector.multi_reduction <maximumf>, %61, %cst_32 [0] : vector<4x128x32xf32> to vector<128x32xf32>
    %63 = vector.shape_cast %62 : vector<128x32xf32> to vector<1x128x32xf32>
    %64 = vector.broadcast %63 : vector<1x128x32xf32> to vector<4x128x32xf32>
    %65 = arith.subf %61, %64 : vector<4x128x32xf32>
    %66 = math.exp %65 : vector<4x128x32xf32>
    %cst_33 = arith.constant dense<0.000000e+00> : vector<128x32xf32>
    %67 = vector.multi_reduction <add>, %66, %cst_33 [0] : vector<4x128x32xf32> to vector<128x32xf32>
    %68 = vector.shape_cast %67 : vector<128x32xf32> to vector<1x128x32xf32>
    %69 = tpu.reciprocal %68 {approx = true} : vector<1x128x32xf32> -> vector<1x128x32xf32>
    %70 = vector.broadcast %69 : vector<1x128x32xf32> to vector<4x128x32xf32>
    %71 = arith.mulf %66, %70 : vector<4x128x32xf32>
    %72 = vector.extract_strided_slice %71 {offsets = [0, 0, 0], sizes = [1, 128, 32], strides = [1, 1, 1]} : vector<4x128x32xf32> to vector<1x128x32xf32>
    %73 = vector.shape_cast %72 : vector<1x128x32xf32> to vector<128x32xf32>
    %74 = tpu.transpose %73, [1, 0] : vector<128x32xf32> -> vector<32x128xf32>
    %75 = arith.truncf %74 : vector<32x128xf32> to vector<32x128xbf16>
    %c0_34 = arith.constant 0 : index
    %c0_35 = arith.constant 0 : index
    %c0_36 = arith.constant 0 : index
    %c0_37 = arith.constant 0 : index
    %76 = vector.load %arg13[%c0_34, %c0_35, %c0_36, %c0_37] : memref<1x4x32x128xbf16, #tpu.memory_space<vmem>>, vector<1x1x32x128xbf16>
    %77 = vector.shape_cast %76 : vector<1x1x32x128xbf16> to vector<32x128xbf16>
    %78 = vector.shape_cast %75 : vector<32x128xbf16> to vector<1x1x32x128xbf16>
    tpu.vector_store %arg13[%c0_34, %c0_35, %c0_36, %c0_37], %78 {strides = array<i32>} : memref<1x4x32x128xbf16, #tpu.memory_space<vmem>>, vector<1x1x32x128xbf16>,
    %79 = vector.extract_strided_slice %71 {offsets = [1, 0, 0], sizes = [1, 128, 32], strides = [1, 1, 1]} : vector<4x128x32xf32> to vector<1x128x32xf32>
    %80 = vector.shape_cast %79 : vector<1x128x32xf32> to vector<128x32xf32>
    %81 = tpu.transpose %80, [1, 0] : vector<128x32xf32> -> vector<32x128xf32>
    %82 = arith.truncf %81 : vector<32x128xf32> to vector<32x128xbf16>
    %c0_38 = arith.constant 0 : index
    %c1_39 = arith.constant 1 : index
    %c0_40 = arith.constant 0 : index
    %c0_41 = arith.constant 0 : index
    %83 = vector.load %arg13[%c0_38, %c1_39, %c0_40, %c0_41] : memref<1x4x32x128xbf16, #tpu.memory_space<vmem>>, vector<1x1x32x128xbf16>
    %84 = vector.shape_cast %83 : vector<1x1x32x128xbf16> to vector<32x128xbf16>
    %85 = vector.shape_cast %82 : vector<32x128xbf16> to vector<1x1x32x128xbf16>
    tpu.vector_store %arg13[%c0_38, %c1_39, %c0_40, %c0_41], %85 {strides = array<i32>} : memref<1x4x32x128xbf16, #tpu.memory_space<vmem>>, vector<1x1x32x128xbf16>,
    %86 = vector.extract_strided_slice %71 {offsets = [2, 0, 0], sizes = [1, 128, 32], strides = [1, 1, 1]} : vector<4x128x32xf32> to vector<1x128x32xf32>
    %87 = vector.shape_cast %86 : vector<1x128x32xf32> to vector<128x32xf32>
    %88 = tpu.transpose %87, [1, 0] : vector<128x32xf32> -> vector<32x128xf32>
    %89 = arith.truncf %88 : vector<32x128xf32> to vector<32x128xbf16>
    %c0_42 = arith.constant 0 : index
    %c2_43 = arith.constant 2 : index
    %c0_44 = arith.constant 0 : index
    %c0_45 = arith.constant 0 : index
    %90 = vector.load %arg13[%c0_42, %c2_43, %c0_44, %c0_45] : memref<1x4x32x128xbf16, #tpu.memory_space<vmem>>, vector<1x1x32x128xbf16>
    %91 = vector.shape_cast %90 : vector<1x1x32x128xbf16> to vector<32x128xbf16>
    %92 = vector.shape_cast %89 : vector<32x128xbf16> to vector<1x1x32x128xbf16>
    tpu.vector_store %arg13[%c0_42, %c2_43, %c0_44, %c0_45], %92 {strides = array<i32>} : memref<1x4x32x128xbf16, #tpu.memory_space<vmem>>, vector<1x1x32x128xbf16>,
    %93 = vector.extract_strided_slice %71 {offsets = [3, 0, 0], sizes = [1, 128, 32], strides = [1, 1, 1]} : vector<4x128x32xf32> to vector<1x128x32xf32>
    %94 = vector.shape_cast %93 : vector<1x128x32xf32> to vector<128x32xf32>
    %95 = tpu.transpose %94, [1, 0] : vector<128x32xf32> -> vector<32x128xf32>
    %96 = arith.truncf %95 : vector<32x128xf32> to vector<32x128xbf16>
    %c0_46 = arith.constant 0 : index
    %c3 = arith.constant 3 : index
    %c0_47 = arith.constant 0 : index
    %c0_48 = arith.constant 0 : index
    %97 = vector.load %arg13[%c0_46, %c3, %c0_47, %c0_48] : memref<1x4x32x128xbf16, #tpu.memory_space<vmem>>, vector<1x1x32x128xbf16>
    %98 = vector.shape_cast %97 : vector<1x1x32x128xbf16> to vector<32x128xbf16>
    %99 = vector.shape_cast %96 : vector<32x128xbf16> to vector<1x1x32x128xbf16>
    tpu.vector_store %arg13[%c0_46, %c3, %c0_47, %c0_48], %99 {strides = array<i32>} : memref<1x4x32x128xbf16, #tpu.memory_space<vmem>>, vector<1x1x32x128xbf16>,
    %100 = arith.addf %25, %41 : vector<4x128x32xf32>
    %101 = arith.mulf %71, %100 : vector<4x128x32xf32>
    %cst_49 = arith.constant dense<0.000000e+00> : vector<128x32xf32>
    %102 = vector.multi_reduction <add>, %101, %cst_49 [0] : vector<4x128x32xf32> to vector<128x32xf32>
    %103 = arith.truncf %102 : vector<128x32xf32> to vector<128x32xbf16>
    %c0_50 = arith.constant 0 : index
    %c0_51 = arith.constant 0 : index
    %104 = vector.load %arg9[%c0_50, %c0_51] : memref<32x8xbf16, #tpu.memory_space<vmem>>, vector<32x8xbf16>
    %cst_52 = arith.constant dense<0.000000e+00> : vector<128x8xf32>
    %105 = tpu.matmul %103, %104, %cst_52 {dimension_numbers = #tpu.dot_dimension_numbers<[1], [0], [0], [1], [0, 0, 1, 1], [], []>} : vector<128x32xbf16>, vector<32x8xbf16>, vector<128x8xf32> -> vector<128x8xf32>
    %c0_53 = arith.constant 0 : index
    %c0_54 = arith.constant 0 : index
    %106 = vector.load %arg11[%c0_53, %c0_54] : memref<1x8xf32, #tpu.memory_space<vmem>>, vector<1x8xf32>
    %107 = vector.broadcast %106 : vector<1x8xf32> to vector<128x8xf32>
    %108 = arith.addf %105, %107 : vector<128x8xf32>
    %109 = arith.addf %108, %8 : vector<128x8xf32>
    %110 = tpu.transpose %109, [1, 0] : vector<128x8xf32> -> vector<8x128xf32>
    %c0_55 = arith.constant 0 : index
    %c0_56 = arith.constant 0 : index
    %c0_57 = arith.constant 0 : index
    %111 = vector.load %arg12[%c0_55, %c0_56, %c0_57] : memref<1x8x128xf32, #tpu.memory_space<vmem>>, vector<1x8x128xf32>
    %112 = vector.shape_cast %111 : vector<1x8x128xf32> to vector<8x128xf32>
    %113 = vector.shape_cast %110 : vector<8x128xf32> to vector<1x8x128xf32>
    tpu.vector_store %arg12[%c0_55, %c0_56, %c0_57], %113 {strides = array<i32>} : memref<1x8x128xf32, #tpu.memory_space<vmem>>, vector<1x8x128xf32>,
    return
  }
  func.func @transform_0(%arg0: i32, %arg1: i32) -> (i32, i32, i32) {
    %c0_i32 = arith.constant 0 : i32
    %c0_i32_0 = arith.constant 0 : i32
    return %arg0, %arg1, %c0_i32 : i32, i32, i32
  }
  func.func @transform_1(%arg0: i32, %arg1: i32) -> (i32, i32, i32, i32) {
    %c0_i32 = arith.constant 0 : i32
    %c0_i32_0 = arith.constant 0 : i32
    %c0_i32_1 = arith.constant 0 : i32
    return %arg0, %c0_i32, %arg1, %c0_i32_0 : i32, i32, i32, i32
  }
  func.func @transform_2(%arg0: i32, %arg1: i32) -> (i32, i32, i32, i32) {
    %c0_i32 = arith.constant 0 : i32
    %c0_i32_0 = arith.constant 0 : i32
    %c0_i32_1 = arith.constant 0 : i32
    return %arg0, %c0_i32, %arg1, %c0_i32_0 : i32, i32, i32, i32
  }
  func.func @transform_3(%arg0: i32, %arg1: i32) -> (i32, i32) {
    %c0_i32 = arith.constant 0 : i32
    %c0_i32_0 = arith.constant 0 : i32
    %c0_i32_1 = arith.constant 0 : i32
    return %c0_i32, %c0_i32_0 : i32, i32
  }
  func.func @transform_4(%arg0: i32, %arg1: i32) -> (i32, i32) {
    %c0_i32 = arith.constant 0 : i32
    %c0_i32_0 = arith.constant 0 : i32
    %c0_i32_1 = arith.constant 0 : i32
    return %c0_i32, %c0_i32_0 : i32, i32
  }
  func.func @transform_5(%arg0: i32, %arg1: i32) -> (i32, i32) {
    %c0_i32 = arith.constant 0 : i32
    %c0_i32_0 = arith.constant 0 : i32
    %c0_i32_1 = arith.constant 0 : i32
    return %c0_i32, %c0_i32_0 : i32, i32
  }
  func.func @transform_6(%arg0: i32, %arg1: i32) -> (i32, i32, i32) {
    %c0_i32 = arith.constant 0 : i32
    %c0_i32_0 = arith.constant 0 : i32
    %c0_i32_1 = arith.constant 0 : i32
    %c0_i32_2 = arith.constant 0 : i32
    return %c0_i32, %c0_i32_0, %c0_i32_1 : i32, i32, i32
  }
  func.func @transform_7(%arg0: i32, %arg1: i32) -> (i32, i32) {
    %c0_i32 = arith.constant 0 : i32
    %c0_i32_0 = arith.constant 0 : i32
    %c0_i32_1 = arith.constant 0 : i32
    return %c0_i32, %c0_i32_0 : i32, i32
  }
  func.func @transform_8(%arg0: i32, %arg1: i32) -> (i32, i32) {
    %c0_i32 = arith.constant 0 : i32
    %c0_i32_0 = arith.constant 0 : i32
    %c0_i32_1 = arith.constant 0 : i32
    return %c0_i32, %c0_i32_0 : i32, i32
  }
  func.func @transform_9(%arg0: i32, %arg1: i32) -> (i32, i32) {
    %c0_i32 = arith.constant 0 : i32
    %c0_i32_0 = arith.constant 0 : i32
    %c0_i32_1 = arith.constant 0 : i32
    return %c0_i32, %c0_i32_0 : i32, i32
  }
  func.func @transform_10(%arg0: i32, %arg1: i32) -> (i32, i32, i32) {
    %c0_i32 = arith.constant 0 : i32
    %c0_i32_0 = arith.constant 0 : i32
    return %arg0, %c0_i32, %arg1 : i32, i32, i32
  }
  func.func @transform_11(%arg0: i32, %arg1: i32) -> (i32, i32, i32, i32) {
    %c0_i32 = arith.constant 0 : i32
    %c0_i32_0 = arith.constant 0 : i32
    %c0_i32_1 = arith.constant 0 : i32
    return %arg0, %c0_i32, %c0_i32_0, %arg1 : i32, i32, i32, i32
  }
}

</mosaic_0001>

<bundles_post_ra>
// kernel: transformer_block_pallas.1
= control target key start
LH: loop header
LB: loop body
LE: loop exit
PB: predicated region body
PF: predicated region fallthrough
CT: control target
= control target key end

     0   :  { %s9775_s0 = inlined_call_operand.vmem [shape: f32[4,128,8], index: 0, kind: input, shape index: {}]   ;;  %s9776_s1 = inlined_call_operand.vmem [shape: bf16[4,4,128,8], index: 1, kind: input, shape index: {}]   ;;  %s9777_s2 = inlined_call_operand.vmem [shape: bf16[4,4,128,8], index: 2, kind: input, shape index: {}]   ;;  %s9778_s3 = inlined_call_operand.vmem [shape: bf16[8,96], index: 3, kind: input, shape index: {}]   ;;  %s9779_s4 = inlined_call_operand.vmem [shape: f32[1,96], index: 4, kind: input, shape index: {}]   ;;  %s9780_s5 = inlined_call_operand.vmem [shape: bf16[8,32], index: 5, kind: input, shape index: {}]   ;;  %s9781_s6 = inlined_call_operand.vmem [shape: bf16[3,32,32], index: 6, kind: input, shape index: {}]   ;;  %s9782_s7 = inlined_call_operand.vmem [shape: bf16[32,8], index: 7, kind: input, shape index: {}]   ;;  %s9783_s8 = inlined_call_operand.vmem [shape: f32[4,32], index: 8, kind: input, shape index: {}]   ;;  %s9784_s9 = inlined_call_operand.vmem [shape: f32[1,8], index: 9, kind: input, shape index: {}]   ;;  %s9785_s10 = inlined_call_operand.hbm [shape: f32[4,8,128], index: 10, kind: output, shape index: {0}]   ;;  %s9786_s11 = inlined_call_operand.vmem [shape: bf16[4,4,32,128], index: 11, kind: output, shape index: {1}]  }
   0x1   :  { %9877 = sst [smem:[#allocation72_spill]] %s9775_s0 }
   0x2   :  { %9878 = sst [smem:[#allocation73_spill]] %s9776_s1 }
   0x3   :  { %9879 = sst [smem:[#allocation74_spill]] %s9777_s2 }
   0x4   :  { %17 = vsyncpa [#allocation3], 0 }
   0x5   :  { %19 = vsyncpa [#allocation3 + $0x1], 0  ;;  %s6801_s17 = smov 0   ;;  %s6803_s18 = smov 0  }
   0x6   :  { %s6805_s19 = smov 0   ;;  %s6807_s20 = smov 0  }
   0x7   :  { %s6809_s21 = smov 0   ;;  %s6811_s22 = smov 0  }
   0x8 LB: > { %s5307_s23 = sadd.s32 4294967295, %s6735_s22   ;;  %s5308_s24 = sadd.s32 4294967294, %s6735_s22   ;;  %s6735_s22 = sphi %s6811_s22, %s25_s22   ;;  %s6731_s21 = sphi %s6809_s21, %s10219_s21   ;;  %s6727_s20 = sphi %s6807_s20, %s10218_s20   ;;  %s6723_s19 = sphi %s6805_s19, %s10217_s19   ;;  %s6719_s18 = sphi %s6803_s18, %s10216_s18   ;;  %s6715_s17 = sphi %s6801_s17, %s10215_s17  }
   0x9   : > { %s37_s25 = sadd.s32 1, %s6731_s21  ;;  %s277_s26 = sadd.s32 1, %s6723_s19 }
   0xa   : > { %p39_p0 = scmp.ge.s32.totalorder %s37_s25, 4  ;;  %p287_p1 = scmp.ne.s32.totalorder %s6723_s19, %s6719_s18 }
   0xb   : > { %p288_p2 = scmp.eq.s32.totalorder %s5307_s23, 3  ;;  %p293_p3 = scmp.ne.s32.totalorder %s6719_s18, %s6715_s17 }
   0xc   : > { %s10221_s25 = smov (%p39_p0, %s37_s25), 0  ;;  %p294_p5 = scmp.eq.s32.totalorder %s5308_s24, 3 }
   0xd   : > { %p6841_p4 = por %p288_p2, %p287_p1  ;;  %s272_s28 = ssub.s32 %s6731_s21, %s10221_s25 }
   0xe   : > { %p5311_p6 = scmp.ge.s32.totalorder %s6735_s22, 1  ;;  %p275_p7 = scmp.eq.s32.totalorder %s272_s28, 0 }
   0xf   : > { %p6848_p8 = por %p294_p5, %p293_p3  ;;  %p400_p9 = scmp.lt.s32.totalorder %s6735_s22, 5 }
  0x10   : > { %s6854_s30 = scalar_select %p275_p7, %s6723_s19, %s277_s26  }
  0x11   : > { %p401_p10 = pnand %p5311_p6, %p400_p9 }
  0x13   : > { %404 = sbr.rel (%p401_p10) target bundleno = 1576 (0x628), region = 60 }
  0x18   : > { %v6859_v0 = vld [vmem:[%s9778_s3] sm:$0xf]  ;;  %vm574_vm0 = vcmask 1043456   ;;  %p471_p11 = scmp.lt.s32.totalorder %s6727_s20, 3  ;;  %s6737_s15 = smov 64   ;;  %vm549_vm1 = vcmask 64512  }
  0x19   : > { %v5322_v1 = vcombine.low %v6859_v0, %v6859_v0  ;;  %6244 = vmatprep.subr.msk.bf16.mxu1 %vm574_vm0, %v6859_v0  ;;  %v6868_v2 = vsel %vm574_vm0, %v6859_v0, 0  ;;  %s9882_s1 = sld [smem:[#allocation73_spill]]  ;;  %v6936_v23 = vld [vmem:[%s9779_s4] ss:$0 sm:$0xff]  ;;  %v6469_v61 = vld [vmem:[%s9781_s6 + $0x8] sm:$0xff]   ;;  %vm2021_vm2 = vcmask 261120  }
  0x1a   : > { %6241 = vmatpush3.bf16.msra.mxu1 %v6868_v2  ;;  %s6872_s14 = scalar_select %p471_p11, %s6727_s20, 3  ;;  %v1352_v39 = vld [vmem:[%s9780_s5] sm:$0xf] }
  0x1b   : > { %544 = vrot.lane.b32.xlu0 %v5322_v1, %s6737_s15  ;;  %s9883_s0 = sld [smem:[#allocation72_spill]]  ;;  %v1614_v58 = vsel %vm574_vm0, %v1352_v39, 0  ;;  %6016 = vmatprep.subr.bf16.mxu1 %v6469_v61  ;;  %s6739_s13 = smov 96  }
  0x1c   : > { %s5613_s16 = sshll.u32 %s6872_s14, 8  ;;  %s5612_s28 = sshll.u32 %s6872_s14, 7 }
  0x1d   : > { %s9884_s2 = sld [smem:[#allocation74_spill]] }
  0x1f   : > { %s6881_s26 = scalar_lea.vmem %s9882_s1, %s5613_s16  ;;  %546 = vrot.lane.b32.xlu0 %v6936_v23, %s6737_s15  ;;  %s6738_s15 = smov 32  }
  0x20   : > { %v6409_v3 = vld [vmem:[%s6881_s26 + $0x40] sm:$0xff]   ;;  %v6410_v4 = vld [vmem:[%s6881_s26 + $0x48] sm:$0xff]   ;;  %v6411_v5 = vld [vmem:[%s6881_s26 + $0x50] sm:$0xff]  }
  0x21   : > { %5902 = vmatprep.mubr.msk.bf16.mxu1 %vm549_vm1, %v6409_v3  ;;  %v6412_v6 = vld [vmem:[%s6881_s26 + $0x58] sm:$0xff]   ;;  %v6413_v7 = vld [vmem:[%s6881_s26 + $0x60] sm:$0xff]   ;;  %s6897_s23 = scalar_lea.vmem %s9883_s0, %s5612_s28  ;;  %v6414_v8 = vld [vmem:[%s6881_s26 + $0x68] sm:$0xff]  }
  0x22   : > { %5903 = vmatmul.mubr.msk.bf16.vlgmr.msra.gmra.mxu1 %vm549_vm1, %v6410_v4  ;;  %v6415_v9 = vld [vmem:[%s6881_s26 + $0x70] sm:$0xff]   ;;  %v512_v10 = vld [vmem:[%s6897_s23] sm:$0xff]  ;;  %v513_v11 = vld [vmem:[%s6897_s23 + $0x8] sm:$0xff] }
  0x23   : > { %5906 = vmatprep.mubr.msk.bf16.mxu1 %vm549_vm1, %v6411_v5  ;;  %v528_v12 = vpack.c.bf16 %v513_v11, %v512_v10  ;;  %v6416_v13 = vld [vmem:[%s6881_s26 + $0x78] sm:$0xff]   ;;  %v6417_v14 = vld [vmem:[%s6881_s26 + $0x80] sm:$0xff]   ;;  %v6418_v15 = vld [vmem:[%s6881_s26 + $0x88] sm:$0xff]   ;;  %s6918_s12 = scalar_lea.vmem %s9884_s2, %s5613_s16  ;;  %6017 = vmatpush3.bf16.msra.mxu1 %v6469_v61  ;;  %s457_s16 = sand.u32 1, %s6719_s18  }
  0x24   : > { %v6419_v16 = vld [vmem:[%s6881_s26 + $0x90] sm:$0xff]   ;;  %v6420_v17 = vld [vmem:[%s6881_s26 + $0x98] sm:$0xff]   ;;  %v6421_v18 = vld [vmem:[%s6881_s26 + $0xa0] sm:$0xff]   ;;  %s5136_s0 = scalar_lea.sflag [#allocation3], %s457_s16 }
  0x25   : > { %5868 = vmatprep.mubr.msk.bf16.mxu0 %vm549_vm1, %v528_v12  ;;  %v6422_v19 = vld [vmem:[%s6881_s26 + $0xa8] sm:$0xff]   ;;  %v6423_v20 = vld [vmem:[%s6881_s26 + $0xb0] sm:$0xff]   ;;  %v6424_v21 = vld [vmem:[%s6881_s26 + $0xb8] sm:$0xff]  }
  0x26   : > { %v6425_v22 = vld [vmem:[%s6881_s26 + $0xc0] sm:$0xff]   ;;  %v6426_v24 = vld [vmem:[%s6881_s26 + $0xc8] sm:$0xff]   ;;  %v6427_v25 = vld [vmem:[%s6881_s26 + $0xd0] sm:$0xff]  }
  0x27   : > { %v6428_v26 = vld [vmem:[%s6881_s26 + $0xd8] sm:$0xff]   ;;  %v6429_v27 = vld [vmem:[%s6881_s26 + $0xe0] sm:$0xff]   ;;  %v6430_v28 = vld [vmem:[%s6881_s26 + $0xe8] sm:$0xff]  }
  0x28   : > { %v6431_v29 = vld [vmem:[%s6881_s26 + $0xf0] sm:$0xff]   ;;  %v6432_v30 = vld [vmem:[%s6881_s26 + $0xf8] sm:$0xff]   ;;  %v516_v33 = vld [vmem:[%s6897_s23 + $0x20] sm:$0xff] }
  0x29   : > { %v514_v31 = vld [vmem:[%s6897_s23 + $0x10] sm:$0xff]  ;;  %v515_v32 = vld [vmem:[%s6897_s23 + $0x18] sm:$0xff]  ;;  %v517_v34 = vld [vmem:[%s6897_s23 + $0x28] sm:$0xff] }
  0x2a   : > { %5907 = vmatmul.mubr.msk.bf16.gmra.mxu1 %vm549_vm1, %v6412_v6  ;;  %v529_v37 = vpack.c.bf16 %v515_v32, %v514_v31  ;;  %v530_v38 = vpack.c.bf16 %v517_v34, %v516_v33  ;;  %v518_v40 = vld [vmem:[%s6897_s23 + $0x30] sm:$0xff]  ;;  %v519_v41 = vld [vmem:[%s6897_s23 + $0x38] sm:$0xff]  ;;  %v520_v42 = vld [vmem:[%s6897_s23 + $0x40] sm:$0xff] }
  0x2b   : > { %5910 = vmatprep.mubr.msk.bf16.mxu1 %vm549_vm1, %v6413_v7  ;;  %v521_v43 = vld [vmem:[%s6897_s23 + $0x48] sm:$0xff]  ;;  %v531_v44 = vpack.c.bf16 %v519_v41, %v518_v40  ;;  %v522_v46 = vld [vmem:[%s6897_s23 + $0x50] sm:$0xff]  ;;  %v523_v47 = vld [vmem:[%s6897_s23 + $0x58] sm:$0xff] }
  0x2c   : > { %v532_v45 = vpack.c.bf16 %v521_v43, %v520_v42  ;;  %v524_v48 = vld [vmem:[%s6897_s23 + $0x60] sm:$0xff]  ;;  %v525_v49 = vld [vmem:[%s6897_s23 + $0x68] sm:$0xff]  ;;  %v533_v50 = vpack.c.bf16 %v523_v47, %v522_v46  ;;  %v526_v52 = vld [vmem:[%s6897_s23 + $0x70] sm:$0xff] }
  0x2d   : > { %v534_v51 = vpack.c.bf16 %v525_v49, %v524_v48  ;;  %v527_v53 = vld [vmem:[%s6897_s23 + $0x78] sm:$0xff]  ;;  %v6433_v55 = vld [vmem:[%s6881_s26] sm:$0xff]   ;;  %v6434_v56 = vld [vmem:[%s6881_s26 + $0x8] sm:$0xff]  }
  0x2e   : > { %v535_v54 = vpack.c.bf16 %v527_v53, %v526_v52  ;;  %v6435_v57 = vld [vmem:[%s6881_s26 + $0x10] sm:$0xff]   ;;  %v6436_v59 = vld [vmem:[%s6881_s26 + $0x18] sm:$0xff]   ;;  %v6437_v60 = vld [vmem:[%s6881_s26 + $0x20] sm:$0xff]  }
  0x2f   : > { %v6438_v62 = vld [vmem:[%s6881_s26 + $0x28] sm:$0xff]   ;;  %v6439_v63 = vld [vmem:[%s6881_s26 + $0x30] sm:$0xff]   ;;  %v6441_v1 = vld [vmem:[%s6918_s12] sm:$0xff]  }
  0x30   : > { %v6443_v3 = vld [vmem:[%s6918_s12 + $0x10] sm:$0xff]   ;;  %v6444_v4 = vld [vmem:[%s6918_s12 + $0x18] sm:$0xff]   ;;  %v6445_v5 = vld [vmem:[%s6918_s12 + $0x20] sm:$0xff]  }
  0x31   : > { %v6446_v6 = vld [vmem:[%s6918_s12 + $0x28] sm:$0xff]   ;;  %v6447_v7 = vld [vmem:[%s6918_s12 + $0x30] sm:$0xff]   ;;  %v6474_v12 = vld [vmem:[%s9781_s6] sm:$0xff]  }
  0x32   : > { %5911 = vmatmul.mubr.msk.bf16.gmra.mxu1 %vm549_vm1, %v6414_v8  ;;  %v6448_v8 = vld [vmem:[%s6918_s12 + $0x38] sm:$0xff]   ;;  %v6450_v10 = vld [vmem:[%s6918_s12 + $0x48] sm:$0xff]   ;;  %v6451_v11 = vld [vmem:[%s6918_s12 + $0x50] sm:$0xff]   ;;  %6018 = vmatprep.subr.bf16.mxu1 %v6474_v12 }
  0x33   : > { %5914 = vmatprep.mubr.msk.bf16.mxu1 %vm549_vm1, %v6415_v9  ;;  %v6449_v9 = vld [vmem:[%s6918_s12 + $0x40] sm:$0xff]   ;;  %6019 = vmatpush3.bf16.msra.mxu1 %v6474_v12  ;;  %v6471_v32 = vld [vmem:[%s6918_s12 + $0xe8] sm:$0xff]   ;;  %v6472_v33 = vld [vmem:[%s6918_s12 + $0xf0] sm:$0xff]  }
  0x34   : > { %v6470_v31 = vld [vmem:[%s6918_s12 + $0xe0] sm:$0xff]   ;;  %v6473_v34 = vld [vmem:[%s6918_s12 + $0xf8] sm:$0xff]  }
  0x35   : > { %v6475_v52 = vld [vmem:[%s9781_s6 + $0x18] sm:$0xff]  }
  0x3a   : > { %5915 = vmatmul.mubr.msk.bf16.gmra.mxu1 %vm549_vm1, %v6416_v13  ;;  %v6452_v13 = vld [vmem:[%s6918_s12 + $0x58] sm:$0xff]  }
  0x3b   : > { %5918 = vmatprep.mubr.msk.bf16.mxu1 %vm549_vm1, %v6417_v14  ;;  %v6453_v14 = vld [vmem:[%s6918_s12 + $0x60] sm:$0xff]  }
  0x42   : > { %5919 = vmatmul.mubr.msk.bf16.gmra.mxu1 %vm549_vm1, %v6418_v15  ;;  %v6454_v15 = vld [vmem:[%s6918_s12 + $0x68] sm:$0xff]  }
  0x43   : > { %5922 = vmatprep.mubr.msk.bf16.mxu1 %vm549_vm1, %v6419_v16  ;;  %v6455_v16 = vld [vmem:[%s6918_s12 + $0x70] sm:$0xff]  }
  0x4a   : > { %5923 = vmatmul.mubr.msk.bf16.gmra.mxu1 %vm549_vm1, %v6420_v17  ;;  %v6456_v17 = vld [vmem:[%s6918_s12 + $0x78] sm:$0xff]  }
  0x4b   : > { %5926 = vmatprep.mubr.msk.bf16.mxu1 %vm549_vm1, %v6421_v18  ;;  %v6457_v18 = vld [vmem:[%s6918_s12 + $0x80] sm:$0xff]  }
  0x52   : > { %5927 = vmatmul.mubr.msk.bf16.gmra.mxu1 %vm549_vm1, %v6422_v19  ;;  %v6458_v19 = vld [vmem:[%s6918_s12 + $0x88] sm:$0xff]  }
  0x53   : > { %5930 = vmatprep.mubr.msk.bf16.mxu1 %vm549_vm1, %v6423_v20  ;;  %v6459_v20 = vld [vmem:[%s6918_s12 + $0x90] sm:$0xff]  }
  0x5a   : > { %5931 = vmatmul.mubr.msk.bf16.gmra.mxu1 %vm549_vm1, %v6424_v21  ;;  %v6460_v21 = vld [vmem:[%s6918_s12 + $0x98] sm:$0xff]  }
  0x5b   : > { %5934 = vmatprep.mubr.msk.bf16.mxu1 %vm549_vm1, %v6425_v22  ;;  %v6461_v22 = vld [vmem:[%s6918_s12 + $0xa0] sm:$0xff]  }
  0x62   : > { %5935 = vmatmul.mubr.msk.bf16.gmra.mxu1 %vm549_vm1, %v6426_v24  ;;  %v6462_v24 = vld [vmem:[%s6918_s12 + $0xa8] sm:$0xff]  }
  0x63   : > { %5938 = vmatprep.mubr.msk.bf16.mxu1 %vm549_vm1, %v6427_v25  ;;  %v6463_v25 = vld [vmem:[%s6918_s12 + $0xb0] sm:$0xff]  }
  0x6a   : > { %5939 = vmatmul.mubr.msk.bf16.gmra.mxu1 %vm549_vm1, %v6428_v26  ;;  %v6464_v26 = vld [vmem:[%s6918_s12 + $0xb8] sm:$0xff]  }
  0x6b   : > { %5942 = vmatprep.mubr.msk.bf16.mxu1 %vm549_vm1, %v6429_v27  ;;  %v6465_v27 = vld [vmem:[%s6918_s12 + $0xc0] sm:$0xff]  }
  0x72   : > { %5943 = vmatmul.mubr.msk.bf16.gmra.mxu1 %vm549_vm1, %v6430_v28  ;;  %v6466_v28 = vld [vmem:[%s6918_s12 + $0xc8] sm:$0xff]  }
  0x73   : > { %5946 = vmatprep.mubr.msk.bf16.mxu1 %vm549_vm1, %v6431_v29  ;;  %v6467_v29 = vld [vmem:[%s6918_s12 + $0xd0] sm:$0xff]  }
  0x7a   : > { %5947 = vmatmul.mubr.msk.bf16.gmra.mxu1 %vm549_vm1, %v6432_v30  ;;  %v6468_v30 = vld [vmem:[%s6918_s12 + $0xd8] sm:$0xff]  }
  0x8d   : > { %v545_v35 = vpop.permute.xlu0 %544 }
  0x8e   : > { %6242 = vmatprep.subr.msk.bf16.mxu0 %vm574_vm0, %v545_v35  ;;  %v576_v36 = vsel %vm574_vm0, %v545_v35, 0 }
  0x8f   : > { %5867 = vmatpush3.bf16.msra.mxu0 %v576_v36 }
  0x90   : > { %6243 = vmatprep.subr.msk.bf16.mxu0 %vm574_vm0, %v6859_v0  ;;  %v6440_v0 = vld [vmem:[%s6881_s26 + $0x38] sm:$0xff]   ;;  %s5312_s26 = sshll.u32 %s457_s16, 3 }
  0x92   : > { %5869 = vmatmul.mubr.msk.bf16.vlgmr.msra.gmra.mxu0 %vm549_vm1, %v529_v37 }
  0x93   : > { %5885 = vmatpush3.bf16.msra.mxu0 %v6868_v2  ;;  %5872 = vmatprep.mubr.msk.bf16.mxu0 %vm549_vm1, %v530_v38  ;;  %v6442_v2 = vld [vmem:[%s6918_s12 + $0x8] sm:$0xff]  }
  0x94   : > { %6245 = vmatprep.subr.msk.bf16.mxu0 %vm574_vm0, %v1352_v39 }
  0x9a   : > { %5873 = vmatmul.mubr.msk.bf16.gmra.mxu0 %vm549_vm1, %v531_v44 }
  0x9b   : > { %5876 = vmatprep.mubr.msk.bf16.mxu0 %vm549_vm1, %v532_v45 }
  0xa2   : > { %5877 = vmatmul.mubr.msk.bf16.gmra.mxu0 %vm549_vm1, %v533_v50 }
  0xa3   : > { %5880 = vmatprep.mubr.msk.bf16.mxu0 %vm549_vm1, %v534_v51 }
  0xaa   : > { %5881 = vmatmul.mubr.msk.bf16.gmra.mxu0 %vm549_vm1, %v535_v54 }
  0xab   : > { %5886 = vmatprep.mubr.msk.bf16.mxu0 %vm549_vm1, %v6433_v55 }
  0xb2   : > { %5887 = vmatmul.mubr.msk.bf16.vlgmr.msra.gmra.mxu0 %vm549_vm1, %v6434_v56 }
  0xb3   : > { %5951 = vmatpush3.bf16.msra.mxu0 %v1614_v58  ;;  %5890 = vmatprep.mubr.msk.bf16.mxu0 %vm549_vm1, %v6435_v57 }
  0xb4   : > { %6084 = vmatprep.subr.bf16.mxu0 %v6475_v52 }
  0xba   : > { %5891 = vmatmul.mubr.msk.bf16.gmra.mxu0 %vm549_vm1, %v6436_v59 }
  0xbb   : > { %5894 = vmatprep.mubr.msk.bf16.mxu0 %vm549_vm1, %v6437_v60 }
  0xc2   : > { %5895 = vmatmul.mubr.msk.bf16.gmra.mxu0 %vm549_vm1, %v6438_v62 }
  0xc3   : > { %5898 = vmatprep.mubr.msk.bf16.mxu0 %vm549_vm1, %v6439_v63 }
  0xca   : > { %5899 = vmatmul.mubr.msk.bf16.gmra.mxu0 %vm549_vm1, %v6440_v0  ;;  %v1353_v0 = vlaneseq }
  0xcb   : > { %5952 = vmatprep.mubr.msk.bf16.mxu0 %vm549_vm1, %v6441_v1 }
  0xd2   : > { %5953 = vmatmul.mubr.msk.bf16.vlgmr.msra.gmra.mxu0 %vm549_vm1, %v6442_v2 }
  0xd3   : > { %5956 = vmatprep.mubr.msk.bf16.mxu0 %vm549_vm1, %v6443_v3  ;;  %6085 = vmatpush3.bf16.msra.mxu0 %v6475_v52  ;;  %v7134_v3 = vshrl.u32 %v1353_v0, 7 }
  0xd5   : > { %9885 = vst [vmem:[#allocation5_spill] sm:$0xff] %v7134_v3 }
  0xda   : > { %5957 = vmatmul.mubr.msk.bf16.gmra.mxu0 %vm549_vm1, %v6444_v4 }
  0xdb   : > { %5960 = vmatprep.mubr.msk.bf16.mxu0 %vm549_vm1, %v6445_v5 }
  0xe2   : > { %5961 = vmatmul.mubr.msk.bf16.gmra.mxu0 %vm549_vm1, %v6446_v6  ;;  %v1355_v6 = vsub.s32 0, %v7134_v3 }
  0xe3   : > { %5964 = vmatprep.mubr.msk.bf16.mxu0 %vm549_vm1, %v6447_v7  ;;  %v7144_v7 = vld [vmem:[%s9783_s8] sm:$0xf] }
  0xea   : > { %5965 = vmatmul.mubr.msk.bf16.gmra.mxu0 %vm549_vm1, %v6448_v8 }
  0xeb   : > { %5968 = vmatprep.mubr.msk.bf16.mxu0 %vm549_vm1, %v6449_v9  ;;  %v7147_v9 = vrot.slane %v7144_v7, %v1355_v6 }
  0xf2   : > { %5969 = vmatmul.mubr.msk.bf16.gmra.mxu0 %vm549_vm1, %v6450_v10 }
  0xf3   : > { %5972 = vmatprep.mubr.msk.bf16.mxu0 %vm549_vm1, %v6451_v11 }
  0xfa   : > { %5973 = vmatmul.mubr.msk.bf16.gmra.mxu0 %vm549_vm1, %v6452_v13 }
  0xfb   : > { %5976 = vmatprep.mubr.msk.bf16.mxu0 %vm549_vm1, %v6453_v14 }
 0x102   : > { %5977 = vmatmul.mubr.msk.bf16.gmra.mxu0 %vm549_vm1, %v6454_v15 }
 0x103   : > { %5980 = vmatprep.mubr.msk.bf16.mxu0 %vm549_vm1, %v6455_v16  ;;  %v6476_v16 = vld [vmem:[%s9781_s6 + $0x10] sm:$0xff]  }
 0x104   : > { %6086 = vmatprep.subr.bf16.mxu0 %v6476_v16 }
 0x105   : > { %6087 = vmatpush3.bf16.msra.mxu0 %v6476_v16 }
 0x10a   : > { %5981 = vmatmul.mubr.msk.bf16.gmra.mxu0 %vm549_vm1, %v6456_v17 }
 0x10b   : > { %5984 = vmatprep.mubr.msk.bf16.mxu0 %vm549_vm1, %v6457_v18 }
 0x112   : > { %5985 = vmatmul.mubr.msk.bf16.gmra.mxu0 %vm549_vm1, %v6458_v19 }
 0x113   : > { %5988 = vmatprep.mubr.msk.bf16.mxu0 %vm549_vm1, %v6459_v20 }
 0x11a   : > { %5989 = vmatmul.mubr.msk.bf16.gmra.mxu0 %vm549_vm1, %v6460_v21 }
 0x11b   : > { %5992 = vmatprep.mubr.msk.bf16.mxu0 %vm549_vm1, %v6461_v22 }
 0x122   : > { %5993 = vmatmul.mubr.msk.bf16.gmra.mxu0 %vm549_vm1, %v6462_v24 }
 0x123   : > { %5996 = vmatprep.mubr.msk.bf16.mxu0 %vm549_vm1, %v6463_v25 }
 0x12a   : > { %5997 = vmatmul.mubr.msk.bf16.gmra.mxu0 %vm549_vm1, %v6464_v26 }
 0x12b   : > { %6000 = vmatprep.mubr.msk.bf16.mxu0 %vm549_vm1, %v6465_v27 }
 0x132   : > { %6001 = vmatmul.mubr.msk.bf16.gmra.mxu0 %vm549_vm1, %v6466_v28 }
 0x133   : > { %6004 = vmatprep.mubr.msk.bf16.mxu0 %vm549_vm1, %v6467_v29 }
 0x13a   : > { %6005 = vmatmul.mubr.msk.bf16.gmra.mxu0 %vm549_vm1, %v6468_v30 }
 0x13b   : > { %6008 = vmatprep.mubr.msk.bf16.mxu0 %vm549_vm1, %v6470_v31 }
 0x142   : > { %6009 = vmatmul.mubr.msk.bf16.gmra.mxu0 %vm549_vm1, %v6471_v32 }
 0x143   : > { %6012 = vmatprep.mubr.msk.bf16.mxu0 %vm549_vm1, %v6472_v33  ;;  %v7162_v33 = vpop.f32.mrf.mxu1 }
 0x14a   : > { %6013 = vmatmul.mubr.msk.bf16.gmra.mxu0 %vm549_vm1, %v6473_v34 }
 0x152   : > { %v7071_v35 = vpop.f32.mrf.mxu0 }
 0x154   : > { %v7073_v36 = vpop.f32.mrf.mxu0 }
 0x156   : > { %v7075_v37 = vpop.f32.mrf.mxu0 }
 0x158   : > { %v7077_v38 = vpop.f32.mrf.mxu0 }
 0x15a   : > { %v7079_v39 = vpop.f32.mrf.mxu0 }
 0x15c   : > { %v7081_v40 = vpop.f32.mrf.mxu0 }
 0x15e   : > { %v7083_v41 = vpop.f32.mrf.mxu0 }
 0x160   : > { %v7085_v42 = vpop.f32.mrf.mxu0 }
 0x162   : > { %v7087_v43 = vpop.f32.mrf.mxu0 }
 0x164   : > { %v7089_v44 = vpop.f32.mrf.mxu0 }
 0x166   : > { %v7091_v45 = vpop.f32.mrf.mxu0 }
 0x168   : > { %v7093_v46 = vpop.f32.mrf.mxu0 }
 0x16a   : > { %v7095_v47 = vpop.f32.mrf.mxu0 }
 0x16c   : > { %v7097_v48 = vpop.f32.mrf.mxu0 }
 0x16e   : > { %v7099_v49 = vpop.f32.mrf.mxu0 }
 0x170   : > { %v7101_v50 = vpop.f32.mrf.mxu0 }
 0x172   : > { %v7103_v51 = vpop.f32.mrf.mxu0 }
 0x174   : > { %v7108_v53 = vpop.f32.mrf.mxu0 }
 0x176   : > { %v7110_v54 = vpop.f32.mrf.mxu0 }
 0x178   : > { %v7112_v55 = vpop.f32.mrf.mxu0 }
 0x17a   : > { %v7114_v56 = vpop.f32.mrf.mxu0 }
 0x17c   : > { %v7116_v57 = vpop.f32.mrf.mxu0 }
 0x17e   : > { %v7118_v58 = vpop.f32.mrf.mxu0 }
 0x180   : > { %v7120_v59 = vpop.f32.mrf.mxu0 }
 0x182   : > { %v7122_v60 = vpop.f32.mrf.mxu0 }
 0x184   : > { %v7124_v61 = vpop.f32.mrf.mxu0 }
 0x186   : > { %v7126_v62 = vpop.f32.mrf.mxu0 }
 0x188   : > { %v7128_v63 = vpop.f32.mrf.mxu0 }
 0x18a   : > { %v7130_v1 = vpop.f32.mrf.mxu0 }
 0x18c   : > { %v7132_v2 = vpop.f32.mrf.mxu0 }
 0x18e   : > { %v7136_v4 = vpop.f32.mrf.mxu0 }
 0x190   : > { %v7138_v5 = vpop.f32.mrf.mxu0 }
 0x192   : > { %v5954_v8 = vpop.f32.mrf.mxu0 }
 0x193   : > { %v1659_v14 = vadd.f32 %v5954_v8, %v7147_v9 }
 0x194   : > { %v1650_v10 = vpop.f32.mrf.mxu0 }
 0x195   : > { %v1651_v12 = vadd.f32 %v1650_v10, %v7147_v9  ;;  %v1907_v22 = vmax.f32 %v1659_v14, 0.0 }
 0x196   : > { %v5955_v11 = vpop.f32.mrf.mxu0 }
 0x197   : > { %v1662_v13 = vadd.f32 %v5955_v11, %v7147_v9  ;;  %v1905_v20 = vmax.f32 %v1651_v12, 0.0  ;;  %v7164_v12 = vpop.f32.mrf.mxu1 }
 0x198   : > { %v1653_v15 = vpop.f32.mrf.mxu0 }
 0x199   : > { %v1654_v17 = vadd.f32 %v1653_v15, %v7147_v9  ;;  %v1908_v18 = vmax.f32 %v1662_v13, 0.0 }
 0x19a   : > { %v5958_v19 = vpop.f32.mrf.mxu0 }
 0x19b   : > { %v1906_v21 = vmax.f32 %v1654_v17, 0.0  ;;  %v1970_v26 = vpack.c.bf16 %v1908_v18, %v1907_v22  ;;  %v1675_v30 = vadd.f32 %v5958_v19, %v7147_v9 }
 0x19c   : > { %v1666_v24 = vpop.f32.mrf.mxu0 }
 0x19d   : > { %v1969_v25 = vpack.c.bf16 %v1906_v21, %v1905_v20  ;;  %v1667_v28 = vadd.f32 %v1666_v24, %v7147_v9  ;;  %v1911_v8 = vmax.f32 %v1675_v30, 0.0  ;;  %v7172_v20 = vpop.f32.mrf.mxu1 }
 0x19e   : > { %v5959_v27 = vpop.f32.mrf.mxu0 }
 0x19f   : > { %v1678_v29 = vadd.f32 %v5959_v27, %v7147_v9  ;;  %6020 = vmatprep.mubr.msk.bf16.mxu1 %vm2021_vm2, %v1969_v25  ;;  %v1909_v0 = vmax.f32 %v1667_v28, 0.0 }
 0x1a0   : > { %v1669_v31 = vpop.f32.mrf.mxu0  ;;  %6021 = vmatmul.mubr.msk.bf16.vlgmr.msra.gmra.mxu1 %vm2021_vm2, %v1970_v26 }
 0x1a1   : > { %v1670_v32 = vadd.f32 %v1669_v31, %v7147_v9  ;;  %v1912_v34 = vmax.f32 %v1678_v29, 0.0  ;;  %v7174_v29 = vpop.f32.mrf.mxu1 }
 0x1a2   : > { %v5962_v52 = vpop.f32.mrf.mxu0 }
 0x1a3   : > { %v1910_v6 = vmax.f32 %v1670_v32, 0.0  ;;  %v1972_v13 = vpack.c.bf16 %v1912_v34, %v1911_v8  ;;  %v1691_v17 = vadd.f32 %v5962_v52, %v7147_v9  ;;  %v7182_v8 = vpop.f32.mrf.mxu1 }
 0x1a4   : > { %v1682_v10 = vpop.f32.mrf.mxu0 }
 0x1a5   : > { %v1971_v11 = vpack.c.bf16 %v1910_v6, %v1909_v0  ;;  %v1683_v15 = vadd.f32 %v1682_v10, %v7147_v9  ;;  %v1915_v26 = vmax.f32 %v1691_v17, 0.0 }
 0x1a6   : > { %v5963_v14 = vpop.f32.mrf.mxu0 }
 0x1a7   : > { %v1694_v16 = vadd.f32 %v5963_v14, %v7147_v9  ;;  %6024 = vmatprep.mubr.msk.bf16.mxu1 %vm2021_vm2, %v1971_v11  ;;  %v1913_v24 = vmax.f32 %v1683_v15, 0.0 }
 0x1a8   : > { %v1685_v18 = vpop.f32.mrf.mxu0  ;;  %6025 = vmatmul.mubr.msk.bf16.gmra.mxu1 %vm2021_vm2, %v1972_v13 }
 0x1a9   : > { %v1686_v19 = vadd.f32 %v1685_v18, %v7147_v9  ;;  %v1916_v21 = vmax.f32 %v1694_v16, 0.0  ;;  %v7184_v18 = vpop.f32.mrf.mxu1 }
 0x1aa   : > { %v5966_v22 = vpop.f32.mrf.mxu0 }
 0x1ab   : > { %v1914_v25 = vmax.f32 %v1686_v19, 0.0  ;;  %v1974_v30 = vpack.c.bf16 %v1916_v21, %v1915_v26  ;;  %v1707_v52 = vadd.f32 %v5966_v22, %v7147_v9 }
 0x1ac   : > { %v1698_v27 = vpop.f32.mrf.mxu0 }
 0x1ad   : > { %v1973_v28 = vpack.c.bf16 %v1914_v25, %v1913_v24  ;;  %v1699_v32 = vadd.f32 %v1698_v27, %v7147_v9  ;;  %v1919_v15 = vmax.f32 %v1707_v52, 0.0 }
 0x1ae   : > { %v5967_v31 = vpop.f32.mrf.mxu0 }
 0x1af   : > { %v1710_v34 = vadd.f32 %v5967_v31, %v7147_v9  ;;  %6028 = vmatprep.mubr.msk.bf16.mxu1 %vm2021_vm2, %v1973_v28  ;;  %v1917_v13 = vmax.f32 %v1699_v32, 0.0  ;;  %v7192_v28 = vpop.f32.mrf.mxu1 }
 0x1b0   : > { %v1701_v0 = vpop.f32.mrf.mxu0  ;;  %6029 = vmatmul.mubr.msk.bf16.gmra.mxu1 %vm2021_vm2, %v1974_v30 }
 0x1b1   : > { %v1702_v6 = vadd.f32 %v1701_v0, %v7147_v9  ;;  %v1920_v10 = vmax.f32 %v1710_v34, 0.0 }
 0x1b2   : > { %v5970_v11 = vpop.f32.mrf.mxu0 }
 0x1b3   : > { %v1918_v14 = vmax.f32 %v1702_v6, 0.0  ;;  %v1976_v19 = vpack.c.bf16 %v1920_v10, %v1919_v15  ;;  %v1723_v25 = vadd.f32 %v5970_v11, %v7147_v9  ;;  %v7194_v10 = vpop.f32.mrf.mxu1 }
 0x1b4   : > { %v1714_v16 = vpop.f32.mrf.mxu0 }
 0x1b5   : > { %v1975_v17 = vpack.c.bf16 %v1918_v14, %v1917_v13  ;;  %v1715_v22 = vadd.f32 %v1714_v16, %v7147_v9  ;;  %v1923_v52 = vmax.f32 %v1723_v25, 0.0 }
 0x1b6   : > { %v5971_v21 = vpop.f32.mrf.mxu0 }
 0x1b7   : > { %v1726_v24 = vadd.f32 %v5971_v21, %v7147_v9  ;;  %6032 = vmatprep.mubr.msk.bf16.mxu1 %vm2021_vm2, %v1975_v17  ;;  %v1921_v32 = vmax.f32 %v1715_v22, 0.0  ;;  %v7202_v21 = vpop.f32.mrf.mxu1 }
 0x1b8   : > { %v1717_v26 = vpop.f32.mrf.mxu0  ;;  %6033 = vmatmul.mubr.msk.bf16.gmra.mxu1 %vm2021_vm2, %v1976_v19 }
 0x1b9   : > { %v1718_v27 = vadd.f32 %v1717_v26, %v7147_v9  ;;  %v1924_v30 = vmax.f32 %v1726_v24, 0.0 }
 0x1ba   : > { %v5974_v31 = vpop.f32.mrf.mxu0 }
 0x1bb   : > { %v1922_v34 = vmax.f32 %v1718_v27, 0.0  ;;  %v1978_v13 = vpack.c.bf16 %v1924_v30, %v1923_v52  ;;  %v1739_v16 = vadd.f32 %v5974_v31, %v7147_v9 }
 0x1bc   : > { %v1730_v0 = vpop.f32.mrf.mxu0 }
 0x1bd   : > { %v1977_v6 = vpack.c.bf16 %v1922_v34, %v1921_v32  ;;  %v1731_v11 = vadd.f32 %v1730_v0, %v7147_v9  ;;  %v1927_v27 = vmax.f32 %v1739_v16, 0.0  ;;  %v7204_v34 = vpop.f32.mrf.mxu1 }
 0x1be   : > { %v5975_v14 = vpop.f32.mrf.mxu0  ;;  %9886 = vst [vmem:[#allocation6_spill] sm:$0xff] %v7204_v34 }
 0x1bf   : > { %v1742_v15 = vadd.f32 %v5975_v14, %v7147_v9  ;;  %6036 = vmatprep.mubr.msk.bf16.mxu1 %vm2021_vm2, %v1977_v6  ;;  %v1925_v25 = vmax.f32 %v1731_v11, 0.0 }
 0x1c0   : > { %v1733_v17 = vpop.f32.mrf.mxu0  ;;  %6037 = vmatmul.mubr.msk.bf16.gmra.mxu1 %vm2021_vm2, %v1978_v13 }
 0x1c1   : > { %v1734_v19 = vadd.f32 %v1733_v17, %v7147_v9  ;;  %v1928_v22 = vmax.f32 %v1742_v15, 0.0  ;;  %v7212_v15 = vpop.f32.mrf.mxu1 }
 0x1c2   : > { %v5978_v24 = vpop.f32.mrf.mxu0  ;;  %9887 = vst [vmem:[#allocation7_spill] sm:$0xff] %v7212_v15 }
 0x1c3   : > { %v1926_v26 = vmax.f32 %v1734_v19, 0.0  ;;  %v1980_v52 = vpack.c.bf16 %v1928_v22, %v1927_v27  ;;  %v1755_v13 = vadd.f32 %v5978_v24, %v7147_v9 }
 0x1c4   : > { %v1746_v30 = vpop.f32.mrf.mxu0 }
 0x1c5   : > { %v1979_v32 = vpack.c.bf16 %v1926_v26, %v1925_v25  ;;  %v1747_v31 = vadd.f32 %v1746_v30, %v7147_v9  ;;  %v1931_v25 = vmax.f32 %v1755_v13, 0.0  ;;  %v7214_v30 = vpop.f32.mrf.mxu1 }
 0x1c6   : > { %v5979_v0 = vpop.f32.mrf.mxu0  ;;  %9888 = vst [vmem:[#allocation8_spill] sm:$0xff] %v7214_v30 }
 0x1c7   : > { %v1758_v6 = vadd.f32 %v5979_v0, %v7147_v9  ;;  %6040 = vmatprep.mubr.msk.bf16.mxu1 %vm2021_vm2, %v1979_v32  ;;  %v1929_v19 = vmax.f32 %v1747_v31, 0.0 }
 0x1c8   : > { %v1749_v14 = vpop.f32.mrf.mxu0  ;;  %6041 = vmatmul.mubr.msk.bf16.gmra.mxu1 %vm2021_vm2, %v1980_v52 }
 0x1c9   : > { %v1750_v11 = vadd.f32 %v1749_v14, %v7147_v9  ;;  %v1932_v16 = vmax.f32 %v1758_v6, 0.0  ;;  %v7222_v6 = vpop.f32.mrf.mxu1 }
 0x1ca   : > { %v5982_v17 = vpop.f32.mrf.mxu0  ;;  %9889 = vst [vmem:[#allocation9_spill] sm:$0xff] %v7222_v6 }
 0x1cb   : > { %v1930_v22 = vmax.f32 %v1750_v11, 0.0  ;;  %v1982_v0 = vpack.c.bf16 %v1932_v16, %v1931_v25  ;;  %v1771_v52 = vadd.f32 %v5982_v17, %v7147_v9  ;;  %v7224_v30 = vpop.f32.mrf.mxu1 }
 0x1cc   : > { %v1762_v26 = vpop.f32.mrf.mxu0  ;;  %9890 = vst [vmem:[#allocation10_spill] sm:$0xff] %v7224_v30 }
 0x1cd   : > { %v1981_v27 = vpack.c.bf16 %v1930_v22, %v1929_v19  ;;  %v1763_v24 = vadd.f32 %v1762_v26, %v7147_v9  ;;  %v1935_v22 = vmax.f32 %v1771_v52, 0.0 }
 0x1ce   : > { %v5983_v32 = vpop.f32.mrf.mxu0 }
 0x1cf   : > { %v1774_v34 = vadd.f32 %v5983_v32, %v7147_v9  ;;  %6044 = vmatprep.mubr.msk.bf16.mxu1 %vm2021_vm2, %v1981_v27  ;;  %v1933_v19 = vmax.f32 %v1763_v24, 0.0  ;;  %v7232_v24 = vpop.f32.mrf.mxu1 }
 0x1d0   : > { %v1765_v14 = vpop.f32.mrf.mxu0  ;;  %6045 = vmatmul.mubr.msk.bf16.gmra.mxu1 %vm2021_vm2, %v1982_v0  ;;  %9891 = vst [vmem:[#allocation11_spill] sm:$0xff] %v7232_v24 }
 0x1d1   : > { %v1766_v31 = vadd.f32 %v1765_v14, %v7147_v9  ;;  %v1936_v13 = vmax.f32 %v1774_v34, 0.0  ;;  %v7234_v30 = vpop.f32.mrf.mxu1 }
 0x1d2   : > { %v5986_v11 = vpop.f32.mrf.mxu0  ;;  %9892 = vst [vmem:[#allocation12_spill] sm:$0xff] %v7234_v30 }
 0x1d3   : > { %v1934_v16 = vmax.f32 %v1766_v31, 0.0  ;;  %v1984_v32 = vpack.c.bf16 %v1936_v13, %v1935_v22  ;;  %v1787_v0 = vadd.f32 %v5986_v11, %v7147_v9 }
 0x1d4   : > { %v1778_v25 = vpop.f32.mrf.mxu0 }
 0x1d5   : > { %v1983_v26 = vpack.c.bf16 %v1934_v16, %v1933_v19  ;;  %v1779_v17 = vadd.f32 %v1778_v25, %v7147_v9  ;;  %v1939_v16 = vmax.f32 %v1787_v0, 0.0 }
 0x1d6   : > { %v5987_v27 = vpop.f32.mrf.mxu0 }
 0x1d7   : > { %v1790_v15 = vadd.f32 %v5987_v27, %v7147_v9  ;;  %6048 = vmatprep.mubr.msk.bf16.mxu1 %vm2021_vm2, %v1983_v26  ;;  %v1937_v19 = vmax.f32 %v1779_v17, 0.0  ;;  %v7242_v17 = vpop.f32.mrf.mxu1 }
 0x1d8   : > { %v1781_v14 = vpop.f32.mrf.mxu0  ;;  %6049 = vmatmul.mubr.msk.bf16.gmra.mxu1 %vm2021_vm2, %v1984_v32  ;;  %9893 = vst [vmem:[#allocation13_spill] sm:$0xff] %v7242_v17 }
 0x1d9   : > { %v1782_v34 = vadd.f32 %v1781_v14, %v7147_v9  ;;  %v1940_v52 = vmax.f32 %v1790_v15, 0.0  ;;  %v7244_v30 = vpop.f32.mrf.mxu1 }
 0x1da   : > { %v5990_v31 = vpop.f32.mrf.mxu0  ;;  %9894 = vst [vmem:[#allocation14_spill] sm:$0xff] %v7244_v30 }
 0x1db   : > { %v1938_v13 = vmax.f32 %v1782_v34, 0.0  ;;  %v1986_v27 = vpack.c.bf16 %v1940_v52, %v1939_v16  ;;  %v1803_v32 = vadd.f32 %v5990_v31, %v7147_v9 }
 0x1dc   : > { %v1794_v22 = vpop.f32.mrf.mxu0 }
 0x1dd   : > { %v1985_v25 = vpack.c.bf16 %v1938_v13, %v1937_v19  ;;  %v1795_v11 = vadd.f32 %v1794_v22, %v7147_v9  ;;  %v1943_v13 = vmax.f32 %v1803_v32, 0.0 }
 0x1de   : > { %v5991_v26 = vpop.f32.mrf.mxu0 }
 0x1df   : > { %v1806_v6 = vadd.f32 %v5991_v26, %v7147_v9  ;;  %6052 = vmatprep.mubr.msk.bf16.mxu1 %vm2021_vm2, %v1985_v25  ;;  %v1941_v19 = vmax.f32 %v1795_v11, 0.0  ;;  %v7252_v11 = vpop.f32.mrf.mxu1 }
 0x1e0   : > { %v1797_v14 = vpop.f32.mrf.mxu0  ;;  %6053 = vmatmul.mubr.msk.bf16.gmra.mxu1 %vm2021_vm2, %v1986_v27  ;;  %9895 = vst [vmem:[#allocation15_spill] sm:$0xff] %v7252_v11 }
 0x1e1   : > { %v1798_v15 = vadd.f32 %v1797_v14, %v7147_v9  ;;  %v1944_v0 = vmax.f32 %v1806_v6, 0.0  ;;  %v7254_v30 = vpop.f32.mrf.mxu1 }
 0x1e2   : > { %v5994_v34 = vpop.f32.mrf.mxu0  ;;  %9896 = vst [vmem:[#allocation16_spill] sm:$0xff] %v7254_v30 }
 0x1e3   : > { %v1942_v52 = vmax.f32 %v1798_v15, 0.0  ;;  %v1988_v26 = vpack.c.bf16 %v1944_v0, %v1943_v13  ;;  %v1819_v27 = vadd.f32 %v5994_v34, %v7147_v9 }
 0x1e4   : > { %v1810_v16 = vpop.f32.mrf.mxu0 }
 0x1e5   : > { %v1987_v22 = vpack.c.bf16 %v1942_v52, %v1941_v19  ;;  %v1811_v31 = vadd.f32 %v1810_v16, %v7147_v9  ;;  %v1947_v52 = vmax.f32 %v1819_v27, 0.0 }
 0x1e6   : > { %v5995_v25 = vpop.f32.mrf.mxu0 }
 0x1e7   : > { %v1822_v24 = vadd.f32 %v5995_v25, %v7147_v9  ;;  %6056 = vmatprep.mubr.msk.bf16.mxu1 %vm2021_vm2, %v1987_v22  ;;  %v1945_v19 = vmax.f32 %v1811_v31, 0.0  ;;  %v7262_v31 = vpop.f32.mrf.mxu1 }
 0x1e8   : > { %v1813_v14 = vpop.f32.mrf.mxu0  ;;  %6057 = vmatmul.mubr.msk.bf16.gmra.mxu1 %vm2021_vm2, %v1988_v26  ;;  %9897 = vst [vmem:[#allocation17_spill] sm:$0xff] %v7262_v31 }
 0x1e9   : > { %v1814_v6 = vadd.f32 %v1813_v14, %v7147_v9  ;;  %v1948_v32 = vmax.f32 %v1822_v24, 0.0  ;;  %v7264_v30 = vpop.f32.mrf.mxu1 }
 0x1ea   : > { %v5998_v15 = vpop.f32.mrf.mxu0  ;;  %9898 = vst [vmem:[#allocation18_spill] sm:$0xff] %v7264_v30 }
 0x1eb   : > { %v1946_v0 = vmax.f32 %v1814_v6, 0.0  ;;  %v1990_v25 = vpack.c.bf16 %v1948_v32, %v1947_v52  ;;  %v1835_v26 = vadd.f32 %v5998_v15, %v7147_v9 }
 0x1ec   : > { %v1826_v13 = vpop.f32.mrf.mxu0 }
 0x1ed   : > { %v1989_v16 = vpack.c.bf16 %v1946_v0, %v1945_v19  ;;  %v1827_v34 = vadd.f32 %v1826_v13, %v7147_v9  ;;  %v1951_v0 = vmax.f32 %v1835_v26, 0.0 }
 0x1ee   : > { %v5999_v22 = vpop.f32.mrf.mxu0 }
 0x1ef   : > { %v1838_v17 = vadd.f32 %v5999_v22, %v7147_v9  ;;  %6060 = vmatprep.mubr.msk.bf16.mxu1 %vm2021_vm2, %v1989_v16  ;;  %v1949_v19 = vmax.f32 %v1827_v34, 0.0  ;;  %v7272_v34 = vpop.f32.mrf.mxu1 }
 0x1f0   : > { %v1829_v14 = vpop.f32.mrf.mxu0  ;;  %6061 = vmatmul.mubr.msk.bf16.gmra.mxu1 %vm2021_vm2, %v1990_v25 }
 0x1f1   : > { %v1830_v24 = vadd.f32 %v1829_v14, %v7147_v9  ;;  %v1952_v27 = vmax.f32 %v1838_v17, 0.0  ;;  %v7276_v30 = vpop.f32.mrf.mxu1 }
 0x1f2   : > { %v6002_v6 = vpop.f32.mrf.mxu0  ;;  %9899 = vst [vmem:[#allocation19_spill] sm:$0xff] %v7276_v30 }
 0x1f3   : > { %v1950_v32 = vmax.f32 %v1830_v24, 0.0  ;;  %v1992_v22 = vpack.c.bf16 %v1952_v27, %v1951_v0  ;;  %v1851_v25 = vadd.f32 %v6002_v6, %v7147_v9 }
 0x1f4   : > { %v1842_v52 = vpop.f32.mrf.mxu0 }
 0x1f5   : > { %v1991_v13 = vpack.c.bf16 %v1950_v32, %v1949_v19  ;;  %v1843_v15 = vadd.f32 %v1842_v52, %v7147_v9  ;;  %v1955_v32 = vmax.f32 %v1851_v25, 0.0 }
 0x1f6   : > { %v6003_v16 = vpop.f32.mrf.mxu0 }
 0x1f7   : > { %v1854_v11 = vadd.f32 %v6003_v16, %v7147_v9  ;;  %6064 = vmatprep.mubr.msk.bf16.mxu1 %vm2021_vm2, %v1991_v13  ;;  %v1953_v19 = vmax.f32 %v1843_v15, 0.0 }
 0x1f8   : > { %v1845_v14 = vpop.f32.mrf.mxu0  ;;  %6065 = vmatmul.mubr.msk.bf16.gmra.mxu1 %vm2021_vm2, %v1992_v22 }
 0x1f9   : > { %v1846_v17 = vadd.f32 %v1845_v14, %v7147_v9  ;;  %v1956_v26 = vmax.f32 %v1854_v11, 0.0 }
 0x1fa   : > { %v6006_v24 = vpop.f32.mrf.mxu0 }
 0x1fb   : > { %v1954_v27 = vmax.f32 %v1846_v17, 0.0  ;;  %v1867_v0 = vadd.f32 %v6006_v24, %v7147_v9  ;;  %v1994_v6 = vpack.c.bf16 %v1956_v26, %v1955_v32  ;;  %v7282_v24 = vpop.f32.mrf.mxu1 }
 0x1fc   : > { %v1858_v52 = vpop.f32.mrf.mxu0  ;;  %9900 = vst [vmem:[#allocation20_spill] sm:$0xff] %v7282_v24 }
 0x1fd   : > { %v1993_v16 = vpack.c.bf16 %v1954_v27, %v1953_v19  ;;  %v1859_v13 = vadd.f32 %v1858_v52, %v7147_v9  ;;  %v1959_v14 = vmax.f32 %v1867_v0, 0.0 }
 0x1fe   : > { %v6007_v31 = vpop.f32.mrf.mxu0 }
 0x1ff   : > { %v1870_v22 = vadd.f32 %v6007_v31, %v7147_v9  ;;  %6068 = vmatprep.mubr.msk.bf16.mxu1 %vm2021_vm2, %v1993_v16  ;;  %v1957_v15 = vmax.f32 %v1859_v13, 0.0  ;;  %v7286_v16 = vpop.f32.mrf.mxu1 }
 0x200   : > { %v1861_v11 = vpop.f32.mrf.mxu0  ;;  %6069 = vmatmul.mubr.msk.bf16.gmra.mxu1 %vm2021_vm2, %v1994_v6  ;;  %9901 = vst [vmem:[#allocation21_spill] sm:$0xff] %v7286_v16 }
 0x201   : > { %v1960_v25 = vmax.f32 %v1870_v22, 0.0  ;;  %v1862_v17 = vadd.f32 %v1861_v11, %v7147_v9 }
 0x202   : > { %v6010_v19 = vpop.f32.mrf.mxu0 }
 0x203   : > { %v1958_v27 = vmax.f32 %v1862_v17, 0.0  ;;  %v1996_v52 = vpack.c.bf16 %v1960_v25, %v1959_v14  ;;  %v1883_v26 = vadd.f32 %v6010_v19, %v7147_v9  ;;  %v7292_v25 = vpop.f32.mrf.mxu1 }
 0x204   : > { %v1874_v32 = vpop.f32.mrf.mxu0 }
 0x205   : > { %v1995_v30 = vpack.c.bf16 %v1958_v27, %v1957_v15  ;;  %v1875_v31 = vadd.f32 %v1874_v32, %v7147_v9  ;;  %v1963_v13 = vmax.f32 %v1883_v26, 0.0 }
 0x206   : > { %v6011_v0 = vpop.f32.mrf.mxu0 }
 0x207   : > { %v1886_v6 = vadd.f32 %v6011_v0, %v7147_v9  ;;  %6072 = vmatprep.mubr.msk.bf16.mxu1 %vm2021_vm2, %v1995_v30  ;;  %v1961_v11 = vmax.f32 %v1875_v31, 0.0  ;;  %v7296_v30 = vpop.f32.mrf.mxu1 }
 0x208   : > { %v1877_v22 = vpop.f32.mrf.mxu0  ;;  %6073 = vmatmul.mubr.msk.bf16.gmra.mxu1 %vm2021_vm2, %v1996_v52 }
 0x209   : > { %v1964_v17 = vmax.f32 %v1886_v6, 0.0  ;;  %v1878_v14 = vadd.f32 %v1877_v22, %v7147_v9 }
 0x20a   : > { %v6014_v15 = vpop.f32.mrf.mxu0 }
 0x20b   : > { %v1962_v19 = vmax.f32 %v1878_v14, 0.0  ;;  %v1998_v27 = vpack.c.bf16 %v1964_v17, %v1963_v13  ;;  %v1899_v32 = vadd.f32 %v6014_v15, %v7147_v9  ;;  %v7302_v17 = vpop.f32.mrf.mxu1 }
 0x20c   : > { %v1890_v16 = vpop.f32.mrf.mxu0 }
 0x20d   : > { %v1997_v24 = vpack.c.bf16 %v1962_v19, %v1961_v11  ;;  %v1891_v0 = vadd.f32 %v1890_v16, %v7147_v9  ;;  %v1967_v31 = vmax.f32 %v1899_v32, 0.0  ;;  %v7304_v19 = vpop.f32.mrf.mxu1 }
 0x20e   : > { %v6015_v26 = vpop.f32.mrf.mxu0 }
 0x20f   : > { %v1902_v52 = vadd.f32 %v6015_v26, %v7147_v9  ;;  %6076 = vmatprep.mubr.msk.bf16.mxu1 %vm2021_vm2, %v1997_v24  ;;  %v1965_v22 = vmax.f32 %v1891_v0, 0.0  ;;  %v7308_v24 = vpop.f32.mrf.mxu1 }
 0x210   : > { %v1893_v6 = vpop.f32.mrf.mxu0  ;;  %6077 = vmatmul.mubr.msk.bf16.gmra.mxu1 %vm2021_vm2, %v1998_v27 }
 0x211   : > { %v1968_v14 = vmax.f32 %v1902_v52, 0.0  ;;  %v1894_v13 = vadd.f32 %v1893_v6, %v7147_v9  ;;  %v7310_v32 = vpop.f32.mrf.mxu1 }
 0x213   : > { %v1966_v11 = vmax.f32 %v1894_v13, 0.0  ;;  %v2000_v15 = vpack.c.bf16 %v1968_v14, %v1967_v31  ;;  %v7312_v27 = vpop.f32.mrf.mxu1  ;;  %v6477_v14 = vld [vmem:[%s9781_s6 + $0x28] sm:$0xff]  }
 0x214   : > { %6152 = vmatprep.subr.bf16.mxu1 %v6477_v14 }
 0x215   : > { %v1999_v16 = vpack.c.bf16 %v1966_v11, %v1965_v22  ;;  %v7314_v0 = vpop.f32.mrf.mxu1  ;;  %6153 = vmatpush3.bf16.msra.mxu1 %v6477_v14  ;;  %v7351_v14 = vpop.permute.xlu0 %546 }
 0x216   : > { %9902 = vst [vmem:[#allocation22_spill] sm:$0xff] %v7314_v0 }
 0x217   : > { %6080 = vmatprep.mubr.msk.bf16.mxu1 %vm2021_vm2, %v1999_v16  ;;  %v7316_v9 = vpop.f32.mrf.mxu1 }
 0x218   : > { %6081 = vmatmul.mubr.msk.bf16.gmra.mxu1 %vm2021_vm2, %v2000_v15  ;;  %9903 = vst [vmem:[#allocation23_spill] sm:$0xff] %v7316_v9 }
 0x219   : > { %v7318_v26 = vpop.f32.mrf.mxu1 }
 0x21a   : > { %9904 = vst [vmem:[#allocation24_spill] sm:$0xff] %v7318_v26 }
 0x21b   : > { %v7320_v52 = vpop.f32.mrf.mxu1 }
 0x21c   : > { %9905 = vst [vmem:[#allocation25_spill] sm:$0xff] %v7320_v52 }
 0x21d   : > { %v7322_v31 = vpop.f32.mrf.mxu1 }
 0x21e   : > { %9906 = vst [vmem:[#allocation26_spill] sm:$0xff] %v7322_v31 }
 0x21f   : > { %v7324_v6 = vpop.f32.mrf.mxu1 }
 0x220   : > { %9907 = vst [vmem:[#allocation27_spill] sm:$0xff] %v7324_v6 }
 0x221   : > { %v7326_v22 = vpop.f32.mrf.mxu1 }
 0x222   : > { %9908 = vst [vmem:[#allocation28_spill] sm:$0xff] %v7326_v22  ;;  %v2007_v22 = vsub.s32 1, %v7134_v3 }
 0x223   : > { %v7331_v13 = vpop.f32.mrf.mxu1 }
 0x224   : > { %9909 = vst [vmem:[#allocation29_spill] sm:$0xff] %v7331_v13  ;;  %v7347_v26 = vrot.slane %v7144_v7, %v2007_v22  ;;  %v7368_v22 = vadd.f32 %v7075_v37, %v7351_v14 }
 0x225   : > { %v7333_v11 = vpop.f32.mrf.mxu1 }
 0x226   : > { %9910 = vst [vmem:[#allocation30_spill] sm:$0xff] %v7333_v11 }
 0x227   : > { %v7335_v15 = vpop.f32.mrf.mxu1 }
 0x228   : > { %9911 = vst [vmem:[#allocation31_spill] sm:$0xff] %v7335_v15  ;;  %v7355_v15 = vadd.f32 %v7103_v51, %v6936_v23  ;;  %v7376_v51 = vadd.f32 %v6936_v23, %v7112_v55 }
 0x229   : > { %v7337_v16 = vpop.f32.mrf.mxu1 }
 0x22a   : > { %9912 = vst [vmem:[#allocation32_spill] sm:$0xff] %v7337_v16  ;;  %9917 = vst [vmem:[#allocation37_spill] sm:$0xff] %v7355_v15 }
 0x22b   : > { %v7339_v52 = vpop.f32.mrf.mxu1  ;;  %9920 = vst [vmem:[#allocation40_spill] sm:$0xff] %v7376_v51 }
 0x22c   : > { %9913 = vst [vmem:[#allocation33_spill] sm:$0xff] %v7339_v52  ;;  %v7359_v52 = vadd.f32 %v7110_v54, %v6936_v23  ;;  %v7385_v54 = vadd.f32 %v7077_v38, %v7351_v14 }
 0x22d   : > { %v7341_v31 = vpop.f32.mrf.mxu1 }
 0x22e   : > { %9914 = vst [vmem:[#allocation34_spill] sm:$0xff] %v7341_v31  ;;  %9918 = vst [vmem:[#allocation38_spill] sm:$0xff] %v7359_v52  ;;  %v7364_v31 = vadd.f32 %v6936_v23, %v7108_v53  ;;  %v7381_v53 = vadd.f32 %v7073_v36, %v7351_v14  ;;  %v2408_v16 = vsub.f32 %v7385_v54, %v7376_v51 }
 0x22f   : > { %v7344_v6 = vpop.f32.mrf.mxu1 }
 0x230   : > { %9915 = vst [vmem:[#allocation35_spill] sm:$0xff] %v7344_v6  ;;  %9919 = vst [vmem:[#allocation39_spill] sm:$0xff] %v7364_v31  ;;  %v2407_v6 = vsub.f32 %v7381_v53, %v7364_v31 }
 0x231   : > { %v7349_v13 = vpop.f32.mrf.mxu1 }
 0x232   : > { %9916 = vst [vmem:[#allocation36_spill] sm:$0xff] %v7349_v13  ;;  %v7372_v13 = vadd.f32 %v7071_v35, %v7351_v14 }
 0x234   : > { %v2409_v35 = vsub.f32 %v7372_v13, %v7355_v15  ;;  %v7402_v15 = vld [vmem:[%s9779_s4] ss:$0 sm:$0xff] }
 0x235   : > { %v7410_v31 = vadd.f32 %v7402_v15, %v7118_v58  ;;  %v7418_v51 = vadd.f32 %v7402_v15, %v7116_v57  ;;  %v7426_v58 = vadd.f32 %v7402_v15, %v7120_v59  ;;  %v7436_v57 = vadd.f32 %v7085_v42, %v7351_v14 }
 0x237   : > { %9922 = vst [vmem:[#allocation42_spill] sm:$0xff] %v7418_v51  ;;  %v2412_v42 = vsub.f32 %v7436_v57, %v7426_v58 }
 0x260   : > { %v6022_v11 = vpop.f32.mrf.mxu1 }
 0x261   : > { %v2161_v3 = vadd.f32 %v6022_v11, %v7347_v26  ;;  %v2410_v11 = vsub.f32 %v7368_v22, %v7359_v52 }
 0x262   : > { %v2152_v7 = vpop.f32.mrf.mxu1 }
 0x263   : > { %4250 = vrot.lane.b32.xlu0 %v2161_v3, %s6738_s15  ;;  %v2153_v23 = vadd.f32 %v2152_v7, %v7347_v26  ;;  %v2473_v38 = vadd.f32 %v2409_v35, %v2161_v3  ;;  %v7406_v7 = vadd.f32 %v7402_v15, %v7114_v56  ;;  %v7422_v56 = vadd.f32 %v7083_v41, %v7351_v14 }
 0x264   : > { %v6023_v37 = vpop.f32.mrf.mxu1 }
 0x265   : > { %v2164_v55 = vadd.f32 %v6023_v37, %v7347_v26  ;;  %9921 = vst [vmem:[#allocation41_spill] sm:$0xff] %v7406_v7  ;;  %v2471_v3 = vadd.f32 %v2407_v6, %v2153_v23  ;;  %v2414_v59 = vsub.f32 %v7422_v56, %v7410_v31 }
 0x266   : > { %v2155_v36 = vpop.f32.mrf.mxu1 }
 0x267   : > { %v2474_v0 = vadd.f32 %v2410_v11, %v2164_v55  ;;  %v2156_v9 = vadd.f32 %v2155_v36, %v7347_v26  ;;  %4246 = vrot.lane.b32.xlu0 %v2153_v23, %s6738_s15  ;;  %v7414_v36 = vadd.f32 %v7079_v39, %v7351_v14  ;;  %v7432_v39 = vadd.f32 %v7081_v40, %v7351_v14 }
 0x268   : > { %v6026_v37 = vpop.f32.mrf.mxu1 }
 0x269   : > { %v2536_v35 = vpack.c.bf16 %v2474_v0, %v2473_v38  ;;  %v2472_v11 = vadd.f32 %v2408_v16, %v2156_v9  ;;  %v2177_v0 = vadd.f32 %v6026_v37, %v7347_v26  ;;  %v2413_v41 = vsub.f32 %v7414_v36, %v7406_v7 }
 0x26a   : > { %v2168_v52 = vpop.f32.mrf.mxu1  ;;  %v2411_v40 = vsub.f32 %v7432_v39, %v7418_v51 }
 0x26b   : > { %v2535_v6 = vpack.c.bf16 %v2472_v11, %v2471_v3  ;;  %4252 = vrot.lane.b32.xlu0 %v2164_v55, %s6738_s15  ;;  %v2169_v23 = vadd.f32 %v2168_v52, %v7347_v26  ;;  %v2477_v37 = vadd.f32 %v2413_v41, %v2177_v0  ;;  %v7456_v52 = vadd.f32 %v7402_v15, %v7122_v60 }
 0x26c   : > { %v6027_v16 = vpop.f32.mrf.mxu1  ;;  %v7465_v41 = vadd.f32 %v7402_v15, %v7124_v61  ;;  %v7473_v60 = vadd.f32 %v7087_v43, %v7351_v14  ;;  %v7485_v61 = vadd.f32 %v7089_v44, %v7351_v14 }
 0x26d   : > { %v2180_v38 = vadd.f32 %v6027_v16, %v7347_v26  ;;  %6088 = vmatprep.mubr.msk.bf16.mxu0 %vm2021_vm2, %v2535_v6  ;;  %v7460_v16 = vadd.f32 %v7402_v15, %v7126_v62  ;;  %v7477_v62 = vadd.f32 %v7091_v45, %v7351_v14 }
 0x26e   : > { %v2171_v55 = vpop.f32.mrf.mxu1  ;;  %6089 = vmatmul.mubr.msk.bf16.vlgmr.msra.gmra.mxu0 %vm2021_vm2, %v2536_v35  ;;  %v2475_v35 = vadd.f32 %v2411_v40, %v2169_v23  ;;  %9923 = vst [vmem:[#allocation43_spill] sm:$0xff] %v7465_v41  ;;  %v2415_v44 = vsub.f32 %v7485_v61, %v7465_v41 }
 0x26f   : > { %v2478_v3 = vadd.f32 %v2414_v59, %v2180_v38  ;;  %v7451_v11 = vadd.f32 %v2171_v55, %v7347_v26  ;;  %4248 = vrot.lane.b32.xlu0 %v2156_v9, %s6738_s15  ;;  %v7469_v9 = vadd.f32 %v7402_v15, %v7128_v63  ;;  %v7489_v63 = vadd.f32 %v7093_v46, %v7351_v14 }
 0x270   : > { %v6030_v6 = vpop.f32.mrf.mxu1  ;;  %v2418_v45 = vsub.f32 %v7477_v62, %v7460_v16 }
 0x271   : > { %v2538_v51 = vpack.c.bf16 %v2478_v3, %v2477_v37  ;;  %v2476_v7 = vadd.f32 %v2412_v42, %v7451_v11  ;;  %v7480_v55 = vadd.f32 %v6030_v6, %v7347_v26  ;;  %v2417_v42 = vsub.f32 %v7473_v60, %v7456_v52 }
 0x272   : > { %v2184_v59 = vpop.f32.mrf.mxu1  ;;  %v2416_v46 = vsub.f32 %v7489_v63, %v7469_v9 }
 0x273   : > { %v2537_v40 = vpack.c.bf16 %v2476_v7, %v2475_v35  ;;  %4258 = vrot.lane.b32.xlu0 %v2177_v0, %s6738_s15  ;;  %v7496_v7 = vadd.f32 %v2184_v59, %v7347_v26  ;;  %v2481_v3 = vadd.f32 %v2417_v42, %v7480_v55  ;;  %v7511_v59 = vadd.f32 %v7402_v15, %v7130_v1 }
 0x274   : > { %v6031_v43 = vpop.f32.mrf.mxu1  ;;  %v7528_v1 = vadd.f32 %v7402_v15, %v7138_v5  ;;  %v7546_v5 = vadd.f32 %v7101_v50, %v7351_v14 }
 0x275   : > { %v2196_v0 = vadd.f32 %v6031_v43, %v7347_v26  ;;  %6092 = vmatprep.mubr.msk.bf16.mxu0 %vm2021_vm2, %v2537_v40  ;;  %v7515_v43 = vadd.f32 %v7402_v15, %v7136_v4  ;;  %v7532_v4 = vadd.f32 %v7099_v49, %v7351_v14 }
 0x276   : > { %v2187_v37 = vpop.f32.mrf.mxu1  ;;  %6093 = vmatmul.mubr.msk.bf16.gmra.mxu0 %vm2021_vm2, %v2538_v51  ;;  %v2479_v51 = vadd.f32 %v2415_v44, %v7496_v7  ;;  %v2420_v50 = vsub.f32 %v7546_v5, %v7528_v1 }
 0x277   : > { %v2482_v6 = vadd.f32 %v2418_v45, %v2196_v0  ;;  %v2188_v35 = vadd.f32 %v2187_v37, %v7347_v26  ;;  %4268 = vrot.lane.b32.xlu1 %v2196_v0, %s6738_s15  ;;  %4254 = vrot.lane.b32.xlu0 %v2169_v23, %s6738_s15  ;;  %v7520_v45 = vadd.f32 %v7095_v47, %v7351_v14  ;;  %v6478_v47 = vld [vmem:[%s9781_s6 + $0x20] sm:$0xff]  }
 0x278   : > { %v6034_v40 = vpop.f32.mrf.mxu1  ;;  %v7524_v23 = vadd.f32 %v7402_v15, %v7132_v2  ;;  %v7542_v2 = vadd.f32 %v7097_v48, %v7351_v14  ;;  %6154 = vmatprep.subr.bf16.mxu1 %v6478_v47 }
 0x279   : > { %v2540_v41 = vpack.c.bf16 %v2482_v6, %v2481_v3  ;;  %v2480_v42 = vadd.f32 %v2416_v46, %v2188_v35  ;;  %v2209_v46 = vadd.f32 %v6034_v40, %v7347_v26  ;;  %v2421_v49 = vsub.f32 %v7520_v45, %v7511_v59  ;;  %6155 = vmatpush3.bf16.msra.mxu1 %v6478_v47 }
 0x27a   : > { %9924 = vst [vmem:[#allocation44_spill] sm:$0xff] %v7524_v23  ;;  %v2200_v0 = vpop.f32.mrf.mxu1  ;;  %v2422_v3 = vsub.f32 %v7532_v4, %v7515_v43  ;;  %v2419_v48 = vsub.f32 %v7542_v2, %v7524_v23 }
 0x27b   : > { %v2539_v44 = vpack.c.bf16 %v2480_v42, %v2479_v51  ;;  %4264 = vrot.lane.b32.xlu1 %v2188_v35, %s6738_s15  ;;  %4260 = vrot.lane.b32.xlu0 %v2180_v38, %s6738_s15  ;;  %v7553_v38 = vadd.f32 %v2200_v0, %v7347_v26  ;;  %v2485_v35 = vadd.f32 %v2421_v49, %v2209_v46 }
 0x27c   : > { %v6035_v37 = vpop.f32.mrf.mxu1  ;;  %v7568_v42 = vadd.f32 %v7402_v15, %v7162_v33 }
 0x27d   : > { %v2212_v6 = vadd.f32 %v6035_v37, %v7347_v26  ;;  %6096 = vmatprep.mubr.msk.bf16.mxu0 %vm2021_vm2, %v2539_v44  ;;  %v7572_v44 = vadd.f32 %v7402_v15, %v7172_v20  ;;  %v7577_v37 = vadd.f32 %v7402_v15, %v7164_v12 }
 0x27e   : > { %v2203_v14 = vpop.f32.mrf.mxu1  ;;  %6097 = vmatmul.mubr.msk.bf16.gmra.mxu0 %vm2021_vm2, %v2540_v41  ;;  %9925 = vst [vmem:[#allocation45_spill] sm:$0xff] %v7568_v42  ;;  %v2483_v41 = vadd.f32 %v2419_v48, %v7553_v38  ;;  %v2425_v48 = vsub.f32 %v7372_v13, %v7568_v42 }
 0x27f   : > { %v2486_v40 = vadd.f32 %v2422_v3, %v2212_v6  ;;  %v2204_v51 = vadd.f32 %v2203_v14, %v7347_v26  ;;  %4276 = vrot.lane.b32.xlu1 %v2212_v6, %s6738_s15  ;;  %4256 = vrot.lane.b32.xlu0 %v7451_v11, %s6738_s15  ;;  %9926 = vst [vmem:[#allocation46_spill] sm:$0xff] %v7577_v37 }
 0x280   : > { %v6038_v0 = vpop.f32.mrf.mxu1  ;;  %v7581_v11 = vadd.f32 %v7402_v15, %v7174_v29  ;;  %v2426_v29 = vsub.f32 %v7368_v22, %v7572_v44  ;;  %v2423_v14 = vsub.f32 %v7381_v53, %v7577_v37 }
 0x281   : > { %v2542_v47 = vpack.c.bf16 %v2486_v40, %v2485_v35  ;;  %v2484_v49 = vadd.f32 %v2420_v50, %v2204_v51  ;;  %v2225_v6 = vadd.f32 %v6038_v0, %v7347_v26 }
 0x282   : > { %v2216_v3 = vpop.f32.mrf.mxu1  ;;  %v2424_v0 = vsub.f32 %v7385_v54, %v7581_v11 }
 0x283   : > { %v2541_v33 = vpack.c.bf16 %v2484_v49, %v2483_v41  ;;  %4272 = vrot.lane.b32.xlu1 %v2204_v51, %s6738_s15  ;;  %4266 = vrot.lane.b32.xlu0 %v7480_v55, %s6738_s15  ;;  %v7590_v12 = vadd.f32 %v2216_v3, %v7347_v26  ;;  %v2489_v55 = vadd.f32 %v2425_v48, %v2225_v6 }
 0x284   : > { %v6039_v20 = vpop.f32.mrf.mxu1  ;;  %v7611_v41 = vadd.f32 %v7402_v15, %v7182_v8  ;;  %v7621_v48 = vadd.f32 %v7402_v15, %v7184_v18 }
 0x285   : > { %v7593_v50 = vadd.f32 %v6039_v20, %v7347_v26  ;;  %6100 = vmatprep.mubr.msk.bf16.mxu0 %vm2021_vm2, %v2541_v33  ;;  %v2487_v3 = vadd.f32 %v2423_v14, %v7590_v12 }
 0x286   : > { %v2219_v35 = vpop.f32.mrf.mxu1  ;;  %6101 = vmatmul.mubr.msk.bf16.gmra.mxu0 %vm2021_vm2, %v2542_v47  ;;  %9927 = vst [vmem:[#allocation47_spill] sm:$0xff] %v7611_v41  ;;  %v7615_v47 = vadd.f32 %v7402_v15, %v7192_v28  ;;  %9928 = vst [vmem:[#allocation48_spill] sm:$0xff] %v7621_v48  ;;  %v2429_v14 = vsub.f32 %v7414_v36, %v7611_v41  ;;  %v9934_v41 = vld [vmem:[#allocation8_spill] sm:$0xff] }
 0x287   : > { %v2490_v40 = vadd.f32 %v2426_v29, %v7593_v50  ;;  %v7603_v51 = vadd.f32 %v2219_v35, %v7347_v26  ;;  %4262 = vrot.lane.b32.xlu0 %v7496_v7, %s6738_s15  ;;  %v7625_v7 = vadd.f32 %v7402_v15, %v7194_v10 }
 0x288   : > { %v6042_v49 = vpop.f32.mrf.mxu1  ;;  %v2430_v10 = vsub.f32 %v7422_v56, %v7615_v47 }
 0x289   : > { %v2544_v33 = vpack.c.bf16 %v2490_v40, %v2489_v55  ;;  %v2488_v20 = vadd.f32 %v2424_v0, %v7603_v51  ;;  %v7628_v35 = vadd.f32 %v6042_v49, %v7347_v26  ;;  %v2427_v40 = vsub.f32 %v7432_v39, %v7621_v48 }
 0x28a   : > { %v2232_v8 = vpop.f32.mrf.mxu1 }
 0x28b   : > { %v2543_v29 = vpack.c.bf16 %v2488_v20, %v2487_v3  ;;  %4274 = vrot.lane.b32.xlu0 %v2209_v46, %s6738_s15  ;;  %v7634_v55 = vadd.f32 %v2232_v8, %v7347_v26  ;;  %v2428_v46 = vsub.f32 %v7436_v57, %v7625_v7  ;;  %v2493_v49 = vadd.f32 %v2429_v14, %v7628_v35 }
 0x28c   : > { %v6043_v28 = vpop.f32.mrf.mxu1  ;;  %v7654_v8 = vadd.f32 %v7402_v15, %v7202_v21 }
 0x28d   : > { %v2244_v18 = vadd.f32 %v6043_v28, %v7347_v26  ;;  %6104 = vmatprep.mubr.msk.bf16.mxu0 %vm2021_vm2, %v2543_v29  ;;  %v9930_v28 = vld [vmem:[#allocation7_spill] sm:$0xff] }
 0x28e   : > { %v2235_v0 = vpop.f32.mrf.mxu1  ;;  %6105 = vmatmul.mubr.msk.bf16.gmra.mxu0 %vm2021_vm2, %v2544_v33  ;;  %9929 = vst [vmem:[#allocation49_spill] sm:$0xff] %v7654_v8  ;;  %v7658_v48 = vadd.f32 %v7402_v15, %v9930_v28  ;;  %v2491_v33 = vadd.f32 %v2427_v40, %v7634_v55  ;;  %v2433_v40 = vsub.f32 %v7473_v60, %v7654_v8 }
 0x28f   : > { %v2494_v3 = vadd.f32 %v2430_v10, %v2244_v18  ;;  %v7647_v20 = vadd.f32 %v2235_v0, %v7347_v26  ;;  %4292 = vrot.lane.b32.xlu1 %v2244_v18, %s6738_s15  ;;  %4270 = vrot.lane.b32.xlu0 %v7553_v38, %s6738_s15  ;;  %v9932_v0 = vld [vmem:[#allocation6_spill] sm:$0xff]  ;;  %v7668_v38 = vadd.f32 %v7402_v15, %v9934_v41 }
 0x290   : > { %v6046_v29 = vpop.f32.mrf.mxu1  ;;  %9931 = vst [vmem:[#allocation7_spill] sm:$0xff] %v7658_v48  ;;  %v7664_v18 = vadd.f32 %v7402_v15, %v9932_v0  ;;  %v2434_v41 = vsub.f32 %v7477_v62, %v7658_v48 }
 0x291   : > { %v2546_v14 = vpack.c.bf16 %v2494_v3, %v2493_v49  ;;  %v2492_v10 = vadd.f32 %v2428_v46, %v7647_v20  ;;  %9935 = vst [vmem:[#allocation8_spill] sm:$0xff] %v7668_v38  ;;  %v7671_v42 = vadd.f32 %v6046_v29, %v7347_v26 }
 0x292   : > { %9933 = vst [vmem:[#allocation6_spill] sm:$0xff] %v7664_v18  ;;  %v2248_v21 = vpop.f32.mrf.mxu1  ;;  %v2431_v3 = vsub.f32 %v7485_v61, %v7664_v18  ;;  %v9938_v18 = vld [vmem:[#allocation11_spill] sm:$0xff] }
 0x293   : > { %v2545_v37 = vpack.c.bf16 %v2492_v10, %v2491_v33  ;;  %4282 = vrot.lane.b32.xlu0 %v2225_v6, %s6738_s15  ;;  %v7677_v46 = vadd.f32 %v2248_v21, %v7347_v26  ;;  %v2432_v6 = vsub.f32 %v7489_v63, %v7668_v38  ;;  %v2497_v33 = vadd.f32 %v2433_v40, %v7671_v42  ;;  %v9940_v38 = vld [vmem:[#allocation10_spill] sm:$0xff] }
 0x294   : > { %v6047_v28 = vpop.f32.mrf.mxu1  ;;  %v7699_v8 = vadd.f32 %v7402_v15, %v9938_v18 }
 0x295   : > { %v2260_v49 = vadd.f32 %v6047_v28, %v7347_v26  ;;  %6108 = vmatprep.mubr.msk.bf16.mxu0 %vm2021_vm2, %v2545_v37  ;;  %v9936_v37 = vld [vmem:[#allocation9_spill] sm:$0xff] }
 0x296   : > { %v2251_v29 = vpop.f32.mrf.mxu1  ;;  %6109 = vmatmul.mubr.msk.bf16.gmra.mxu0 %vm2021_vm2, %v2546_v14  ;;  %v7695_v21 = vadd.f32 %v7402_v15, %v9936_v37  ;;  %9939 = vst [vmem:[#allocation11_spill] sm:$0xff] %v7699_v8  ;;  %v2495_v14 = vadd.f32 %v2431_v3, %v7677_v46 }
 0x297   : > { %v2498_v10 = vadd.f32 %v2434_v41, %v2260_v49  ;;  %v2252_v0 = vadd.f32 %v2251_v29, %v7347_v26  ;;  %4300 = vrot.lane.b32.xlu1 %v2260_v49, %s6738_s15  ;;  %4278 = vrot.lane.b32.xlu0 %v7590_v12, %s6738_s15  ;;  %v7704_v29 = vadd.f32 %v7402_v15, %v9940_v38  ;;  %v9942_v49 = vld [vmem:[#allocation12_spill] sm:$0xff] }
 0x298   : > { %9937 = vst [vmem:[#allocation9_spill] sm:$0xff] %v7695_v21  ;;  %v6050_v28 = vpop.f32.mrf.mxu1  ;;  %v7708_v12 = vadd.f32 %v7402_v15, %v9942_v49  ;;  %v2437_v3 = vsub.f32 %v7520_v45, %v7695_v21  ;;  %v9948_v21 = vld [vmem:[#allocation14_spill] sm:$0xff] }
 0x299   : > { %v2548_v40 = vpack.c.bf16 %v2498_v10, %v2497_v33  ;;  %v2496_v41 = vadd.f32 %v2432_v6, %v2252_v0  ;;  %9941 = vst [vmem:[#allocation10_spill] sm:$0xff] %v7704_v29  ;;  %v7711_v48 = vadd.f32 %v6050_v28, %v7347_v26  ;;  %v2438_v33 = vsub.f32 %v7532_v4, %v7699_v8 }
 0x29a   : > { %9943 = vst [vmem:[#allocation12_spill] sm:$0xff] %v7708_v12  ;;  %v2264_v23 = vpop.f32.mrf.mxu1  ;;  %v2435_v10 = vsub.f32 %v7542_v2, %v7704_v29 }
 0x29b   : > { %v2547_v37 = vpack.c.bf16 %v2496_v41, %v2495_v14  ;;  %4296 = vrot.lane.b32.xlu1 %v2252_v0, %s6738_s15  ;;  %4284 = vrot.lane.b32.xlu0 %v7593_v50, %s6738_s15  ;;  %v7719_v38 = vadd.f32 %v2264_v23, %v7347_v26  ;;  %v2436_v50 = vsub.f32 %v7546_v5, %v7708_v12  ;;  %v9944_v41 = vld [vmem:[#allocation13_spill] sm:$0xff]  ;;  %v9950_v12 = vld [vmem:[#allocation16_spill] sm:$0xff] }
 0x29c   : > { %v6051_v18 = vpop.f32.mrf.mxu1  ;;  %v2501_v28 = vadd.f32 %v2437_v3, %v7711_v48  ;;  %v7737_v49 = vadd.f32 %v7402_v15, %v9944_v41 }
 0x29d   : > { %v2276_v6 = vadd.f32 %v6051_v18, %v7347_v26  ;;  %6112 = vmatprep.mubr.msk.bf16.mxu0 %vm2021_vm2, %v2547_v37  ;;  %v9946_v18 = vld [vmem:[#allocation15_spill] sm:$0xff] }
 0x29e   : > { %v2267_v0 = vpop.f32.mrf.mxu1  ;;  %6113 = vmatmul.mubr.msk.bf16.gmra.mxu0 %vm2021_vm2, %v2548_v40  ;;  %9945 = vst [vmem:[#allocation13_spill] sm:$0xff] %v7737_v49  ;;  %v7741_v29 = vadd.f32 %v7402_v15, %v9946_v18  ;;  %v2499_v40 = vadd.f32 %v2435_v10, %v7719_v38 }
 0x29f   : > { %v2502_v23 = vadd.f32 %v2438_v33, %v2276_v6  ;;  %v2268_v14 = vadd.f32 %v2267_v0, %v7347_v26  ;;  %4308 = vrot.lane.b32.xlu1 %v2276_v6, %s6738_s15  ;;  %4280 = vrot.lane.b32.xlu0 %v7603_v51, %s6738_s15  ;;  %v7746_v0 = vadd.f32 %v7402_v15, %v9948_v21 }
 0x2a0   : > { %v6054_v37 = vpop.f32.mrf.mxu1  ;;  %9947 = vst [vmem:[#allocation15_spill] sm:$0xff] %v7741_v29  ;;  %v7750_v51 = vadd.f32 %v7402_v15, %v9950_v12  ;;  %v2442_v12 = vsub.f32 %v7368_v22, %v7741_v29 }
 0x2a1   : > { %v2550_v3 = vpack.c.bf16 %v2502_v23, %v2501_v28  ;;  %v2500_v33 = vadd.f32 %v2436_v50, %v2268_v14  ;;  %9949 = vst [vmem:[#allocation14_spill] sm:$0xff] %v7746_v0  ;;  %v7753_v8 = vadd.f32 %v6054_v37, %v7347_v26  ;;  %v2441_v50 = vsub.f32 %v7372_v13, %v7737_v49  ;;  %v9956_v49 = vld [vmem:[#allocation19_spill] sm:$0xff] }
 0x2a2   : > { %v2280_v6 = vpop.f32.mrf.mxu1  ;;  %9951 = vst [vmem:[#allocation16_spill] sm:$0xff] %v7750_v51  ;;  %v2439_v23 = vsub.f32 %v7381_v53, %v7746_v0 }
 0x2a3   : > { %v2549_v41 = vpack.c.bf16 %v2500_v33, %v2499_v40  ;;  %4304 = vrot.lane.b32.xlu1 %v2268_v14, %s6738_s15  ;;  %4290 = vrot.lane.b32.xlu0 %v7628_v35, %s6738_s15  ;;  %v7761_v21 = vadd.f32 %v2280_v6, %v7347_v26  ;;  %v2505_v35 = vadd.f32 %v2441_v50, %v7753_v8  ;;  %v9952_v33 = vld [vmem:[#allocation17_spill] sm:$0xff] }
 0x2a4   : > { %v6055_v10 = vpop.f32.mrf.mxu1  ;;  %v2440_v40 = vsub.f32 %v7385_v54, %v7750_v51  ;;  %v7783_v6 = vadd.f32 %v7402_v15, %v9952_v33 }
 0x2a5   : > { %v7764_v28 = vadd.f32 %v6055_v10, %v7347_v26  ;;  %6116 = vmatprep.mubr.msk.bf16.mxu0 %vm2021_vm2, %v2549_v41  ;;  %v2503_v10 = vadd.f32 %v2439_v23, %v7761_v21 }
 0x2a6   : > { %v2283_v14 = vpop.f32.mrf.mxu1  ;;  %6117 = vmatmul.mubr.msk.bf16.gmra.mxu0 %vm2021_vm2, %v2550_v3  ;;  %9953 = vst [vmem:[#allocation17_spill] sm:$0xff] %v7783_v6  ;;  %v7787_v3 = vadd.f32 %v7402_v15, %v7272_v34  ;;  %v2445_v23 = vsub.f32 %v7414_v36, %v7783_v6  ;;  %v9959_v6 = vld [vmem:[#allocation21_spill] sm:$0xff] }
 0x2a7   : > { %v2506_v37 = vadd.f32 %v2442_v12, %v7764_v28  ;;  %v7775_v18 = vadd.f32 %v2283_v14, %v7347_v26  ;;  %4286 = vrot.lane.b32.xlu0 %v7634_v55, %s6738_s15  ;;  %v9954_v14 = vld [vmem:[#allocation18_spill] sm:$0xff]  ;;  %v7797_v55 = vadd.f32 %v7402_v15, %v9956_v49 }
 0x2a8   : > { %v6058_v41 = vpop.f32.mrf.mxu1  ;;  %v7793_v0 = vadd.f32 %v7402_v15, %v9954_v14  ;;  %v2446_v49 = vsub.f32 %v7422_v56, %v7787_v3 }
 0x2a9   : > { %v2552_v50 = vpack.c.bf16 %v2506_v37, %v2505_v35  ;;  %v2504_v12 = vadd.f32 %v2440_v40, %v7775_v18  ;;  %9957 = vst [vmem:[#allocation19_spill] sm:$0xff] %v7797_v55  ;;  %v7800_v29 = vadd.f32 %v6058_v41, %v7347_v26 }
 0x2aa   : > { %9955 = vst [vmem:[#allocation18_spill] sm:$0xff] %v7793_v0  ;;  %v2296_v33 = vpop.f32.mrf.mxu1  ;;  %v2443_v40 = vsub.f32 %v7432_v39, %v7793_v0  ;;  %v7829_v0 = vadd.f32 %v7402_v15, %v7292_v25 }
 0x2ab   : > { %v2551_v51 = vpack.c.bf16 %v2504_v12, %v2503_v10  ;;  %4288 = vrot.lane.b32.xlu0 %v7647_v20, %s6738_s15  ;;  %v7807_v35 = vadd.f32 %v2296_v33, %v7347_v26  ;;  %v2444_v20 = vsub.f32 %v7436_v57, %v7797_v55  ;;  %v2509_v10 = vadd.f32 %v2445_v23, %v7800_v29 }
 0x2ac   : > { %v6059_v34 = vpop.f32.mrf.mxu1 }
 0x2ad   : > { %v2308_v37 = vadd.f32 %v6059_v34, %v7347_v26  ;;  %6120 = vmatprep.mubr.msk.bf16.mxu0 %vm2021_vm2, %v2551_v51  ;;  %v9958_v51 = vld [vmem:[#allocation20_spill] sm:$0xff] }
 0x2ae   : > { %v2299_v41 = vpop.f32.mrf.mxu1  ;;  %6121 = vmatmul.mubr.msk.bf16.gmra.mxu0 %vm2021_vm2, %v2552_v50  ;;  %v7825_v33 = vadd.f32 %v7402_v15, %v9958_v51  ;;  %v2507_v50 = vadd.f32 %v2443_v40, %v7807_v35 }
 0x2af   : > { %v2510_v12 = vadd.f32 %v2446_v49, %v2308_v37  ;;  %v2300_v14 = vadd.f32 %v2299_v41, %v7347_v26  ;;  %4324 = vrot.lane.b32.xlu1 %v2308_v37, %s6738_s15  ;;  %4298 = vrot.lane.b32.xlu0 %v7671_v42, %s6738_s15  ;;  %v7834_v41 = vadd.f32 %v7402_v15, %v9959_v6 }
 0x2b0   : > { %v6062_v34 = vpop.f32.mrf.mxu1  ;;  %v7838_v42 = vadd.f32 %v7402_v15, %v7296_v30  ;;  %v2449_v40 = vsub.f32 %v7473_v60, %v7825_v33 }
 0x2b1   : > { %v2554_v23 = vpack.c.bf16 %v2510_v12, %v2509_v10  ;;  %v2508_v49 = vadd.f32 %v2444_v20, %v2300_v14  ;;  %v7841_v55 = vadd.f32 %v6062_v34, %v7347_v26  ;;  %v2450_v20 = vsub.f32 %v7477_v62, %v7829_v0 }
 0x2b2   : > { %v2312_v37 = vpop.f32.mrf.mxu1  ;;  %v2447_v10 = vsub.f32 %v7485_v61, %v7834_v41 }
 0x2b3   : > { %v2553_v51 = vpack.c.bf16 %v2508_v49, %v2507_v50  ;;  %4320 = vrot.lane.b32.xlu1 %v2300_v14, %s6738_s15  ;;  %4294 = vrot.lane.b32.xlu0 %v7677_v46, %s6738_s15  ;;  %v7849_v6 = vadd.f32 %v2312_v37, %v7347_v26  ;;  %v2448_v46 = vsub.f32 %v7489_v63, %v7838_v42 }
 0x2b4   : > { %v6063_v25 = vpop.f32.mrf.mxu1  ;;  %v2513_v14 = vadd.f32 %v2449_v40, %v7841_v55  ;;  %v7867_v49 = vadd.f32 %v7402_v15, %v7302_v17 }
 0x2b5   : > { %v2324_v30 = vadd.f32 %v6063_v25, %v7347_v26  ;;  %6124 = vmatprep.mubr.msk.bf16.mxu0 %vm2021_vm2, %v2553_v51  ;;  %v7871_v51 = vadd.f32 %v7402_v15, %v7308_v24 }
 0x2b6   : > { %v2315_v12 = vpop.f32.mrf.mxu1  ;;  %6125 = vmatmul.mubr.msk.bf16.gmra.mxu0 %vm2021_vm2, %v2554_v23  ;;  %9960 = vst [vmem:[#allocation20_spill] sm:$0xff] %v7867_v49  ;;  %v2511_v23 = vadd.f32 %v2447_v10, %v7849_v6  ;;  %v2453_v10 = vsub.f32 %v7520_v45, %v7867_v49  ;;  %v9964_v49 = vld [vmem:[#allocation22_spill] sm:$0xff] }
 0x2b7   : > { %v2514_v34 = vadd.f32 %v2450_v20, %v2324_v30  ;;  %v2316_v50 = vadd.f32 %v2315_v12, %v7347_v26  ;;  %4332 = vrot.lane.b32.xlu1 %v2324_v30, %s6738_s15  ;;  %4306 = vrot.lane.b32.xlu0 %v7711_v48, %s6738_s15  ;;  %9961 = vst [vmem:[#allocation21_spill] sm:$0xff] %v7871_v51 }
 0x2b8   : > { %v6066_v37 = vpop.f32.mrf.mxu1  ;;  %v7876_v20 = vadd.f32 %v7402_v15, %v7304_v19  ;;  %v7880_v48 = vadd.f32 %v7402_v15, %v7310_v32 }
 0x2b9   : > { %v2556_v25 = vpack.c.bf16 %v2514_v34, %v2513_v14  ;;  %v2512_v40 = vadd.f32 %v2448_v46, %v2316_v50  ;;  %v7883_v12 = vadd.f32 %v6066_v37, %v7347_v26  ;;  %v2454_v46 = vsub.f32 %v7532_v4, %v7871_v51 }
 0x2ba   : > { %9962 = vst [vmem:[#allocation50_spill] sm:$0xff] %v7876_v20  ;;  %v2328_v30 = vpop.f32.mrf.mxu1  ;;  %v2451_v14 = vsub.f32 %v7542_v2, %v7876_v20 }
 0x2bb   : > { %v2555_v17 = vpack.c.bf16 %v2512_v40, %v2511_v23  ;;  %4328 = vrot.lane.b32.xlu1 %v2316_v50, %s6738_s15  ;;  %4302 = vrot.lane.b32.xlu0 %v7719_v38, %s6738_s15  ;;  %v7891_v19 = vadd.f32 %v2328_v30, %v7347_v26  ;;  %v2452_v38 = vsub.f32 %v7546_v5, %v7880_v48 }
 0x2bc   : > { %v6067_v24 = vpop.f32.mrf.mxu1  ;;  %v2517_v50 = vadd.f32 %v2453_v10, %v7883_v12  ;;  %v7909_v40 = vadd.f32 %v7402_v15, %v7312_v27 }
 0x2bd   : > { %v2340_v32 = vadd.f32 %v6067_v24, %v7347_v26  ;;  %6128 = vmatprep.mubr.msk.bf16.mxu0 %vm2021_vm2, %v2555_v17  ;;  %v9963_v17 = vld [vmem:[#allocation23_spill] sm:$0xff] }
 0x2be   : > { %v2331_v34 = vpop.f32.mrf.mxu1  ;;  %6129 = vmatmul.mubr.msk.bf16.gmra.mxu0 %vm2021_vm2, %v2556_v25  ;;  %v7913_v24 = vadd.f32 %v7402_v15, %v9963_v17  ;;  %v2515_v25 = vadd.f32 %v2451_v14, %v7891_v19 }
 0x2bf   : > { %v2518_v37 = vadd.f32 %v2454_v46, %v2340_v32  ;;  %v2332_v23 = vadd.f32 %v2331_v34, %v7347_v26  ;;  %4340 = vrot.lane.b32.xlu1 %v2340_v32, %s6738_s15  ;;  %4314 = vrot.lane.b32.xlu0 %v7753_v8, %s6738_s15  ;;  %v7918_v34 = vadd.f32 %v7402_v15, %v9964_v49  ;;  %v9965_v32 = vld [vmem:[#allocation24_spill] sm:$0xff] }
 0x2c0   : > { %v6070_v30 = vpop.f32.mrf.mxu1  ;;  %v7922_v8 = vadd.f32 %v7402_v15, %v9965_v32  ;;  %v2457_v49 = vsub.f32 %v7372_v13, %v7909_v40 }
 0x2c1   : > { %v2558_v10 = vpack.c.bf16 %v2518_v37, %v2517_v50  ;;  %v2516_v46 = vadd.f32 %v2452_v38, %v2332_v23  ;;  %v7925_v20 = vadd.f32 %v6070_v30, %v7347_v26  ;;  %v2458_v38 = vsub.f32 %v7368_v22, %v7913_v24 }
 0x2c2   : > { %v2344_v51 = vpop.f32.mrf.mxu1 }
 0x2c3   : > { %v2557_v27 = vpack.c.bf16 %v2516_v46, %v2515_v25  ;;  %4336 = vrot.lane.b32.xlu1 %v2332_v23, %s6738_s15  ;;  %4310 = vrot.lane.b32.xlu0 %v7761_v21, %s6738_s15  ;;  %v7935_v50 = vadd.f32 %v2344_v51, %v7347_v26  ;;  %v2455_v23 = vsub.f32 %v7381_v53, %v7918_v34  ;;  %v9966_v51 = vld [vmem:[#allocation25_spill] sm:$0xff] }
 0x2c4   : > { %v6071_v14 = vpop.f32.mrf.mxu1  ;;  %v2456_v21 = vsub.f32 %v7385_v54, %v7922_v8  ;;  %v2521_v22 = vadd.f32 %v2457_v49, %v7925_v20  ;;  %v7953_v53 = vadd.f32 %v7402_v15, %v9966_v51  ;;  %v9967_v54 = vld [vmem:[#allocation27_spill] sm:$0xff]  ;;  %v9970_v49 = vld [vmem:[#allocation28_spill] sm:$0xff] }
 0x2c5   : > { %v2356_v37 = vadd.f32 %v6071_v14, %v7347_v26  ;;  %6132 = vmatprep.mubr.msk.bf16.mxu0 %vm2021_vm2, %v2557_v27  ;;  %v7957_v46 = vadd.f32 %v7402_v15, %v9967_v54  ;;  %v9968_v14 = vld [vmem:[#allocation26_spill] sm:$0xff] }
 0x2c6   : > { %v2347_v30 = vpop.f32.mrf.mxu1  ;;  %6133 = vmatmul.mubr.msk.bf16.gmra.mxu0 %vm2021_vm2, %v2558_v10  ;;  %v2519_v10 = vadd.f32 %v2455_v23, %v7935_v50 }
 0x2c7   : > { %v2522_v17 = vadd.f32 %v2458_v38, %v2356_v37  ;;  %v7946_v13 = vadd.f32 %v2347_v30, %v7347_v26  ;;  %4348 = vrot.lane.b32.xlu1 %v2356_v37, %s6738_s15  ;;  %4316 = vrot.lane.b32.xlu0 %v7764_v28, %s6738_s15  ;;  %v7963_v38 = vadd.f32 %v7402_v15, %v9968_v14  ;;  %v9971_v14 = vld [vmem:[#allocation29_spill] sm:$0xff] }
 0x2c8   : > { %v6074_v25 = vpop.f32.mrf.mxu1  ;;  %v7967_v28 = vadd.f32 %v7402_v15, %v9970_v49  ;;  %v7995_v49 = vadd.f32 %v7402_v15, %v9971_v14 }
 0x2c9   : > { %v2560_v32 = vpack.c.bf16 %v2522_v17, %v2521_v22  ;;  %v2520_v27 = vadd.f32 %v2456_v21, %v7946_v13  ;;  %9969 = vst [vmem:[#allocation23_spill] sm:$0xff] %v7963_v38  ;;  %v7970_v51 = vadd.f32 %v6074_v25, %v7347_v26  ;;  %v2461_v21 = vsub.f32 %v7414_v36, %v7953_v53 }
 0x2ca   : > { %v2360_v37 = vpop.f32.mrf.mxu1  ;;  %v2462_v22 = vsub.f32 %v7422_v56, %v7957_v46  ;;  %v2459_v25 = vsub.f32 %v7432_v39, %v7963_v38  ;;  %9972 = vst [vmem:[#allocation22_spill] sm:$0xff] %v7995_v49 }
 0x2cb   : > { %v2559_v30 = vpack.c.bf16 %v2520_v27, %v2519_v10  ;;  %4312 = vrot.lane.b32.xlu0 %v7775_v18, %s6738_s15  ;;  %v7979_v17 = vadd.f32 %v2360_v37, %v7347_v26  ;;  %v2460_v18 = vsub.f32 %v7436_v57, %v7967_v28  ;;  %v2525_v36 = vadd.f32 %v2461_v21, %v7970_v51  ;;  %v9973_v37 = vld [vmem:[#allocation31_spill] sm:$0xff]  ;;  %v9974_v21 = vld [vmem:[#allocation30_spill] sm:$0xff] }
 0x2cc   : > { %v6075_v23 = vpop.f32.mrf.mxu1  ;;  %v7999_v57 = vadd.f32 %v7402_v15, %v9973_v37 }
 0x2cd   : > { %v2372_v54 = vadd.f32 %v6075_v23, %v7347_v26  ;;  %6136 = vmatprep.mubr.msk.bf16.mxu0 %vm2021_vm2, %v2559_v30 }
 0x2ce   : > { %v2363_v10 = vpop.f32.mrf.mxu1  ;;  %6137 = vmatmul.mubr.msk.bf16.gmra.mxu0 %vm2021_vm2, %v2560_v32  ;;  %v2523_v32 = vadd.f32 %v2459_v25, %v7979_v17 }
 0x2cf   : > { %v2526_v27 = vadd.f32 %v2462_v22, %v2372_v54  ;;  %v2364_v56 = vadd.f32 %v2363_v10, %v7347_v26  ;;  %4356 = vrot.lane.b32.xlu1 %v2372_v54, %s6738_s15  ;;  %4322 = vrot.lane.b32.xlu0 %v7800_v29, %s6738_s15  ;;  %v8004_v22 = vadd.f32 %v7402_v15, %v9974_v21  ;;  %v9976_v54 = vld [vmem:[#allocation32_spill] sm:$0xff]  ;;  %v9977_v21 = vld [vmem:[#allocation33_spill] sm:$0xff] }
 0x2d0   : > { %v6078_v39 = vpop.f32.mrf.mxu1  ;;  %v8008_v29 = vadd.f32 %v7402_v15, %v9976_v54  ;;  %v8039_v54 = vadd.f32 %v7402_v15, %v9977_v21 }
 0x2d1   : > { %v2562_v30 = vpack.c.bf16 %v2526_v27, %v2525_v36  ;;  %v2524_v23 = vadd.f32 %v2460_v18, %v2364_v56  ;;  %9975 = vst [vmem:[#allocation24_spill] sm:$0xff] %v8004_v22  ;;  %v8011_v38 = vadd.f32 %v6078_v39, %v7347_v26  ;;  %v2465_v18 = vsub.f32 %v7473_v60, %v7995_v49 }
 0x2d2   : > { %v2376_v10 = vpop.f32.mrf.mxu1  ;;  %v2466_v36 = vsub.f32 %v7477_v62, %v7999_v57 }
 0x2d3   : > { %v2561_v14 = vpack.c.bf16 %v2524_v23, %v2523_v32  ;;  %4352 = vrot.lane.b32.xlu1 %v2364_v56, %s6738_s15  ;;  %4318 = vrot.lane.b32.xlu0 %v7807_v35, %s6738_s15  ;;  %v8021_v27 = vadd.f32 %v2376_v10, %v7347_v26  ;;  %v2463_v56 = vsub.f32 %v7485_v61, %v8004_v22  ;;  %v9978_v10 = vld [vmem:[#allocation35_spill] sm:$0xff] }
 0x2d4   : > { %v6079_v25 = vpop.f32.mrf.mxu1  ;;  %v2464_v35 = vsub.f32 %v7489_v63, %v8008_v29  ;;  %v2529_v60 = vadd.f32 %v2465_v18, %v8011_v38  ;;  %v8043_v63 = vadd.f32 %v7402_v15, %v9978_v10 }
 0x2d5   : > { %v2388_v37 = vadd.f32 %v6079_v25, %v7347_v26  ;;  %v8024_v32 = vpop.permute.xlu0 %4250  ;;  %6140 = vmatprep.mubr.msk.bf16.mxu0 %vm2021_vm2, %v2561_v14 }
 0x2d6   : > { %v2379_v39 = vpop.f32.mrf.mxu1  ;;  %6141 = vmatmul.mubr.msk.bf16.gmra.mxu0 %vm2021_vm2, %v2562_v30  ;;  %v2527_v30 = vadd.f32 %v2463_v56, %v8021_v27 }
 0x2d7   : > { %v2530_v62 = vadd.f32 %v2466_v36, %v2388_v37  ;;  %v2380_v23 = vadd.f32 %v2379_v39, %v7347_v26  ;;  %4364 = vrot.lane.b32.xlu1 %v2388_v37, %s6738_s15  ;;  %4330 = vrot.lane.b32.xlu0 %v7841_v55, %s6738_s15  ;;  %v9979_v36 = vld [vmem:[#allocation34_spill] sm:$0xff]  ;;  %v9980_v39 = vld [vmem:[#allocation36_spill] sm:$0xff] }
 0x2d8   : > { %v6082_v61 = vpop.f32.mrf.mxu1  ;;  %v8050_v37 = vadd.f32 %v7402_v15, %v9979_v36  ;;  %v8054_v21 = vadd.f32 %v7402_v15, %v9980_v39 }
 0x2d9   : > { %v2564_v14 = vpack.c.bf16 %v2530_v62, %v2529_v60  ;;  %v2528_v25 = vadd.f32 %v2464_v35, %v2380_v23  ;;  %v8046_v18 = vpop.permute.xlu0 %4246  ;;  %v8057_v49 = vadd.f32 %v6082_v61, %v7347_v26  ;;  %v2469_v35 = vsub.f32 %v7520_v45, %v8039_v54  ;;  %v9981_v61 = vld [vmem:[#allocation38_spill] sm:$0xff] }
 0x2da   : > { %v2392_v55 = vpop.f32.mrf.mxu1  ;;  %v2470_v60 = vsub.f32 %v7532_v4, %v8043_v63  ;;  %v2468_v45 = vsub.f32 %v7546_v5, %v8054_v21 }
 0x2db   : > { %v2563_v22 = vpack.c.bf16 %v2528_v25, %v2527_v30  ;;  %4360 = vrot.lane.b32.xlu1 %v2380_v23, %s6738_s15  ;;  %4326 = vrot.lane.b32.xlu0 %v7849_v6, %s6738_s15  ;;  %v8067_v62 = vadd.f32 %v2392_v55, %v7347_v26  ;;  %v2467_v23 = vsub.f32 %v7542_v2, %v8050_v37 }
 0x2dc   : > { %v6083_v56 = vpop.f32.mrf.mxu1  ;;  %v2533_v4 = vadd.f32 %v2469_v35, %v8057_v49 }
 0x2dd   : > { %v2404_v15 = vadd.f32 %v6083_v56, %v7347_v26  ;;  %v4253_v10 = vpop.permute.xlu0 %4252  ;;  %6144 = vmatprep.mubr.msk.bf16.mxu0 %vm2021_vm2, %v2563_v22  ;;  %v2531_v2 = vadd.f32 %v2467_v23, %v8067_v62 }
 0x2de   : > { %v4441_v6 = vadd.f32 %v4253_v10, %v9981_v61  ;;  %v2395_v30 = vpop.f32.mrf.mxu1  ;;  %6145 = vmatmul.mubr.msk.bf16.gmra.mxu0 %vm2021_vm2, %v2564_v14  ;;  %v9982_v14 = vld [vmem:[#allocation40_spill] sm:$0xff] }
 0x2df   : > { %v2534_v25 = vadd.f32 %v2470_v60, %v2404_v15  ;;  %v2396_v36 = vadd.f32 %v2395_v30, %v7347_v26  ;;  %4338 = vrot.lane.b32.xlu0 %v7883_v12, %s6738_s15 }
 0x2e0   : > { %4572 = vrot.lane.b32.xlu1 %v4441_v6, %s6739_s13 }
 0x2e1   : > { %v2566_v22 = vpack.c.bf16 %v2534_v25, %v2533_v4  ;;  %v2532_v55 = vadd.f32 %v2468_v45, %v2396_v36  ;;  %v4249_v39 = vpop.permute.xlu0 %4248 }
 0x2e2   : > { %v4439_v56 = vadd.f32 %v4249_v39, %v9982_v14 }
 0x2e3   : > { %v2565_v10 = vpack.c.bf16 %v2532_v55, %v2531_v2  ;;  %4334 = vrot.lane.b32.xlu0 %v7891_v19, %s6738_s15  ;;  %v9986_v55 = vld [vmem:[#allocation42_spill] sm:$0xff] }
 0x2e4   : > { %4568 = vrot.lane.b32.xlu1 %v4439_v56, %s6739_s13 }
 0x2e5   : > { %v4259_v26 = vpop.permute.xlu0 %4258  ;;  %6148 = vmatprep.mubr.msk.bf16.mxu0 %vm2021_vm2, %v2565_v10 }
 0x2e6   : > { %6149 = vmatmul.mubr.msk.bf16.gmra.mxu0 %vm2021_vm2, %v2566_v22 }
 0x2e7   : > { %4346 = vrot.lane.b32.xlu0 %v7925_v20, %s6738_s15 }
 0x2e8   : > { %4372 = vrot.lane.b32.xlu1 %v2404_v15, %s6738_s15 }
 0x2e9   : > { %v4255_v5 = vpop.permute.xlu0 %4254  ;;  %v4269_v12 = vpop.permute.xlu1 %4268 }
 0x2ea   : > { %v4449_v15 = vadd.f32 %v4269_v12, %v7460_v16  ;;  %v9983_v16 = vld [vmem:[#allocation37_spill] sm:$0xff] }
 0x2eb   : > { %4342 = vrot.lane.b32.xlu0 %v7935_v50, %s6738_s15 }
 0x2ec   : > { %4368 = vrot.lane.b32.xlu1 %v2396_v36, %s6738_s15 }
 0x2ed   : > { %v4261_v19 = vpop.permute.xlu0 %4260  ;;  %v4265_v23 = vpop.permute.xlu1 %4264 }
 0x2ee   : > { %v4445_v35 = vadd.f32 %v4261_v19, %v7410_v31  ;;  %v4447_v61 = vadd.f32 %v4265_v23, %v7469_v9 }
 0x2ef   : > { %4344 = vrot.lane.b32.xlu0 %v7946_v13, %s6738_s15 }
 0x2f0   : > { %4580 = vrot.lane.b32.xlu1 %v4445_v35, %s6739_s13 }
 0x2f1   : > { %v4257_v60 = vpop.permute.xlu0 %4256  ;;  %v4277_v31 = vpop.permute.xlu1 %4276 }
 0x2f2   : > { %v4443_v20 = vadd.f32 %v4257_v60, %v7426_v58  ;;  %v9988_v60 = vld [vmem:[#allocation7_spill] sm:$0xff] }
 0x2f3   : > { %4354 = vrot.lane.b32.xlu0 %v7970_v51, %s6738_s15  ;;  %v4453_v51 = vadd.f32 %v4277_v31, %v7515_v43 }
 0x2f4   : > { %4576 = vrot.lane.b32.xlu1 %v4443_v20, %s6739_s13 }
 0x2f5   : > { %v4267_v50 = vpop.permute.xlu0 %4266  ;;  %v4273_v6 = vpop.permute.xlu1 %4272 }
 0x2f6   : > { %v4451_v9 = vadd.f32 %v4273_v6, %v7528_v1  ;;  %v9985_v1 = vld [vmem:[#allocation41_spill] sm:$0xff] }
 0x2f7   : > { %4350 = vrot.lane.b32.xlu0 %v7979_v17, %s6738_s15  ;;  %v4440_v17 = vadd.f32 %v8024_v32, %v9983_v16  ;;  %v4444_v2 = vadd.f32 %v4259_v26, %v9985_v1  ;;  %v9993_v16 = vld [vmem:[#allocation5_spill] sm:$0xff]  ;;  %v9996_v1 = vld [vmem:[#allocation47_spill] sm:$0xff] }
 0x2f8   : > { %4588 = vrot.lane.b32.xlu1 %v4449_v15, %s6739_s13 }
 0x2f9   : > { %v4263_v13 = vpop.permute.xlu0 %4262 }
 0x2fb   : > { %4362 = vrot.lane.b32.xlu0 %v8011_v38, %s6738_s15  ;;  %v9984_v38 = vld [vmem:[#allocation39_spill] sm:$0xff] }
 0x2fc   : > { %4584 = vrot.lane.b32.xlu1 %v4447_v61, %s6739_s13  ;;  %v4438_v45 = vadd.f32 %v8046_v18, %v9984_v38 }
 0x2fd   : > { %v4275_v58 = vpop.permute.xlu0 %4274 }
 0x2ff   : > { %4358 = vrot.lane.b32.xlu0 %v8021_v27, %s6738_s15 }
 0x300   : > { %4596 = vrot.lane.b32.xlu1 %v4453_v51, %s6739_s13 }
 0x301   : > { %v4271_v30 = vpop.permute.xlu0 %4270  ;;  %v4293_v27 = vpop.permute.xlu1 %4292 }
 0x303   : > { %4570 = vrot.lane.b32.xlu0 %v4440_v17, %s6739_s13  ;;  %v2574_v17 = vsub.s32 2, %v9993_v16 }
 0x304   : > { %4592 = vrot.lane.b32.xlu1 %v4451_v9, %s6739_s13 }
 0x305   : > { %v4283_v43 = vpop.permute.xlu0 %4282 }
 0x307   : > { %4566 = vrot.lane.b32.xlu0 %v4438_v45, %s6739_s13  ;;  %v9995_v45 = vld [vmem:[#allocation12_spill] sm:$0xff] }
 0x309   : > { %v4279_v4 = vpop.permute.xlu0 %4278  ;;  %v4301_v36 = vpop.permute.xlu1 %4300 }
 0x30a   : > { %v4465_v20 = vadd.f32 %v4301_v36, %v9988_v60 }
 0x30b   : > { %4370 = vrot.lane.b32.xlu0 %v8057_v49, %s6738_s15  ;;  %v4442_v49 = vadd.f32 %v4255_v5, %v9986_v55 }
 0x30d   : > { %v4285_v25 = vpop.permute.xlu0 %4284  ;;  %v4297_v39 = vpop.permute.xlu1 %4296 }
 0x30e   : > { %v4457_v32 = vadd.f32 %v4285_v25, %v7572_v44  ;;  %v4461_v44 = vadd.f32 %v4293_v27, %v7615_v47  ;;  %v4452_v47 = vadd.f32 %v4275_v58, %v7511_v59  ;;  %v9991_v59 = vld [vmem:[#allocation45_spill] sm:$0xff]  ;;  %v9992_v58 = vld [vmem:[#allocation11_spill] sm:$0xff] }
 0x30f   : > { %4366 = vrot.lane.b32.xlu0 %v8067_v62, %s6738_s15  ;;  %v4448_v62 = vadd.f32 %v4267_v50, %v7456_v52  ;;  %v9989_v52 = vld [vmem:[#allocation44_spill] sm:$0xff]  ;;  %s5609_s15 = sshll.u32 %s6727_s20, 7 }
 0x310   : > { %4604 = vrot.lane.b32.xlu1 %v4457_v32, %s6739_s13  ;;  %v4450_v23 = vadd.f32 %v4271_v30, %v9989_v52  ;;  %v9994_v30 = vld [vmem:[#allocation46_spill] sm:$0xff]  ;;  %v9998_v52 = vld [vmem:[#allocation49_spill] sm:$0xff]  ;;  %s5156_s28 = scalar_lea.hbm %s9785_s10, %s5609_s15 }
 0x311   : > { %v4281_v18 = vpop.permute.xlu0 %4280  ;;  %v4309_v10 = vpop.permute.xlu1 %4308  ;;  %v4454_v9 = vadd.f32 %v4279_v4, %v9994_v30 }
 0x312   : > { %v4455_v22 = vadd.f32 %v4281_v18, %v7581_v11  ;;  %v9987_v11 = vld [vmem:[#allocation43_spill] sm:$0xff]  ;;  %v4469_v51 = vadd.f32 %v4309_v10, %v9992_v58 }
 0x313   : > { %4578 = vrot.lane.b32.xlu0 %v4444_v2, %s6739_s13  ;;  %v4446_v26 = vadd.f32 %v4263_v13, %v9987_v11  ;;  %v4456_v13 = vadd.f32 %v4283_v43, %v9991_v59  ;;  %v8168_v43 = vld [vmem:[%s9783_s8] sm:$0xf] }
 0x314   : > { %4600 = vrot.lane.b32.xlu1 %v4455_v22, %s6739_s13  ;;  %v8171_v32 = vrot.slane %v8168_v43, %v2574_v17 }
 0x315   : > { %v4291_v14 = vpop.permute.xlu0 %4290  ;;  %v4305_v5 = vpop.permute.xlu1 %4304 }
 0x316   : > { %v4467_v27 = vadd.f32 %v4305_v5, %v9995_v45  ;;  %v4460_v4 = vadd.f32 %v4291_v14, %v9996_v1 }
 0x317   : > { %4574 = vrot.lane.b32.xlu0 %v4442_v49, %s6739_s13 }
 0x318   : > { %4612 = vrot.lane.b32.xlu1 %v4461_v44, %s6739_s13 }
 0x319   : > { %v4287_v56 = vpop.permute.xlu0 %4286 }
 0x31b   : > { %4586 = vrot.lane.b32.xlu0 %v4448_v62, %s6739_s13  ;;  %v9997_v62 = vld [vmem:[#allocation48_spill] sm:$0xff] }
 0x31c   : > { %v4458_v10 = vadd.f32 %v4287_v56, %v9997_v62  ;;  %v9999_v56 = vld [vmem:[#allocation15_spill] sm:$0xff] }
 0x31d   : > { %v4289_v12 = vpop.permute.xlu0 %4288 }
 0x31e   : > { %v4459_v19 = vadd.f32 %v4289_v12, %v7625_v7  ;;  %v9990_v7 = vld [vmem:[#allocation8_spill] sm:$0xff] }
 0x31f   : > { %4582 = vrot.lane.b32.xlu0 %v4446_v26, %s6739_s13  ;;  %v4463_v31 = vadd.f32 %v4297_v39, %v9990_v7 }
 0x320   : > { %4608 = vrot.lane.b32.xlu1 %v4459_v19, %s6739_s13 }
 0x321   : > { %v4299_v35 = vpop.permute.xlu0 %4298  ;;  %v8148_v50 = vpop.permute.xlu1 %4324 }
 0x323   : > { %4594 = vrot.lane.b32.xlu0 %v4452_v47, %s6739_s13 }
 0x324   : > { %4620 = vrot.lane.b32.xlu1 %v4465_v20, %s6739_s13 }
 0x325   : > { %v4295_v15 = vpop.permute.xlu0 %4294  ;;  %v8155_v6 = vpop.permute.xlu1 %4320 }
 0x327   : > { %4590 = vrot.lane.b32.xlu0 %v4450_v23, %s6739_s13  ;;  %v4464_v23 = vadd.f32 %v4299_v35, %v9998_v52  ;;  %v10000_v35 = vld [vmem:[#allocation6_spill] sm:$0xff] }
 0x328   : > { %4616 = vrot.lane.b32.xlu1 %v4463_v31, %s6739_s13  ;;  %v4462_v45 = vadd.f32 %v4295_v15, %v10000_v35  ;;  %v10005_v35 = vld [vmem:[#allocation13_spill] sm:$0xff] }
 0x329   : > { %v4307_v61 = vpop.permute.xlu0 %4306  ;;  %v8175_v2 = vpop.permute.xlu1 %4332 }
 0x32b   : > { %4602 = vrot.lane.b32.xlu0 %v4456_v13, %s6739_s13 }
 0x32c   : > { %4628 = vrot.lane.b32.xlu1 %v4469_v51, %s6739_s13 }
 0x32d   : > { %v8161_v38 = vpop.permute.xlu0 %4302  ;;  %v8187_v19 = vpop.permute.xlu1 %4328 }
 0x32e   : > { %v6090_v25 = vpop.f32.mrf.mxu0 }
 0x32f   : > { %4598 = vrot.lane.b32.xlu0 %v4454_v9, %s6739_s13  ;;  %v2727_v39 = vadd.f32 %v6090_v25, %v8171_v32 }
 0x330   : > { %4624 = vrot.lane.b32.xlu1 %v4467_v27, %s6739_s13  ;;  %v2718_v36 = vpop.f32.mrf.mxu0 }
 0x331   : > { %v8177_v18 = vpop.permute.xlu0 %4314  ;;  %v2719_v55 = vadd.f32 %v2718_v36, %v8171_v32  ;;  %v2975_v60 = vmax.f32 %v2727_v39, 0.0  ;;  %v8200_v27 = vpop.permute.xlu1 %4340 }
 0x332   : > { %v6091_v22 = vpop.f32.mrf.mxu0 }
 0x333   : > { %v2730_v49 = vadd.f32 %v6091_v22, %v8171_v32  ;;  %4610 = vrot.lane.b32.xlu0 %v4460_v4, %s6739_s13  ;;  %v2973_v47 = vmax.f32 %v2719_v55, 0.0  ;;  %v10001_v4 = vld [vmem:[#allocation16_spill] sm:$0xff] }
 0x334   : > { %v2721_v44 = vpop.f32.mrf.mxu0 }
 0x335   : > { %v2722_v11 = vadd.f32 %v2721_v44, %v8171_v32  ;;  %v8185_v26 = vpop.permute.xlu0 %4310  ;;  %v2976_v14 = vmax.f32 %v2730_v49, 0.0 }
 0x336   : > { %v6094_v12 = vpop.f32.mrf.mxu0 }
 0x337   : > { %v2974_v5 = vmax.f32 %v2722_v11, 0.0  ;;  %4606 = vrot.lane.b32.xlu0 %v4458_v10, %s6739_s13  ;;  %v3038_v59 = vpack.c.bf16 %v2976_v14, %v2975_v60  ;;  %v2743_v30 = vadd.f32 %v6094_v12, %v8171_v32  ;;  %v10002_v10 = vld [vmem:[#allocation9_spill] sm:$0xff]  ;;  %v4477_v12 = vadd.f32 %v8148_v50, %v7787_v3  ;;  %v4337_v60 = vpop.permute.xlu1 %4336 }
 0x338   : > { %v2734_v20 = vpop.f32.mrf.mxu0  ;;  %v4468_v11 = vadd.f32 %v4307_v61, %v10002_v10  ;;  %v4479_v10 = vadd.f32 %v8187_v19, %v7838_v42 }
 0x339   : > { %v3037_v7 = vpack.c.bf16 %v2974_v5, %v2973_v47  ;;  %v4317_v31 = vpop.permute.xlu0 %4316  ;;  %v2735_v51 = vadd.f32 %v2734_v20, %v8171_v32  ;;  %v2979_v44 = vmax.f32 %v2743_v30, 0.0 }
 0x33a   : > { %v4473_v13 = vadd.f32 %v4317_v31, %v9999_v56  ;;  %v6095_v58 = vpop.f32.mrf.mxu0 }
 0x33b   : > { %v2746_v17 = vadd.f32 %v6095_v58, %v8171_v32  ;;  %4618 = vrot.lane.b32.xlu0 %v4464_v23, %s6739_s13  ;;  %6156 = vmatprep.mubr.msk.bf16.mxu1 %vm2021_vm2, %v3037_v7  ;;  %v2977_v49 = vmax.f32 %v2735_v51, 0.0  ;;  %v10003_v7 = vld [vmem:[#allocation10_spill] sm:$0xff] }
 0x33c   : > { %4636 = vrot.lane.b32.xlu1 %v4473_v13, %s6739_s13  ;;  %v2737_v9 = vpop.f32.mrf.mxu0  ;;  %6157 = vmatmul.mubr.msk.bf16.vlgmr.msra.gmra.mxu1 %vm2021_vm2, %v3038_v59  ;;  %v4466_v3 = vadd.f32 %v8161_v38, %v10003_v7  ;;  %v10004_v59 = vld [vmem:[#allocation19_spill] sm:$0xff]  ;;  %v4349_v38 = vpop.permute.xlu1 %4348  ;;  %v4483_v7 = vadd.f32 %v4337_v60, %v7880_v48  ;;  %v10008_v48 = vld [vmem:[#allocation18_spill] sm:$0xff] }
 0x33d   : > { %v2738_v25 = vadd.f32 %v2737_v9, %v8171_v32  ;;  %v4313_v36 = vpop.permute.xlu0 %4312  ;;  %v2980_v1 = vmax.f32 %v2746_v17, 0.0  ;;  %v4475_v56 = vadd.f32 %v8155_v6, %v10004_v59 }
 0x33e   : > { %v4471_v22 = vadd.f32 %v4313_v36, %v10001_v4  ;;  %v6098_v55 = vpop.f32.mrf.mxu0 }
 0x33f   : > { %v2978_v39 = vmax.f32 %v2738_v25, 0.0  ;;  %4614 = vrot.lane.b32.xlu0 %v4462_v45, %s6739_s13  ;;  %v3040_v47 = vpack.c.bf16 %v2980_v1, %v2979_v44  ;;  %v2759_v23 = vadd.f32 %v6098_v55, %v8171_v32  ;;  %v4472_v45 = vadd.f32 %v8177_v18, %v10005_v35 }
 0x340   : > { %4632 = vrot.lane.b32.xlu1 %v4471_v22, %s6739_s13  ;;  %v2750_v62 = vpop.f32.mrf.mxu0  ;;  %v4481_v1 = vadd.f32 %v8175_v2, %v7829_v0 }
 0x341   : > { %v3039_v15 = vpack.c.bf16 %v2978_v39, %v2977_v49  ;;  %v4323_v14 = vpop.permute.xlu0 %4322  ;;  %v2751_v20 = vadd.f32 %v2750_v62, %v8171_v32  ;;  %v2983_v30 = vmax.f32 %v2759_v23, 0.0  ;;  %v10006_v39 = vld [vmem:[#allocation14_spill] sm:$0xff]  ;;  %v8236_v2 = vpop.permute.xlu1 %4356 }
 0x342   : > { %v6099_v5 = vpop.f32.mrf.mxu0  ;;  %v4470_v0 = vadd.f32 %v8185_v26, %v10006_v39 }
 0x343   : > { %v2762_v52 = vadd.f32 %v6099_v5, %v8171_v32  ;;  %4626 = vrot.lane.b32.xlu0 %v4468_v11, %s6739_s13  ;;  %6160 = vmatprep.mubr.msk.bf16.mxu1 %vm2021_vm2, %v3039_v15  ;;  %v2981_v51 = vmax.f32 %v2751_v20, 0.0 }
 0x344   : > { %4644 = vrot.lane.b32.xlu1 %v4477_v12, %s6739_s13  ;;  %v2753_v61 = vpop.f32.mrf.mxu0  ;;  %6161 = vmatmul.mubr.msk.bf16.gmra.mxu1 %vm2021_vm2, %v3040_v47 }
 0x345   : > { %v2754_v50 = vadd.f32 %v2753_v61, %v8171_v32  ;;  %v4319_v31 = vpop.permute.xlu0 %4318  ;;  %v2984_v13 = vmax.f32 %v2762_v52, 0.0  ;;  %v10007_v52 = vld [vmem:[#allocation17_spill] sm:$0xff]  ;;  %v8247_v42 = vpop.permute.xlu1 %4352 }
 0x346   : > { %v6102_v58 = vpop.f32.mrf.mxu0  ;;  %v4476_v26 = vadd.f32 %v4323_v14, %v10007_v52  ;;  %v4474_v60 = vadd.f32 %v4319_v31, %v10008_v48  ;;  %v4493_v48 = vadd.f32 %v8236_v2, %v7957_v46 }
 0x347   : > { %v2982_v17 = vmax.f32 %v2754_v50, 0.0  ;;  %4622 = vrot.lane.b32.xlu0 %v4466_v3, %s6739_s13  ;;  %v3042_v6 = vpack.c.bf16 %v2984_v13, %v2983_v30  ;;  %v2775_v49 = vadd.f32 %v6102_v58, %v8171_v32 }
 0x348   : > { %4640 = vrot.lane.b32.xlu1 %v4475_v56, %s6739_s13  ;;  %v2766_v9 = vpop.f32.mrf.mxu0 }
 0x349   : > { %v3041_v25 = vpack.c.bf16 %v2982_v17, %v2981_v51  ;;  %v4331_v36 = vpop.permute.xlu0 %4330  ;;  %v2767_v22 = vadd.f32 %v2766_v9, %v8171_v32  ;;  %v2987_v5 = vmax.f32 %v2775_v49, 0.0  ;;  %v4489_v51 = vadd.f32 %v4349_v38, %v7913_v24 }
 0x34a   : > { %v6103_v4 = vpop.f32.mrf.mxu0 }
 0x34b   : > { %v2778_v55 = vadd.f32 %v6103_v4, %v8171_v32  ;;  %4634 = vrot.lane.b32.xlu0 %v4472_v45, %s6739_s13  ;;  %6164 = vmatprep.mubr.msk.bf16.mxu1 %vm2021_vm2, %v3041_v25  ;;  %v2985_v12 = vmax.f32 %v2767_v22, 0.0 }
 0x34c   : > { %4652 = vrot.lane.b32.xlu1 %v4481_v1, %s6739_s13  ;;  %v2769_v18 = vpop.f32.mrf.mxu0  ;;  %6165 = vmatmul.mubr.msk.bf16.gmra.mxu1 %vm2021_vm2, %v3042_v6  ;;  %v8261_v1 = vpop.permute.xlu1 %4364  ;;  %v4480_v6 = vadd.f32 %v4331_v36, %v7825_v33 }
 0x34d   : > { %v2770_v44 = vadd.f32 %v2769_v18, %v8171_v32  ;;  %v4327_v62 = vpop.permute.xlu0 %4326  ;;  %v2988_v11 = vmax.f32 %v2778_v55, 0.0 }
 0x34e   : > { %v6106_v15 = vpop.f32.mrf.mxu0  ;;  %v4478_v39 = vadd.f32 %v4327_v62, %v7834_v41 }
 0x34f   : > { %v2986_v47 = vmax.f32 %v2770_v44, 0.0  ;;  %4630 = vrot.lane.b32.xlu0 %v4470_v0, %s6739_s13  ;;  %v3044_v3 = vpack.c.bf16 %v2988_v11, %v2987_v5  ;;  %v2791_v56 = vadd.f32 %v6106_v15, %v8171_v32  ;;  %v10009_v5 = vld [vmem:[#allocation50_spill] sm:$0xff] }
 0x350   : > { %4648 = vrot.lane.b32.xlu1 %v4479_v10, %s6739_s13  ;;  %v2782_v20 = vpop.f32.mrf.mxu0  ;;  %v8272_v10 = vpop.permute.xlu1 %4360 }
 0x351   : > { %v3043_v23 = vpack.c.bf16 %v2986_v47, %v2985_v12  ;;  %v8244_v61 = vpop.permute.xlu0 %4338  ;;  %v2783_v19 = vadd.f32 %v2782_v20, %v8171_v32  ;;  %v2991_v45 = vmax.f32 %v2791_v56, 0.0 }
 0x352   : > { %v6107_v50 = vpop.f32.mrf.mxu0 }
 0x353   : > { %v2794_v59 = vadd.f32 %v6107_v50, %v8171_v32  ;;  %4642 = vrot.lane.b32.xlu0 %v4476_v26, %s6739_s13  ;;  %6168 = vmatprep.mubr.msk.bf16.mxu1 %vm2021_vm2, %v3043_v23  ;;  %v2989_v9 = vmax.f32 %v2783_v19, 0.0 }
 0x354   : > { %4656 = vrot.lane.b32.xlu1 %v4483_v7, %s6739_s13  ;;  %v2785_v14 = vpop.f32.mrf.mxu0  ;;  %6169 = vmatmul.mubr.msk.bf16.gmra.mxu1 %vm2021_vm2, %v3044_v3 }
 0x355   : > { %v2786_v13 = vadd.f32 %v2785_v14, %v8171_v32  ;;  %v4335_v58 = vpop.permute.xlu0 %4334  ;;  %v2992_v17 = vmax.f32 %v2794_v59, 0.0  ;;  %v8284_v59 = vpop.permute.xlu1 %4572 }
 0x356   : > { %v6110_v30 = vpop.f32.mrf.mxu0  ;;  %v4482_v20 = vadd.f32 %v4335_v58, %v10009_v5  ;;  %10010 = vst [vmem:[#allocation25_spill] sm:$0xff] %v8284_v59 }
 0x357   : > { %v2990_v35 = vmax.f32 %v2786_v13, 0.0  ;;  %4638 = vrot.lane.b32.xlu0 %v4474_v60, %s6739_s13  ;;  %v3046_v22 = vpack.c.bf16 %v2992_v17, %v2991_v45  ;;  %v2807_v49 = vadd.f32 %v6110_v30, %v8171_v32  ;;  %v4491_v45 = vadd.f32 %v8247_v42, %v7967_v28 }
 0x358   : > { %4668 = vrot.lane.b32.xlu1 %v4489_v51, %s6739_s13  ;;  %v2798_v25 = vpop.f32.mrf.mxu0 }
 0x359   : > { %v3045_v31 = vpack.c.bf16 %v2990_v35, %v2989_v9  ;;  %v4347_v4 = vpop.permute.xlu0 %4346  ;;  %v2799_v24 = vadd.f32 %v2798_v25, %v8171_v32  ;;  %v2995_v12 = vmax.f32 %v2807_v49, 0.0  ;;  %v8295_v46 = vpop.permute.xlu1 %4568 }
 0x35a   : > { %v6111_v55 = vpop.f32.mrf.mxu0  ;;  %10011 = vst [vmem:[#allocation27_spill] sm:$0xff] %v8295_v46 }
 0x35b   : > { %v2810_v38 = vadd.f32 %v6111_v55, %v8171_v32  ;;  %4650 = vrot.lane.b32.xlu0 %v4480_v6, %s6739_s13  ;;  %6172 = vmatprep.mubr.msk.bf16.mxu1 %vm2021_vm2, %v3045_v31  ;;  %v2993_v11 = vmax.f32 %v2799_v24, 0.0  ;;  %v4497_v55 = vadd.f32 %v8261_v1, %v7999_v57 }
 0x35c   : > { %v2801_v18 = vpop.f32.mrf.mxu0  ;;  %6173 = vmatmul.mubr.msk.bf16.gmra.mxu1 %vm2021_vm2, %v3046_v22 }
 0x35d   : > { %v2802_v33 = vadd.f32 %v2801_v18, %v8171_v32  ;;  %v4343_v36 = vpop.permute.xlu0 %4342  ;;  %v2996_v0 = vmax.f32 %v2810_v38, 0.0 }
 0x35e   : > { %v6114_v44 = vpop.f32.mrf.mxu0  ;;  %v4486_v9 = vadd.f32 %v4343_v36, %v7918_v34  ;;  %v4373_v36 = vpop.permute.xlu1 %4372 }
 0x35f   : > { %v2994_v15 = vmax.f32 %v2802_v33, 0.0  ;;  %4646 = vrot.lane.b32.xlu0 %v4478_v39, %s6739_s13  ;;  %v3048_v23 = vpack.c.bf16 %v2996_v0, %v2995_v12  ;;  %v2823_v50 = vadd.f32 %v6114_v44, %v8171_v32  ;;  %v10012_v0 = vld [vmem:[#allocation23_spill] sm:$0xff] }
 0x360   : > { %v2814_v47 = vpop.f32.mrf.mxu0 }
 0x361   : > { %v3047_v52 = vpack.c.bf16 %v2994_v15, %v2993_v11  ;;  %v4345_v26 = vpop.permute.xlu0 %4344  ;;  %v2815_v7 = vadd.f32 %v2814_v47, %v8171_v32  ;;  %v2999_v17 = vmax.f32 %v2823_v50, 0.0  ;;  %v4495_v15 = vadd.f32 %v8272_v10, %v8008_v29 }
 0x362   : > { %v4487_v41 = vadd.f32 %v4345_v26, %v7922_v8  ;;  %v6115_v62 = vpop.f32.mrf.mxu0  ;;  %v4488_v8 = vadd.f32 %v4347_v4, %v7909_v40 }
 0x363   : > { %v2826_v3 = vadd.f32 %v6115_v62, %v8171_v32  ;;  %4654 = vrot.lane.b32.xlu0 %v4482_v20, %s6739_s13  ;;  %6176 = vmatprep.mubr.msk.bf16.mxu1 %vm2021_vm2, %v3047_v52  ;;  %v2997_v58 = vmax.f32 %v2815_v7, 0.0  ;;  %v10013_v52 = vld [vmem:[#allocation22_spill] sm:$0xff] }
 0x364   : > { %4664 = vrot.lane.b32.xlu1 %v4487_v41, %s6739_s13  ;;  %v2817_v19 = vpop.f32.mrf.mxu0  ;;  %6177 = vmatmul.mubr.msk.bf16.gmra.mxu1 %vm2021_vm2, %v3048_v23  ;;  %v10015_v23 = vld [vmem:[#allocation21_spill] sm:$0xff] }
 0x365   : > { %v2818_v56 = vadd.f32 %v2817_v19, %v8171_v32  ;;  %v4355_v14 = vpop.permute.xlu0 %4354  ;;  %v3000_v60 = vmax.f32 %v2826_v3, 0.0  ;;  %v4485_v41 = vadd.f32 %v8200_v27, %v10015_v23  ;;  %v4369_v3 = vpop.permute.xlu1 %4368 }
 0x366   : > { %v6118_v13 = vpop.f32.mrf.mxu0  ;;  %v4492_v28 = vadd.f32 %v4355_v14, %v7953_v53  ;;  %v10016_v14 = vld [vmem:[#allocation24_spill] sm:$0xff] }
 0x367   : > { %v2998_v51 = vmax.f32 %v2818_v56, 0.0  ;;  %4666 = vrot.lane.b32.xlu0 %v4488_v8, %s6739_s13  ;;  %v3050_v25 = vpack.c.bf16 %v3000_v60, %v2999_v17  ;;  %v2839_v4 = vadd.f32 %v6118_v13, %v8171_v32 }
 0x368   : > { %4676 = vrot.lane.b32.xlu1 %v4493_v48, %s6739_s13  ;;  %v2830_v30 = vpop.f32.mrf.mxu0 }
 0x369   : > { %v3049_v35 = vpack.c.bf16 %v2998_v51, %v2997_v58  ;;  %v4351_v40 = vpop.permute.xlu0 %4350  ;;  %v2831_v2 = vadd.f32 %v2830_v30, %v8171_v32  ;;  %v3003_v39 = vmax.f32 %v2839_v4, 0.0  ;;  %v4499_v58 = vadd.f32 %v4369_v3, %v8054_v21 }
 0x36a   : > { %v6119_v6 = vpop.f32.mrf.mxu0  ;;  %v4490_v44 = vadd.f32 %v4351_v40, %v10012_v0  ;;  %v10018_v40 = vld [vmem:[#allocation20_spill] sm:$0xff] }
 0x36b   : > { %v2842_v31 = vadd.f32 %v6119_v6, %v8171_v32  ;;  %4662 = vrot.lane.b32.xlu0 %v4486_v9, %s6739_s13  ;;  %6180 = vmatprep.mubr.msk.bf16.mxu1 %vm2021_vm2, %v3049_v35  ;;  %v3001_v49 = vmax.f32 %v2831_v2, 0.0  ;;  %v4484_v21 = vadd.f32 %v8244_v61, %v10018_v40  ;;  %v4501_v6 = vadd.f32 %v4373_v36, %v8043_v63 }
 0x36c   : > { %4672 = vrot.lane.b32.xlu1 %v4491_v45, %s6739_s13  ;;  %v2833_v34 = vpop.f32.mrf.mxu0  ;;  %6181 = vmatmul.mubr.msk.bf16.gmra.mxu1 %vm2021_vm2, %v3050_v25 }
 0x36d   : > { %v2834_v42 = vadd.f32 %v2833_v34, %v8171_v32  ;;  %v4363_v22 = vpop.permute.xlu0 %4362  ;;  %v3004_v24 = vmax.f32 %v2842_v31, 0.0 }
 0x36e   : > { %v6122_v38 = vpop.f32.mrf.mxu0  ;;  %v4496_v26 = vadd.f32 %v4363_v22, %v10013_v52 }
 0x36f   : > { %v3002_v18 = vmax.f32 %v2834_v42, 0.0  ;;  %4674 = vrot.lane.b32.xlu0 %v4492_v28, %s6739_s13  ;;  %v3052_v12 = vpack.c.bf16 %v3004_v24, %v3003_v39  ;;  %v2855_v5 = vadd.f32 %v6122_v38, %v8171_v32 }
 0x370   : > { %4684 = vrot.lane.b32.xlu1 %v4497_v55, %s6739_s13  ;;  %v2846_v33 = vpop.f32.mrf.mxu0 }
 0x371   : > { %v3051_v53 = vpack.c.bf16 %v3002_v18, %v3001_v49  ;;  %v4359_v11 = vpop.permute.xlu0 %4358  ;;  %v2847_v1 = vadd.f32 %v2846_v33, %v8171_v32  ;;  %v3007_v8 = vmax.f32 %v2855_v5, 0.0 }
 0x372   : > { %v6123_v57 = vpop.f32.mrf.mxu0  ;;  %v4494_v48 = vadd.f32 %v4359_v11, %v10016_v14 }
 0x373   : > { %v2858_v47 = vadd.f32 %v6123_v57, %v8171_v32  ;;  %4670 = vrot.lane.b32.xlu0 %v4490_v44, %s6739_s13  ;;  %6184 = vmatprep.mubr.msk.bf16.mxu1 %vm2021_vm2, %v3051_v53  ;;  %v3005_v50 = vmax.f32 %v2847_v1, 0.0 }
 0x374   : > { %4680 = vrot.lane.b32.xlu1 %v4495_v15, %s6739_s13  ;;  %v2849_v20 = vpop.f32.mrf.mxu0  ;;  %6185 = vmatmul.mubr.msk.bf16.gmra.mxu1 %vm2021_vm2, %v3052_v12 }
 0x375   : > { %v2850_v29 = vadd.f32 %v2849_v20, %v8171_v32  ;;  %v8322_v10 = vpop.permute.xlu0 %4570  ;;  %v3008_v62 = vmax.f32 %v2858_v47, 0.0 }
 0x376   : > { %10014 = vst [vmem:[#allocation26_spill] sm:$0xff] %v8322_v10  ;;  %v6126_v7 = vpop.f32.mrf.mxu0 }
 0x377   : > { %v3006_v19 = vmax.f32 %v2850_v29, 0.0  ;;  %4682 = vrot.lane.b32.xlu0 %v4496_v26, %s6739_s13  ;;  %v3054_v51 = vpack.c.bf16 %v3008_v62, %v3007_v8  ;;  %v2871_v9 = vadd.f32 %v6126_v7, %v8171_v32 }
 0x378   : > { %4660 = vrot.lane.b32.xlu1 %v4485_v41, %s6739_s13  ;;  %v2862_v56 = vpop.f32.mrf.mxu0 }
 0x379   : > { %v3053_v60 = vpack.c.bf16 %v3006_v19, %v3005_v50  ;;  %v8329_v13 = vpop.permute.xlu0 %4566  ;;  %v2863_v17 = vadd.f32 %v2862_v56, %v8171_v32  ;;  %v3011_v28 = vmax.f32 %v2871_v9, 0.0 }
 0x37a   : > { %10017 = vst [vmem:[#allocation28_spill] sm:$0xff] %v8329_v13  ;;  %v6127_v27 = vpop.f32.mrf.mxu0 }
 0x37b   : > { %v2874_v30 = vadd.f32 %v6127_v27, %v8171_v32  ;;  %4678 = vrot.lane.b32.xlu0 %v4494_v48, %s6739_s13  ;;  %6188 = vmatprep.mubr.msk.bf16.mxu1 %vm2021_vm2, %v3053_v60  ;;  %v3009_v4 = vmax.f32 %v2863_v17, 0.0 }
 0x37c   : > { %4688 = vrot.lane.b32.xlu1 %v4499_v58, %s6739_s13  ;;  %v2865_v35 = vpop.f32.mrf.mxu0  ;;  %6189 = vmatmul.mubr.msk.bf16.gmra.mxu1 %vm2021_vm2, %v3054_v51 }
 0x37d   : > { %v2866_v45 = vadd.f32 %v2865_v35, %v8171_v32  ;;  %v4371_v25 = vpop.permute.xlu0 %4370  ;;  %v3012_v2 = vmax.f32 %v2874_v30, 0.0 }
 0x37e   : > { %v6130_v31 = vpop.f32.mrf.mxu0  ;;  %v4500_v36 = vadd.f32 %v4371_v25, %v8039_v54 }
 0x37f   : > { %v3010_v34 = vmax.f32 %v2866_v45, 0.0  ;;  %4658 = vrot.lane.b32.xlu0 %v4484_v21, %s6739_s13  ;;  %v3056_v24 = vpack.c.bf16 %v3012_v2, %v3011_v28  ;;  %v2887_v18 = vadd.f32 %v6130_v31, %v8171_v32 }
 0x380   : > { %4692 = vrot.lane.b32.xlu1 %v4501_v6, %s6739_s13  ;;  %v2878_v42 = vpop.f32.mrf.mxu0 }
 0x381   : > { %v3055_v22 = vpack.c.bf16 %v3010_v34, %v3009_v4  ;;  %v4367_v55 = vpop.permute.xlu0 %4366  ;;  %v2879_v49 = vadd.f32 %v2878_v42, %v8171_v32  ;;  %v3015_v11 = vmax.f32 %v2887_v18, 0.0 }
 0x382   : > { %v4498_v61 = vadd.f32 %v4367_v55, %v8050_v37  ;;  %v6131_v38 = vpop.f32.mrf.mxu0 }
 0x383   : > { %v2890_v63 = vadd.f32 %v6131_v38, %v8171_v32  ;;  %6192 = vmatprep.mubr.msk.bf16.mxu1 %vm2021_vm2, %v3055_v22  ;;  %v3013_v44 = vmax.f32 %v2879_v49, 0.0 }
 0x384   : > { %4686 = vrot.lane.b32.xlu0 %v4498_v61, %s6739_s13  ;;  %v2881_v39 = vpop.f32.mrf.mxu0  ;;  %6193 = vmatmul.mubr.msk.bf16.gmra.mxu1 %vm2021_vm2, %v3056_v24  ;;  %v6479_v24 = vld [vmem:[%s9782_s7 + $0x8] sm:$0xff]  }
 0x385   : > { %v2882_v33 = vadd.f32 %v2881_v39, %v8171_v32  ;;  %v3016_v0 = vmax.f32 %v2890_v63, 0.0  ;;  %6220 = vmatprep.subr.bf16.mxu0 %v6479_v24 }
 0x386   : > { %v6134_v37 = vpop.f32.mrf.mxu0  ;;  %6221 = vmatpush3.bf16.msra.mxu0 %v6479_v24 }
 0x387   : > { %v3014_v53 = vmax.f32 %v2882_v33, 0.0  ;;  %v3058_v57 = vpack.c.bf16 %v3016_v0, %v3015_v11  ;;  %v2903_v20 = vadd.f32 %v6134_v37, %v8171_v32 }
 0x388   : > { %4690 = vrot.lane.b32.xlu0 %v4500_v36, %s6739_s13  ;;  %v2894_v15 = vpop.f32.mrf.mxu0  ;;  %s5615_s13 = sshll.u32 %s6872_s14, 6 }
 0x389   : > { %v3057_v12 = vpack.c.bf16 %v3014_v53, %v3013_v44  ;;  %v2895_v47 = vadd.f32 %v2894_v15, %v8171_v32  ;;  %v3019_v62 = vmax.f32 %v2903_v20, 0.0  ;;  %s507_s24 = scalar_lea.vmem %s9786_s11, %s5615_s13  ;;  %s459_s13 = scalar_lea.vmem [#allocation2], %s5312_s26 }
 0x38a   : > { %v6135_v1 = vpop.f32.mrf.mxu0  ;;  %s5158_s12 = sshll.u32 %s459_s13, 4  ;;  %s6740_s26 = smov [#allocation2]   ;;  %s9732_s12 = int_to_ptr.vmem [resolvable:$true] %s5158_s12 }
 0x38b   : > { %v2906_v5 = vadd.f32 %v6135_v1, %v8171_v32  ;;  %6196 = vmatprep.mubr.msk.bf16.mxu1 %vm2021_vm2, %v3057_v12  ;;  %v3017_v23 = vmax.f32 %v2895_v47, 0.0  ;;  %s6663_s1 = sshll.u32 %s6740_s26, 4  ;;  %s6664_s1 = int_to_ptr.vmem [resolvable:$false] %s6663_s1 }
 0x38c   : > { %v2897_v54 = vpop.f32.mrf.mxu0  ;;  %6197 = vmatmul.mubr.msk.bf16.gmra.mxu1 %vm2021_vm2, %v3058_v57  ;;  %s6665_s20 = scalar_lea.vmem %s6664_s1, 256  ;;  %p6666_p1 = scmp.lt.s32.totalorder %s9732_s12, %s6664_s1 }
 0x38d   : > { %v2898_v52 = vadd.f32 %v2897_v54, %v8171_v32  ;;  %v3020_v26 = vmax.f32 %v2906_v5, 0.0 }
 0x38e   : > { %v6138_v29 = vpop.f32.mrf.mxu0 }
 0x38f   : > { %v3018_v41 = vmax.f32 %v2898_v52, 0.0  ;;  %v3060_v50 = vpack.c.bf16 %v3020_v26, %v3019_v62  ;;  %v2919_v14 = vadd.f32 %v6138_v29, %v8171_v32 }
 0x390   : > { %v2910_v7 = vpop.f32.mrf.mxu0 }
 0x391   : > { %v3059_v3 = vpack.c.bf16 %v3018_v41, %v3017_v23  ;;  %v2911_v8 = vadd.f32 %v2910_v7, %v8171_v32  ;;  %v3023_v30 = vmax.f32 %v2919_v14, 0.0 }
 0x392   : > { %v6139_v19 = vpop.f32.mrf.mxu0 }
 0x393   : > { %v2922_v56 = vadd.f32 %v6139_v19, %v8171_v32  ;;  %6200 = vmatprep.mubr.msk.bf16.mxu1 %vm2021_vm2, %v3059_v3  ;;  %v3021_v27 = vmax.f32 %v2911_v8, 0.0 }
 0x394   : > { %v2913_v48 = vpop.f32.mrf.mxu0  ;;  %6201 = vmatmul.mubr.msk.bf16.gmra.mxu1 %vm2021_vm2, %v3060_v50  ;;  %v6480_v50 = vld [vmem:[%s9782_s7] sm:$0xff]  }
 0x395   : > { %v2914_v60 = vadd.f32 %v2913_v48, %v8171_v32  ;;  %v3024_v58 = vmax.f32 %v2922_v56, 0.0  ;;  %6222 = vmatprep.subr.bf16.mxu0 %v6480_v50 }
 0x396   : > { %v6142_v51 = vpop.f32.mrf.mxu0  ;;  %6223 = vmatpush3.bf16.msra.mxu0 %v6480_v50 }
 0x397   : > { %v3022_v17 = vmax.f32 %v2914_v60, 0.0  ;;  %v3062_v40 = vpack.c.bf16 %v3024_v58, %v3023_v30  ;;  %v2935_v6 = vadd.f32 %v6142_v51, %v8171_v32  ;;  %v3076_v30 = vsub.s32 3, %v9993_v16 }
 0x398   : > { %v2926_v9 = vpop.f32.mrf.mxu0 }
 0x399   : > { %v3061_v35 = vpack.c.bf16 %v3022_v17, %v3021_v27  ;;  %v2927_v45 = vadd.f32 %v2926_v9, %v8171_v32  ;;  %v3027_v22 = vmax.f32 %v2935_v6, 0.0 }
 0x39a   : > { %v6143_v21 = vpop.f32.mrf.mxu0 }
 0x39b   : > { %v2938_v25 = vadd.f32 %v6143_v21, %v8171_v32  ;;  %6204 = vmatprep.mubr.msk.bf16.mxu1 %vm2021_vm2, %v3061_v35  ;;  %v3025_v28 = vmax.f32 %v2927_v45, 0.0 }
 0x39c   : > { %v2929_v2 = vpop.f32.mrf.mxu0  ;;  %6205 = vmatmul.mubr.msk.bf16.gmra.mxu1 %vm2021_vm2, %v3062_v40  ;;  %v8401_v40 = vrot.slane %v8168_v43, %v3076_v30 }
 0x39d   : > { %v2930_v31 = vadd.f32 %v2929_v2, %v8171_v32  ;;  %v3028_v4 = vmax.f32 %v2938_v25, 0.0 }
 0x39e   : > { %v6146_v34 = vpop.f32.mrf.mxu0 }
 0x39f   : > { %v3026_v42 = vmax.f32 %v2930_v31, 0.0  ;;  %v3064_v38 = vpack.c.bf16 %v3028_v4, %v3027_v22  ;;  %v2951_v39 = vadd.f32 %v6146_v34, %v8171_v32 }
 0x3a0   : > { %v2942_v55 = vpop.f32.mrf.mxu0 }
 0x3a1   : > { %v3063_v61 = vpack.c.bf16 %v3026_v42, %v3025_v28  ;;  %v2943_v63 = vadd.f32 %v2942_v55, %v8171_v32  ;;  %v3031_v11 = vmax.f32 %v2951_v39, 0.0 }
 0x3a2   : > { %v6147_v49 = vpop.f32.mrf.mxu0 }
 0x3a3   : > { %v2954_v18 = vadd.f32 %v6147_v49, %v8171_v32  ;;  %6208 = vmatprep.mubr.msk.bf16.mxu1 %vm2021_vm2, %v3063_v61  ;;  %v3029_v44 = vmax.f32 %v2943_v63, 0.0 }
 0x3a4   : > { %v2945_v33 = vpop.f32.mrf.mxu0  ;;  %6209 = vmatmul.mubr.msk.bf16.gmra.mxu1 %vm2021_vm2, %v3064_v38 }
 0x3a5   : > { %v2946_v36 = vadd.f32 %v2945_v33, %v8171_v32  ;;  %v3032_v0 = vmax.f32 %v2954_v18, 0.0 }
 0x3a6   : > { %v6150_v37 = vpop.f32.mrf.mxu0 }
 0x3a7   : > { %v3030_v53 = vmax.f32 %v2946_v36, 0.0  ;;  %v3066_v57 = vpack.c.bf16 %v3032_v0, %v3031_v11  ;;  %v2967_v20 = vadd.f32 %v6150_v37, %v8171_v32 }
 0x3a8   : > { %v2958_v15 = vpop.f32.mrf.mxu0 }
 0x3a9   : > { %v3065_v12 = vpack.c.bf16 %v3030_v53, %v3029_v44  ;;  %v2959_v47 = vadd.f32 %v2958_v15, %v8171_v32  ;;  %v3035_v41 = vmax.f32 %v2967_v20, 0.0 }
 0x3aa   : > { %v6151_v1 = vpop.f32.mrf.mxu0 }
 0x3ab   : > { %v2970_v5 = vadd.f32 %v6151_v1, %v8171_v32  ;;  %6212 = vmatprep.mubr.msk.bf16.mxu1 %vm2021_vm2, %v3065_v12  ;;  %v3033_v29 = vmax.f32 %v2959_v47, 0.0 }
 0x3ac   : > { %v2961_v54 = vpop.f32.mrf.mxu0  ;;  %6213 = vmatmul.mubr.msk.bf16.gmra.mxu1 %vm2021_vm2, %v3066_v57 }
 0x3ad   : > { %v2962_v52 = vadd.f32 %v2961_v54, %v8171_v32  ;;  %v3036_v26 = vmax.f32 %v2970_v5, 0.0 }
 0x3af   : > { %v3034_v23 = vmax.f32 %v2962_v52, 0.0  ;;  %v3068_v7 = vpack.c.bf16 %v3036_v26, %v3035_v41 }
 0x3b1   : > { %v3067_v62 = vpack.c.bf16 %v3034_v23, %v3033_v29 }
 0x3b3   : > { %6216 = vmatprep.mubr.msk.bf16.mxu1 %vm2021_vm2, %v3067_v62 }
 0x3b4   : > { %6217 = vmatmul.mubr.msk.bf16.gmra.mxu1 %vm2021_vm2, %v3068_v7 }
 0x3fc   : > { %v6158_v3 = vpop.f32.mrf.mxu1 }
 0x3fd   : > { %v8408_v25 = vadd.f32 %v6158_v3, %v8401_v40 }
 0x3fe   : > { %v8393_v19 = vpop.f32.mrf.mxu1 }
 0x3ff   : > { %v8417_v16 = vsel %vm2021_vm2, %v8408_v25, -inf }
 0x400   : > { %v6159_v32 = vpop.f32.mrf.mxu1 }
 0x401   : > { %v8420_v43 = vadd.f32 %v6159_v32, %v8401_v40 }
 0x402   : > { %v8395_v8 = vpop.f32.mrf.mxu1 }
 0x403   : > { %v8435_v55 = vsel %vm2021_vm2, %v8420_v43, -inf }
 0x404   : > { %v6162_v56 = vpop.f32.mrf.mxu1 }
 0x405   : > { %v8438_v24 = vadd.f32 %v6162_v56, %v8401_v40 }
 0x406   : > { %v3236_v14 = vpop.f32.mrf.mxu1 }
 0x407   : > { %v8447_v63 = vadd.f32 %v3236_v14, %v8401_v40  ;;  %v8454_v33 = vsel %vm2021_vm2, %v8438_v24, -inf }
 0x408   : > { %v6163_v48 = vpop.f32.mrf.mxu1 }
 0x409   : > { %v8457_v36 = vadd.f32 %v6163_v48, %v8401_v40  ;;  %v8470_v11 = vsel %vm2021_vm2, %v8447_v63, -inf }
 0x40a   : > { %v3239_v60 = vpop.f32.mrf.mxu1 }
 0x40b   : > { %v8473_v15 = vadd.f32 %v3239_v60, %v8401_v40  ;;  %v8486_v5 = vsel %vm2021_vm2, %v8457_v36, -inf }
 0x40c   : > { %v6166_v58 = vpop.f32.mrf.mxu1 }
 0x40d   : > { %10019 = vst [vmem:[#allocation29_spill] sm:$0xff] %v8473_v15  ;;  %v8489_v20 = vadd.f32 %v6166_v58, %v8401_v40  ;;  %v8502_v23 = vsel %vm2021_vm2, %v8473_v15, -inf }
 0x40e   : > { %v3252_v51 = vpop.f32.mrf.mxu1 }
 0x40f   : > { %10020 = vst [vmem:[#allocation31_spill] sm:$0xff] %v8489_v20  ;;  %v8505_v41 = vadd.f32 %v3252_v51, %v8401_v40  ;;  %v8518_v32 = vsel %vm2021_vm2, %v8489_v20, -inf  ;;  %v8532_v51 = vpop.permute.xlu0 %4578 }
 0x410   : > { %v6167_v27 = vpop.f32.mrf.mxu1  ;;  %10026 = vst [vmem:[#allocation36_spill] sm:$0xff] %v8532_v51 }
 0x411   : > { %10022 = vst [vmem:[#allocation32_spill] sm:$0xff] %v8505_v41  ;;  %v8521_v56 = vadd.f32 %v6167_v27, %v8401_v40  ;;  %v8536_v30 = vsel %vm2021_vm2, %v8505_v41, -inf }
 0x412   : > { %v3255_v17 = vpop.f32.mrf.mxu1 }
 0x413   : > { %10024 = vst [vmem:[#allocation35_spill] sm:$0xff] %v8521_v56  ;;  %v8539_v27 = vadd.f32 %v3255_v17, %v8401_v40 }
 0x414   : > { %v6170_v9 = vpop.f32.mrf.mxu1 }
 0x415   : > { %10027 = vst [vmem:[#allocation38_spill] sm:$0xff] %v8539_v27 }
 0x416   : > { %v8398_v35 = vpop.f32.mrf.mxu1 }
 0x418   : > { %v8403_v21 = vpop.f32.mrf.mxu1 }
 0x41a   : > { %v8405_v45 = vpop.f32.mrf.mxu1 }
 0x41b   : > { %v8608_v38 = vadd.f32 %v8405_v45, %v8401_v40 }
 0x41c   : > { %v6174_v6 = vpop.f32.mrf.mxu1 }
 0x41d   : > { %v8411_v2 = vadd.f32 %v6174_v6, %v8401_v40  ;;  %10036 = vst [vmem:[#allocation8_spill] sm:$0xff] %v8608_v38 }
 0x41e   : > { %v8413_v31 = vpop.f32.mrf.mxu1 }
 0x41f   : > { %v8424_v4 = vsel %vm2021_vm2, %v8411_v2, -inf }
 0x420   : > { %v6175_v28 = vpop.f32.mrf.mxu1 }
 0x421   : > { %v8429_v42 = vadd.f32 %v6175_v28, %v8401_v40 }
 0x422   : > { %v8431_v22 = vpop.f32.mrf.mxu1 }
 0x423   : > { %v8442_v61 = vsel %vm2021_vm2, %v8429_v42, -inf }
 0x424   : > { %v6178_v49 = vpop.f32.mrf.mxu1 }
 0x425   : > { %v8450_v18 = vadd.f32 %v6178_v49, %v8401_v40 }
 0x426   : > { %v3300_v39 = vpop.f32.mrf.mxu1 }
 0x427   : > { %v8461_v0 = vsel %vm2021_vm2, %v8450_v18, -inf  ;;  %v8464_v37 = vadd.f32 %v3300_v39, %v8401_v40 }
 0x428   : > { %v6179_v53 = vpop.f32.mrf.mxu1 }
 0x429   : > { %v8477_v12 = vsel %vm2021_vm2, %v8464_v37, -inf  ;;  %v8480_v57 = vadd.f32 %v6179_v53, %v8401_v40  ;;  %v8552_v53 = vsel %vm2021_vm2, %v8521_v56, -inf }
 0x42a   : > { %v3303_v47 = vpop.f32.mrf.mxu1 }
 0x42b   : > { %v8493_v54 = vsel %vm2021_vm2, %v8480_v57, -inf  ;;  %v8496_v52 = vadd.f32 %v3303_v47, %v8401_v40  ;;  %v8555_v47 = vadd.f32 %v6170_v9, %v8401_v40 }
 0x42c   : > { %v6182_v29 = vpop.f32.mrf.mxu1 }
 0x42d   : > { %10021 = vst [vmem:[#allocation30_spill] sm:$0xff] %v8496_v52  ;;  %v8509_v62 = vsel %vm2021_vm2, %v8496_v52, -inf  ;;  %v8512_v7 = vadd.f32 %v6182_v29, %v8401_v40  ;;  %10029 = vst [vmem:[#allocation37_spill] sm:$0xff] %v8555_v47  ;;  %v8587_v3 = vsel %vm2021_vm2, %v8555_v47, -inf }
 0x42e   : > { %v3316_v50 = vpop.f32.mrf.mxu1 }
 0x42f   : > { %10023 = vst [vmem:[#allocation33_spill] sm:$0xff] %v8512_v7  ;;  %v8525_v14 = vsel %vm2021_vm2, %v8512_v7, -inf  ;;  %v8528_v48 = vadd.f32 %v3316_v50, %v8401_v40 }
 0x430   : > { %v3547_v60 = vmax.f32 %v8518_v32, %v8525_v14  ;;  %v6183_v58 = vpop.f32.mrf.mxu1  ;;  %v8568_v14 = vsel %vm2021_vm2, %v8539_v27, -inf }
 0x431   : > { %10025 = vst [vmem:[#allocation34_spill] sm:$0xff] %v8528_v48  ;;  %v8543_v6 = vsel %vm2021_vm2, %v8528_v48, -inf  ;;  %v8546_v28 = vadd.f32 %v6183_v58, %v8401_v40  ;;  %v8572_v58 = vadd.f32 %v8398_v35, %v8401_v40  ;;  %v8591_v35 = vadd.f32 %v8403_v21, %v8401_v40 }
 0x432   : > { %v3319_v39 = vpop.f32.mrf.mxu1 }
 0x433   : > { %10028 = vst [vmem:[#allocation40_spill] sm:$0xff] %v8546_v28  ;;  %v8559_v17 = vsel %vm2021_vm2, %v8546_v28, -inf  ;;  %v8562_v29 = vadd.f32 %v3319_v39, %v8401_v40  ;;  %10031 = vst [vmem:[#allocation41_spill] sm:$0xff] %v8572_v58  ;;  %v8604_v44 = vsel %vm2021_vm2, %v8572_v58, -inf  ;;  %v8621_v51 = vsel %vm2021_vm2, %v8591_v35, -inf }
 0x434   : > { %v3554_v50 = vmax.f32 %v8552_v53, %v8559_v17  ;;  %v6186_v32 = vpop.f32.mrf.mxu1  ;;  %v8583_v17 = vpop.permute.xlu0 %4574  ;;  %10034 = vst [vmem:[#allocation7_spill] sm:$0xff] %v8591_v35 }
 0x435   : > { %10030 = vst [vmem:[#allocation39_spill] sm:$0xff] %v8562_v29  ;;  %v8576_v9 = vsel %vm2021_vm2, %v8562_v29, -inf  ;;  %v8579_v49 = vadd.f32 %v6186_v32, %v8401_v40  ;;  %10033 = vst [vmem:[#allocation43_spill] sm:$0xff] %v8583_v17 }
 0x436   : > { %v3332_v53 = vpop.f32.mrf.mxu1 }
 0x437   : > { %10032 = vst [vmem:[#allocation42_spill] sm:$0xff] %v8579_v49  ;;  %v8595_v26 = vsel %vm2021_vm2, %v8579_v49, -inf  ;;  %v8598_v32 = vadd.f32 %v3332_v53, %v8401_v40  ;;  %v8636_v53 = vsel %vm2021_vm2, %v8608_v38, -inf }
 0x438   : > { %v6187_v1 = vpop.f32.mrf.mxu1  ;;  %v8632_v10 = vpop.permute.xlu0 %4586 }
 0x439   : > { %10035 = vst [vmem:[#allocation44_spill] sm:$0xff] %v8598_v32  ;;  %v8612_v21 = vsel %vm2021_vm2, %v8598_v32, -inf  ;;  %v8615_v34 = vadd.f32 %v6187_v1, %v8401_v40  ;;  %10039 = vst [vmem:[#allocation5_spill] sm:$0xff] %v8632_v10 }
 0x43a   : > { %v3335_v39 = vpop.f32.mrf.mxu1 }
 0x43b   : > { %10037 = vst [vmem:[#allocation45_spill] sm:$0xff] %v8615_v34  ;;  %v8625_v17 = vsel %vm2021_vm2, %v8615_v34, -inf  ;;  %v8628_v45 = vadd.f32 %v3335_v39, %v8401_v40  ;;  %v8644_v39 = vpop.permute.xlu1 %4580 }
 0x43c   : > { %v6190_v1 = vpop.f32.mrf.mxu1  ;;  %10040 = vst [vmem:[#allocation46_spill] sm:$0xff] %v8644_v39  ;;  %v8646_v59 = vpop.permute.xlu0 %4582 }
 0x43d   : > { %10038 = vst [vmem:[#allocation11_spill] sm:$0xff] %v8628_v45  ;;  %v8640_v46 = vsel %vm2021_vm2, %v8628_v45, -inf  ;;  %10041 = vst [vmem:[#allocation12_spill] sm:$0xff] %v8646_v59  ;;  %v8661_v59 = vadd.f32 %v8413_v31, %v8401_v40 }
 0x43e   : > { %v3348_v34 = vpop.f32.mrf.mxu1 }
 0x43f   : > { %v8648_v10 = vpop.permute.xlu1 %4576  ;;  %v3476_v41 = vsel %vm2021_vm2, %v8661_v59, -inf }
 0x440   : > { %v6191_v35 = vpop.f32.mrf.mxu1  ;;  %10042 = vst [vmem:[#allocation47_spill] sm:$0xff] %v8648_v10  ;;  %v8650_v47 = vpop.permute.xlu0 %4594  ;;  %v8665_v10 = vadd.f32 %v8431_v22, %v8401_v40 }
 0x441   : > { %10043 = vst [vmem:[#allocation48_spill] sm:$0xff] %v8650_v47 }
 0x442   : > { %v3351_v32 = vpop.f32.mrf.mxu1 }
 0x443   : > { %v8652_v45 = vpop.permute.xlu1 %4588 }
 0x444   : > { %v6194_v58 = vpop.f32.mrf.mxu1  ;;  %10044 = vst [vmem:[#allocation49_spill] sm:$0xff] %v8652_v45  ;;  %v8657_v39 = vpop.permute.xlu0 %4590 }
 0x445   : > { %10046 = vst [vmem:[#allocation6_spill] sm:$0xff] %v8657_v39  ;;  %v8677_v39 = vadd.f32 %v8395_v8, %v8401_v40  ;;  %v8694_v8 = vadd.f32 %v3348_v34, %v8401_v40 }
 0x446   : > { %v3364_v49 = vpop.f32.mrf.mxu1 }
 0x447   : > { %v8682_v48 = vpop.permute.xlu1 %4584  ;;  %v3482_v20 = vsel %vm2021_vm2, %v8677_v39, -inf }
 0x448   : > { %v6195_v38 = vpop.f32.mrf.mxu1  ;;  %10049 = vst [vmem:[#allocation10_spill] sm:$0xff] %v8682_v48  ;;  %v8698_v48 = vpop.permute.xlu0 %4602 }
 0x449   : > { %10051 = vst [vmem:[#allocation13_spill] sm:$0xff] %v8698_v48 }
 0x44a   : > { %v3367_v29 = vpop.f32.mrf.mxu1 }
 0x44c   : > { %v6198_v27 = vpop.f32.mrf.mxu1 }
 0x44d   : > { %v8655_v13 = vadd.f32 %v6198_v27, %v8401_v40  ;;  %v8673_v27 = vadd.f32 %v8393_v19, %v8401_v40 }
 0x44e   : > { %v3380_v28 = vpop.f32.mrf.mxu1 }
 0x44f   : > { %10045 = vst [vmem:[#allocation15_spill] sm:$0xff] %v8655_v13  ;;  %v3548_v47 = vsel %vm2021_vm2, %v8655_v13, -inf  ;;  %v3475_v7 = vsel %vm2021_vm2, %v8673_v27, -inf }
 0x450   : > { %v8669_v56 = vmax.f32 %v3547_v60, %v3548_v47  ;;  %v6199_v45 = vpop.f32.mrf.mxu1  ;;  %v3483_v60 = vsel %vm2021_vm2, %v8665_v10, -inf  ;;  %v8689_v47 = vadd.f32 %v6190_v1, %v8401_v40  ;;  %v3477_v52 = vmax.f32 %v3475_v7, %v3476_v41 }
 0x451   : > { %v8680_v31 = vadd.f32 %v6199_v45, %v8401_v40  ;;  %v3484_v15 = vmax.f32 %v3482_v20, %v3483_v60  ;;  %v8722_v20 = vadd.f32 %v3351_v32, %v8401_v40  ;;  %v8725_v41 = vadd.f32 %v6194_v58, %v8401_v40 }
 0x452   : > { %10047 = vst [vmem:[#allocation16_spill] sm:$0xff] %v8669_v56  ;;  %v3383_v22 = vpop.f32.mrf.mxu1  ;;  %v3492_v34 = vsel %vm2021_vm2, %v8689_v47, -inf  ;;  %v10055_v7 = vmax.f32 %v8587_v3, %v8595_v26  ;;  %v10057_v58 = vmax.f32 %v8417_v16, %v8424_v4  ;;  %v8747_v26 = vadd.f32 %v3367_v29, %v8401_v40 }
 0x453   : > { %10048 = vst [vmem:[#allocation9_spill] sm:$0xff] %v8680_v31  ;;  %v3555_v19 = vsel %vm2021_vm2, %v8680_v31, -inf  ;;  %v8750_v3 = vadd.f32 %v3380_v28, %v8401_v40  ;;  %v3485_v28 = vsel %vm2021_vm2, %v8722_v20, -inf  ;;  %v8771_v29 = vadd.f32 %v3383_v22, %v8401_v40 }
 0x454   : > { %v8696_v45 = vmax.f32 %v3554_v50, %v3555_v19  ;;  %v6202_v13 = vpop.f32.mrf.mxu1  ;;  %v8710_v50 = vadd.f32 %v6191_v35, %v8401_v40  ;;  %v3493_v56 = vmax.f32 %v10057_v58, %v3492_v34  ;;  %v10063_v22 = vmax.f32 %v8435_v55, %v8442_v61 }
 0x455   : > { %v8705_v1 = vadd.f32 %v6202_v13, %v8401_v40  ;;  %v3478_v13 = vsel %vm2021_vm2, %v8694_v8, -inf }
 0x456   : > { %10050 = vst [vmem:[#allocation19_spill] sm:$0xff] %v8696_v45  ;;  %v3396_v31 = vpop.f32.mrf.mxu1  ;;  %v8717_v45 = vpop.permute.xlu1 %4596 }
 0x457   : > { %10052 = vst [vmem:[#allocation14_spill] sm:$0xff] %v8705_v1  ;;  %v3576_v19 = vsel %vm2021_vm2, %v8705_v1, -inf  ;;  %v8715_v48 = vadd.f32 %v3396_v31, %v8401_v40  ;;  %10054 = vst [vmem:[#allocation18_spill] sm:$0xff] %v8717_v45  ;;  %v8733_v31 = vadd.f32 %v3364_v49, %v8401_v40  ;;  %v8736_v45 = vadd.f32 %v6195_v38, %v8401_v40 }
 0x458   : > { %v8730_v35 = vmax.f32 %v10055_v7, %v3576_v19  ;;  %v6203_v60 = vpop.f32.mrf.mxu1  ;;  %v10058_v38 = vmax.f32 %v8604_v44, %v8612_v21  ;;  %v8757_v7 = vpop.permute.xlu0 %4598  ;;  %v3520_v44 = vsel %vm2021_vm2, %v8725_v41, -inf }
 0x459   : > { %10053 = vst [vmem:[#allocation17_spill] sm:$0xff] %v8715_v48  ;;  %v3562_v1 = vsel %vm2021_vm2, %v8715_v48, -inf  ;;  %v8741_v32 = vadd.f32 %v6203_v60, %v8401_v40  ;;  %10059 = vst [vmem:[#allocation23_spill] sm:$0xff] %v8757_v7  ;;  %v3479_v60 = vmax.f32 %v3477_v52, %v3478_v13  ;;  %v3499_v48 = vsel %vm2021_vm2, %v8710_v50, -inf }
 0x45a   : > { %v8755_v49 = vmax.f32 %v10058_v38, %v3562_v1  ;;  %v3399_v19 = vpop.f32.mrf.mxu1  ;;  %v10061_v52 = vmax.f32 %v8621_v51, %v8625_v17  ;;  %v3506_v34 = vsel %vm2021_vm2, %v8733_v31, -inf  ;;  %v3527_v13 = vsel %vm2021_vm2, %v8736_v45, -inf }
 0x45b   : > { %10056 = vst [vmem:[#allocation50_spill] sm:$0xff] %v8741_v32  ;;  %v3583_v16 = vsel %vm2021_vm2, %v8741_v32, -inf  ;;  %v8764_v4 = vadd.f32 %v3399_v19, %v8401_v40  ;;  %v8785_v19 = vpop.permute.xlu1 %4592  ;;  %v3500_v51 = vmax.f32 %v10063_v22, %v3499_v48  ;;  %v3513_v17 = vsel %vm2021_vm2, %v8747_v26, -inf }
 0x45c   : > { %v8776_v21 = vmax.f32 %v10061_v52, %v3583_v16  ;;  %v6206_v1 = vpop.f32.mrf.mxu1  ;;  %10062 = vst [vmem:[#allocation21_spill] sm:$0xff] %v8785_v19  ;;  %v3534_v16 = vsel %vm2021_vm2, %v8750_v3, -inf  ;;  %v10064_v52 = vmax.f32 %v8636_v53, %v8640_v46  ;;  %v3486_v32 = vmax.f32 %v3484_v15, %v3485_v28  ;;  %v8818_v28 = vpop.permute.xlu0 %4610 }
 0x45d   : > { %10060 = vst [vmem:[#allocation22_spill] sm:$0xff] %v8764_v4  ;;  %v3569_v58 = vsel %vm2021_vm2, %v8764_v4, -inf  ;;  %v3421_v38 = vadd.f32 %v6206_v1, %v8401_v40  ;;  %v10065_v1 = vmax.f32 %v8454_v33, %v8461_v0  ;;  %v10066_v48 = vmax.f32 %v8470_v11, %v8477_v12  ;;  %10068 = vst [vmem:[#allocation24_spill] sm:$0xff] %v8818_v28 }
 0x45e   : > { %v8797_v7 = vmax.f32 %v10064_v52, %v3569_v58  ;;  %v3412_v4 = vpop.f32.mrf.mxu1  ;;  %v10067_v46 = vmax.f32 %v8486_v5, %v8493_v54  ;;  %v3541_v15 = vsel %vm2021_vm2, %v8771_v29, -inf  ;;  %v10070_v11 = vmax.f32 %v8536_v30, %v8543_v6 }
 0x45f   : > { %v8802_v19 = vmax.f32 %v10065_v1, %v3520_v44  ;;  %v3494_v55 = vsel %vm2021_vm2, %v3421_v38, -inf  ;;  %v3413_v61 = vadd.f32 %v3412_v4, %v8401_v40  ;;  %v8809_v22 = vmax.f32 %v10066_v48, %v3506_v34  ;;  %v8832_v34 = vpop.permute.xlu1 %4604 }
 0x460   : > { %v8814_v53 = vmax.f32 %v10067_v46, %v3527_v13  ;;  %v3495_v33 = vmax.f32 %v3493_v56, %v3494_v55  ;;  %v6207_v0 = vpop.f32.mrf.mxu1  ;;  %v10069_v4 = vmax.f32 %v8502_v23, %v8509_v62  ;;  %v8828_v12 = vmax.f32 %v10070_v11, %v3534_v16 }
 0x461   : > { %v3480_v5 = vsel %vm2021_vm2, %v3413_v61, -inf  ;;  %v3424_v54 = vadd.f32 %v6207_v0, %v8401_v40  ;;  %v8849_v0 = vpop.permute.xlu0 %4606 }
 0x462   : > { %v8823_v44 = vmax.f32 %v10069_v4, %v3513_v17  ;;  %v3589_v56 = vsub.f32 %v8408_v25, %v3495_v33  ;;  %v3605_v13 = vsub.f32 %v8411_v2, %v3495_v33  ;;  %v3621_v58 = vsub.f32 %v8689_v47, %v3495_v33  ;;  %v3415_v62 = vpop.f32.mrf.mxu1  ;;  %10072 = vst [vmem:[#allocation20_spill] sm:$0xff] %v8849_v0 }
 0x463   : > { %v3637_v23 = vsub.f32 %v3421_v38, %v3495_v33  ;;  %v10071_v17 = vmax.f32 %v8568_v14, %v8576_v9  ;;  %v3481_v6 = vmax.f32 %v3479_v60, %v3480_v5  ;;  %v3501_v16 = vsel %vm2021_vm2, %v3424_v54, -inf  ;;  %v8851_v5 = vpop.permute.xlu1 %4600 }
 0x464   : > { %v3416_v52 = vadd.f32 %v3415_v62, %v8401_v40  ;;  %v3655_v1 = vmul.f32 1.442695, %v3589_v56  ;;  %v3687_v55 = vmul.f32 1.442695, %v3605_v13  ;;  %v3719_v48 = vmul.f32 1.442695, %v3621_v58  ;;  %v6210_v46 = vpop.f32.mrf.mxu1 }
 0x465   : > { %v8840_v30 = vmax.f32 %v10071_v17, %v3541_v15  ;;  %v3502_v25 = vmax.f32 %v3500_v51, %v3501_v16  ;;  %v3751_v2 = vmul.f32 1.442695, %v3637_v23  ;;  %v3587_v47 = vsub.f32 %v8673_v27, %v3481_v6 }
 0x466   : > { %v3603_v38 = vsub.f32 %v8661_v59, %v3481_v6  ;;  %v3619_v33 = vsub.f32 %v8694_v8, %v3481_v6  ;;  %6481 = vpow2.f32 %v3655_v1  ;;  %v3635_v14 = vsub.f32 %v3413_v61, %v3481_v6  ;;  %v3428_v15 = vpop.f32.mrf.mxu1 }
 0x467   : > { %v3590_v9 = vsub.f32 %v8420_v43, %v3502_v25  ;;  %v3606_v60 = vsub.f32 %v8429_v42, %v3502_v25  ;;  %6483 = vpow2.f32 %v3687_v55  ;;  %v3651_v4 = vmul.f32 1.442695, %v3587_v47  ;;  %v8863_v55 = vpop.permute.xlu0 %4618 }
 0x468   : > { %v3683_v51 = vmul.f32 1.442695, %v3603_v38  ;;  %v3715_v11 = vmul.f32 1.442695, %v3619_v33  ;;  %6485 = vpow2.f32 %v3719_v48  ;;  %v3747_v27 = vmul.f32 1.442695, %v3635_v14  ;;  %v6211_v56 = vpop.f32.mrf.mxu1 }
 0x469   : > { %v3622_v59 = vsub.f32 %v8710_v50, %v3502_v25  ;;  %v3638_v8 = vsub.f32 %v3424_v54, %v3502_v25  ;;  %6487 = vpow2.f32 %v3751_v2  ;;  %v3657_v61 = vmul.f32 1.442695, %v3590_v9  ;;  %10073 = vst [vmem:[#allocation51_spill] sm:$0xff] %v8863_v55  ;;  %v8867_v2 = vpop.permute.xlu1 %4612 }
 0x46a   : > { %v3689_v43 = vmul.f32 1.442695, %v3606_v60  ;;  %v3487_v42 = vsel %vm2021_vm2, %v3416_v52, -inf  ;;  %6489 = vpow2.f32 %v3651_v4  ;;  %v3431_v62 = vpop.f32.mrf.mxu1  ;;  %v3437_v17 = vadd.f32 %v6210_v46, %v8401_v40  ;;  %10074 = vst [vmem:[#allocation52_spill] sm:$0xff] %v8867_v2 }
 0x46b   : > { %v3721_v13 = vmul.f32 1.442695, %v3622_v59  ;;  %v3753_v58 = vmul.f32 1.442695, %v3638_v8  ;;  %v3488_v23 = vmax.f32 %v3486_v32, %v3487_v42  ;;  %6491 = vpow2.f32 %v3683_v51  ;;  %v8888_v59 = vpop.permute.xlu0 %4614 }
 0x46c   : > { %v3429_v6 = vadd.f32 %v3428_v15, %v8401_v40  ;;  %v8858_v16 = vadd.f32 %v6211_v56, %v8401_v40  ;;  %6493 = vpow2.f32 %v3715_v11  ;;  %v3522_v48 = vsel %vm2021_vm2, %v3437_v17, -inf  ;;  %v6214_v46 = vpop.f32.mrf.mxu1  ;;  %10076 = vst [vmem:[#allocation54_spill] sm:$0xff] %v8888_v59 }
 0x46d   : > { %v3588_v50 = vsub.f32 %v8677_v39, %v3488_v23  ;;  %v3604_v54 = vsub.f32 %v8665_v10, %v3488_v23  ;;  %v3620_v1 = vsub.f32 %v8722_v20, %v3488_v23  ;;  %6495 = vpow2.f32 %v3747_v27 }
 0x46e   : > { %v3636_v32 = vsub.f32 %v3416_v52, %v3488_v23  ;;  %v3508_v25 = vsel %vm2021_vm2, %v3429_v6, -inf  ;;  %6497 = vpow2.f32 %v3657_v61  ;;  %v3523_v10 = vmax.f32 %v8802_v19, %v3522_v48  ;;  %v8882_v19 = vpop.permute.xlu1 %4608 }
 0x46f   : > { %v3653_v47 = vmul.f32 1.442695, %v3588_v50  ;;  %v3685_v38 = vmul.f32 1.442695, %v3604_v54  ;;  %v3717_v33 = vmul.f32 1.442695, %v3620_v1  ;;  %6499 = vpow2.f32 %v3689_v43 }
 0x470   : > { %v3749_v39 = vmul.f32 1.442695, %v3636_v32  ;;  %v3509_v20 = vmax.f32 %v8809_v22, %v3508_v25  ;;  %6501 = vpow2.f32 %v3721_v13  ;;  %v3529_v52 = vsel %vm2021_vm2, %v8858_v16, -inf  ;;  %10075 = vst [vmem:[#allocation53_spill] sm:$0xff] %v8882_v19 }
 0x471   : > { %v8874_v14 = vadd.f32 %v3431_v62, %v8401_v40  ;;  %v8877_v9 = vadd.f32 %v6214_v46, %v8401_v40  ;;  %6503 = vpow2.f32 %v3753_v58  ;;  %v3593_v60 = vsub.f32 %v8438_v24, %v3523_v10 }
 0x472   : > { %v3609_v15 = vsub.f32 %v8450_v18, %v3523_v10  ;;  %v3625_v4 = vsub.f32 %v8725_v41, %v3523_v10  ;;  %6505 = vpow2.f32 %v3653_v47  ;;  %v3641_v22 = vsub.f32 %v3437_v17, %v3523_v10 }
 0x473   : > { %v3591_v51 = vsub.f32 %v8447_v63, %v3509_v20  ;;  %v3607_v11 = vsub.f32 %v8464_v37, %v3509_v20  ;;  %v8886_v27 = vpop.eup %6481  ;;  %6507 = vpow2.f32 %v3685_v38  ;;  %v3663_v8 = vmul.f32 1.442695, %v3593_v60  ;;  %v8916_v38 = vpop.permute.xlu0 %4626 }
 0x474   : > { %v3695_v56 = vmul.f32 1.442695, %v3609_v15  ;;  %v3727_v24 = vmul.f32 1.442695, %v3625_v4  ;;  %v8890_v61 = vpop.eup %6483  ;;  %v3793_v18 = vsel %vm2021_vm2, %v8886_v27, 0.0  ;;  %6509 = vpow2.f32 %v3717_v33  ;;  %10078 = vst [vmem:[#allocation56_spill] sm:$0xff] %v8916_v38 }
 0x475   : > { %v3759_v41 = vmul.f32 1.442695, %v3641_v22  ;;  %v3623_v43 = vsub.f32 %v8733_v31, %v3509_v20  ;;  %v8895_v63 = vpop.eup %6485  ;;  %v3794_v37 = vsel %vm2021_vm2, %v8890_v61, 0.0  ;;  %6511 = vpow2.f32 %v3749_v39 }
 0x476   : > { %v3639_v42 = vsub.f32 %v3429_v6, %v3509_v20  ;;  %v3659_v13 = vmul.f32 1.442695, %v3591_v51  ;;  %v8899_v58 = vpop.eup %6487  ;;  %v3795_v23 = vadd.f32 %v3794_v37, %v3793_v18  ;;  %v3796_v62 = vsel %vm2021_vm2, %v8895_v63, 0.0  ;;  %v8909_v6 = vpop.permute.xlu1 %4620 }
 0x477   : > { %6513 = vpow2.f32 %v3663_v8  ;;  %v3691_v17 = vmul.f32 1.442695, %v3607_v11  ;;  %v8903_v50 = vpop.eup %6489  ;;  %v3798_v31 = vsel %vm2021_vm2, %v8899_v58, 0.0  ;;  %v3723_v54 = vmul.f32 1.442695, %v3623_v43  ;;  %10077 = vst [vmem:[#allocation55_spill] sm:$0xff] %v8909_v6 }
 0x478   : > { %6515 = vpow2.f32 %v3695_v56  ;;  %v3755_v1 = vmul.f32 1.442695, %v3639_v42  ;;  %v8907_v32 = vpop.eup %6491  ;;  %v3797_v48 = vadd.f32 %v3796_v62, %v3795_v23  ;;  %v3779_v25 = vsel %vm2021_vm2, %v8903_v50, 0.0  ;;  %v8952_v62 = vpop.permute.xlu0 %4622 }
 0x479   : > { %6517 = vpow2.f32 %v3727_v24  ;;  %v3530_v46 = vmax.f32 %v8814_v53, %v3529_v52  ;;  %v8914_v47 = vpop.eup %6493  ;;  %v3780_v33 = vsel %vm2021_vm2, %v8907_v32, 0.0  ;;  %v3515_v39 = vsel %vm2021_vm2, %v8874_v14, -inf  ;;  %10080 = vst [vmem:[#allocation58_spill] sm:$0xff] %v8952_v62  ;;  %v10089_v62 = vld [vmem:[#allocation31_spill] sm:$0xff] }
 0x47a   : > { %6519 = vpow2.f32 %v3759_v41  ;;  %v3550_v10 = vsel %vm2021_vm2, %v8877_v9, -inf  ;;  %v8924_v20 = vpop.eup %6495  ;;  %v3799_v60 = vadd.f32 %v3798_v31, %v3797_v48  ;;  %v3781_v15 = vadd.f32 %v3780_v33, %v3779_v25 }
 0x47b   : > { %v3782_v53 = vsel %vm2021_vm2, %v8914_v47, 0.0  ;;  %6521 = vpow2.f32 %v3659_v13  ;;  %v8928_v52 = vpop.eup %6497  ;;  %v3784_v4 = vsel %vm2021_vm2, %v8924_v20, 0.0  ;;  %v3594_v22 = vsub.f32 %v8457_v36, %v3530_v46 }
 0x47c   : > { %6523 = vpow2.f32 %v3691_v17  ;;  %v3610_v51 = vsub.f32 %v8480_v57, %v3530_v46  ;;  %v8934_v11 = vpop.eup %6499  ;;  %v3783_v8 = vadd.f32 %v3782_v53, %v3781_v15  ;;  %v3800_v56 = vsel %vm2021_vm2, %v8928_v52, 0.0  ;;  %v8946_v57 = vpop.permute.xlu1 %4616  ;;  %v10081_v53 = vld [vmem:[#allocation16_spill] sm:$0xff] }
 0x47d   : > { %6525 = vrcp.f32 %v3799_v60  ;;  %v3626_v24 = vsub.f32 %v8736_v45, %v3530_v46  ;;  %v8939_v18 = vpop.eup %6501  ;;  %v3801_v41 = vsel %vm2021_vm2, %v8934_v11, 0.0  ;;  %v3642_v43 = vsub.f32 %v8858_v16, %v3530_v46  ;;  %10079 = vst [vmem:[#allocation57_spill] sm:$0xff] %v8946_v57 }
 0x47e   : > { %6527 = vpow2.f32 %v3723_v54  ;;  %v3665_v36 = vmul.f32 1.442695, %v3594_v22  ;;  %v8944_v37 = vpop.eup %6503  ;;  %v3785_v42 = vadd.f32 %v3784_v4, %v3783_v8  ;;  %v3802_v13 = vadd.f32 %v3801_v41, %v3800_v56  ;;  %v8956_v54 = vpop.f32.mrf.mxu1 }
 0x47f   : > { %v3803_v23 = vsel %vm2021_vm2, %v8939_v18, 0.0  ;;  %6529 = vpow2.f32 %v3755_v1  ;;  %v8950_v45 = vpop.eup %6505  ;;  %v3805_v17 = vsel %vm2021_vm2, %v8944_v37, 0.0  ;;  %v3697_v16 = vmul.f32 1.442695, %v3610_v51 }
 0x480   : > { %6531 = vpow2.f32 %v3665_v36  ;;  %v3729_v31 = vmul.f32 1.442695, %v3626_v24  ;;  %v8958_v48 = vpop.eup %6507  ;;  %v3804_v25 = vadd.f32 %v3803_v23, %v3802_v13  ;;  %v3786_v46 = vsel %vm2021_vm2, %v8950_v45, 0.0  ;;  %v8980_v13 = vpop.permute.xlu1 %4628 }
 0x481   : > { %6533 = vrcp.f32 %v3785_v42  ;;  %v3761_v1 = vmul.f32 1.442695, %v3642_v43  ;;  %v8962_v33 = vpop.eup %6509  ;;  %v3787_v60 = vsel %vm2021_vm2, %v8958_v48, 0.0  ;;  %v3516_v15 = vmax.f32 %v8823_v44, %v3515_v39  ;;  %v10083_v43 = vld [vmem:[#allocation29_spill] sm:$0xff]  ;;  %v10084_v42 = vld [vmem:[#allocation30_spill] sm:$0xff]  ;;  %v6215_v39 = vpop.f32.mrf.mxu1 }
 0x482   : > { %6535 = vpow2.f32 %v3697_v16  ;;  %v3551_v4 = vmax.f32 %v10081_v53, %v3550_v10  ;;  %v8968_v22 = vpop.eup %6511  ;;  %v3806_v51 = vadd.f32 %v3805_v17, %v3804_v25  ;;  %v3788_v8 = vadd.f32 %v3787_v60, %v3786_v46  ;;  %10086 = vst [vmem:[#allocation30_spill] sm:$0xff] %v8980_v13  ;;  %v8987_v25 = vpop.permute.xlu0 %4634 }
 0x483   : > { %v3789_v56 = vsel %vm2021_vm2, %v8962_v33, 0.0  ;;  %6537 = vpow2.f32 %v3729_v31  ;;  %v3791_v41 = vsel %vm2021_vm2, %v8968_v22, 0.0  ;;  %v3592_v36 = vsub.f32 %v10083_v43, %v3516_v15 }
 0x484   : > { %v8972_v24 = vpop.eup %6513  ;;  %6539 = vpow2.f32 %v3761_v1  ;;  %v3608_v44 = vsub.f32 %v10084_v42, %v3516_v15  ;;  %v3790_v23 = vadd.f32 %v3789_v56, %v3788_v8  ;;  %v3624_v16 = vsub.f32 %v8747_v26, %v3516_v15  ;;  %v9014_v55 = vpop.permute.xlu1 %4624 }
 0x485   : > { %10082 = vst [vmem:[#allocation16_spill] sm:$0xff] %v8972_v24  ;;  %v8978_v10 = vpop.eup %6515  ;;  %6541 = vrcp.f32 %v3806_v51  ;;  %v3821_v17 = vsel %vm2021_vm2, %v8972_v24, 0.0  ;;  %v3640_v1 = vsub.f32 %v8874_v14, %v3516_v15  ;;  %v3661_v60 = vmul.f32 1.442695, %v3592_v36  ;;  %v3447_v14 = vpop.f32.mrf.mxu1  ;;  %v10104_v24 = vld [vmem:[#allocation9_spill] sm:$0xff] }
 0x486   : > { %10085 = vst [vmem:[#allocation29_spill] sm:$0xff] %v8978_v10  ;;  %v8985_v31 = vpop.eup %6517  ;;  %v3822_v46 = vsel %vm2021_vm2, %v8978_v10, 0.0  ;;  %v3693_v53 = vmul.f32 1.442695, %v3608_v44  ;;  %v3792_v51 = vadd.f32 %v3791_v41, %v3790_v23  ;;  %v3725_v42 = vmul.f32 1.442695, %v3624_v16 }
 0x487   : > { %10087 = vst [vmem:[#allocation59_spill] sm:$0xff] %v8985_v31  ;;  %v8992_v43 = vpop.eup %6519  ;;  %v3823_v8 = vadd.f32 %v3822_v46, %v3821_v17  ;;  %v3824_v56 = vsel %vm2021_vm2, %v8985_v31, 0.0  ;;  %6543 = vpow2.f32 %v3661_v60  ;;  %v3757_v38 = vmul.f32 1.442695, %v3640_v1  ;;  %v10091_v44 = vld [vmem:[#allocation33_spill] sm:$0xff]  ;;  %v10092_v46 = vld [vmem:[#allocation15_spill] sm:$0xff]  ;;  %v6218_v2 = vpop.f32.mrf.mxu1 }
 0x488   : > { %v8996_v26 = vpop.eup %6521  ;;  %v3826_v13 = vsel %vm2021_vm2, %v8992_v43, 0.0  ;;  %v3597_v6 = vsub.f32 %v10089_v62, %v3551_v4  ;;  %6545 = vrcp.f32 %v3792_v51  ;;  %v3613_v23 = vsub.f32 %v10091_v44, %v3551_v4  ;;  %10093 = vst [vmem:[#allocation33_spill] sm:$0xff] %v9014_v55  ;;  %v9018_v44 = vpop.permute.xlu0 %4630  ;;  %v10099_v55 = vld [vmem:[#allocation19_spill] sm:$0xff] }
 0x489   : > { %10088 = vst [vmem:[#allocation60_spill] sm:$0xff] %v8996_v26  ;;  %v9001_v15 = vpop.eup %6523  ;;  %v3825_v36 = vadd.f32 %v3824_v56, %v3823_v8  ;;  %v3807_v41 = vsel %vm2021_vm2, %v8996_v26, 0.0  ;;  %6547 = vpow2.f32 %v3693_v53  ;;  %v3629_v1 = vsub.f32 %v10092_v46, %v3551_v4  ;;  %v10102_v10 = vld [vmem:[#allocation35_spill] sm:$0xff] }
 0x48a   : > { %10090 = vst [vmem:[#allocation31_spill] sm:$0xff] %v9001_v15  ;;  %v9006_v17 = vpop.eup %6525  ;;  %v3808_v16 = vsel %vm2021_vm2, %v9001_v15, 0.0  ;;  %v3645_v62 = vsub.f32 %v8877_v9, %v3551_v4  ;;  %6549 = vpow2.f32 %v3725_v42  ;;  %v3671_v56 = vmul.f32 1.442695, %v3597_v6 }
 0x48b   : > { %v9012_v60 = vpop.eup %6527  ;;  %v3827_v51 = vadd.f32 %v3826_v13, %v3825_v36  ;;  %v3809_v8 = vadd.f32 %v3808_v16, %v3807_v41  ;;  %6551 = vpow2.f32 %v3757_v38  ;;  %v3703_v53 = vmul.f32 1.442695, %v3613_v23  ;;  %v9035_v16 = vpop.permute.xlu1 %4636 }
 0x48c   : > { %v9016_v57 = vpop.eup %6529  ;;  %v3810_v59 = vsel %vm2021_vm2, %v9012_v60, 0.0  ;;  %v3735_v46 = vmul.f32 1.442695, %v3629_v1  ;;  %v3767_v42 = vmul.f32 1.442695, %v3645_v62  ;;  %v3445_v38 = vadd.f32 %v8956_v54, %v8401_v40 }
 0x48d   : > { %10094 = vst [vmem:[#allocation15_spill] sm:$0xff] %v9016_v57  ;;  %v9022_v9 = vpop.eup %6531  ;;  %6553 = vrcp.f32 %v3827_v51  ;;  %v3811_v4 = vadd.f32 %v3810_v59, %v3809_v8  ;;  %v3812_v13 = vsel %vm2021_vm2, %v9016_v57, 0.0  ;;  %v3456_v41 = vadd.f32 %v6215_v39, %v8401_v40 }
 0x48e   : > { %10095 = vst [vmem:[#allocation61_spill] sm:$0xff] %v9022_v9  ;;  %v9026_v6 = vpop.eup %6533  ;;  %v3828_v36 = vsel %vm2021_vm2, %v9022_v9, 0.0  ;;  %6555 = vpow2.f32 %v3671_v56  ;;  %v9038_v1 = vadd.f32 %v3447_v14, %v8401_v40  ;;  %v9041_v62 = vadd.f32 %v6218_v2, %v8401_v40 }
 0x48f   : > { %v9033_v23 = vpop.eup %6535  ;;  %v3813_v59 = vadd.f32 %v3812_v13, %v3811_v4  ;;  %6557 = vpow2.f32 %v3703_v53  ;;  %v3536_v54 = vsel %vm2021_vm2, %v3445_v38, -inf  ;;  %v3557_v39 = vsel %vm2021_vm2, %v3456_v41, -inf  ;;  %v9056_v13 = vpop.permute.xlu0 %4642 }
 0x490   : > { %10096 = vst [vmem:[#allocation62_spill] sm:$0xff] %v9033_v23  ;;  %v9043_v51 = vpop.eup %6537  ;;  %v3829_v8 = vsel %vm2021_vm2, %v9033_v23, 0.0  ;;  %6559 = vpow2.f32 %v3735_v46  ;;  %v3537_v2 = vmax.f32 %v8828_v12, %v3536_v54  ;;  %10098 = vst [vmem:[#allocation64_spill] sm:$0xff] %v9056_v13  ;;  %v3558_v28 = vmax.f32 %v10099_v55, %v3557_v39  ;;  %v10101_v23 = vld [vmem:[#allocation34_spill] sm:$0xff]  ;;  %v10103_v13 = vld [vmem:[#allocation40_spill] sm:$0xff]  ;;  %v9071_v55 = vpop.permute.xlu1 %4632 }
 0x491   : > { %10097 = vst [vmem:[#allocation63_spill] sm:$0xff] %v9043_v51  ;;  %v9049_v56 = vpop.eup %6539  ;;  %6561 = vrcp.f32 %v3813_v59  ;;  %v3830_v53 = vadd.f32 %v3829_v8, %v3828_v36  ;;  %v3831_v14 = vsel %vm2021_vm2, %v9043_v51, 0.0  ;;  %v3543_v31 = vsel %vm2021_vm2, %v9038_v1, -inf  ;;  %v10100_v36 = vld [vmem:[#allocation32_spill] sm:$0xff] }
 0x492   : > { %v9054_v4 = vpop.eup %6541  ;;  %v3833_v46 = vsel %vm2021_vm2, %v9049_v56, 0.0  ;;  %6563 = vpow2.f32 %v3767_v42  ;;  %v3595_v8 = vsub.f32 %v10100_v36, %v3537_v2  ;;  %v3611_v51 = vsub.f32 %v10101_v23, %v3537_v2  ;;  %v3460_v36 = vpop.f32.mrf.mxu1 }
 0x493   : > { %v3832_v59 = vadd.f32 %v3831_v14, %v3830_v53  ;;  %v3627_v12 = vsub.f32 %v8750_v3, %v3537_v2  ;;  %v3643_v54 = vsub.f32 %v3445_v38, %v3537_v2  ;;  %v3598_v9 = vsub.f32 %v10102_v10, %v3558_v28 }
 0x494   : > { %v3614_v19 = vsub.f32 %v10103_v13, %v3558_v28  ;;  %v3630_v0 = vsub.f32 %v10104_v24, %v3558_v28  ;;  %v9069_v42 = vpop.eup %6543  ;;  %v3667_v15 = vmul.f32 1.442695, %v3595_v8  ;;  %v3699_v53 = vmul.f32 1.442695, %v3611_v51  ;;  %v9082_v51 = vpop.permute.xlu0 %4638 }
 0x495   : > { %10105 = vst [vmem:[#allocation19_spill] sm:$0xff] %v9069_v42  ;;  %v3834_v39 = vadd.f32 %v3833_v46, %v3832_v59  ;;  %v3731_v14 = vmul.f32 1.442695, %v3627_v12  ;;  %v9073_v26 = vpop.eup %6545  ;;  %v3814_v3 = vsel %vm2021_vm2, %v9069_v42, 0.0  ;;  %v3763_v38 = vmul.f32 1.442695, %v3643_v54 }
 0x496   : > { %v3646_v10 = vsub.f32 %v3456_v41, %v3558_v28  ;;  %v3673_v23 = vmul.f32 1.442695, %v3598_v9  ;;  %v9077_v2 = vpop.eup %6547  ;;  %v3705_v24 = vmul.f32 1.442695, %v3614_v19  ;;  %v3737_v13 = vmul.f32 1.442695, %v3630_v0 }
 0x497   : > { %10106 = vst [vmem:[#allocation32_spill] sm:$0xff] %v9077_v2  ;;  %6565 = vrcp.f32 %v3834_v39  ;;  %v3544_v57 = vmax.f32 %v8840_v30, %v3543_v31  ;;  %v9080_v46 = vpop.eup %6549  ;;  %v3815_v59 = vsel %vm2021_vm2, %v9077_v2, 0.0  ;;  %v3578_v28 = vsel %vm2021_vm2, %v9041_v62, -inf  ;;  %v10109_v30 = vld [vmem:[#allocation38_spill] sm:$0xff]  ;;  %v6219_v31 = vpop.f32.mrf.mxu1 }
 0x498   : > { %10107 = vst [vmem:[#allocation34_spill] sm:$0xff] %v9080_v46  ;;  %6567 = vpow2.f32 %v3667_v15  ;;  %v3769_v8 = vmul.f32 1.442695, %v3646_v10  ;;  %v9088_v9 = vpop.eup %6551  ;;  %v3816_v41 = vadd.f32 %v3815_v59, %v3814_v3  ;;  %v3817_v0 = vsel %vm2021_vm2, %v9080_v46, 0.0  ;;  %v10110_v15 = vld [vmem:[#allocation39_spill] sm:$0xff]  ;;  %v9101_v3 = vpop.permute.xlu1 %4644 }
 0x499   : > { %10108 = vst [vmem:[#allocation35_spill] sm:$0xff] %v9088_v9  ;;  %6569 = vpow2.f32 %v3699_v53  ;;  %v3596_v19 = vsub.f32 %v10109_v30, %v3544_v57  ;;  %v3819_v54 = vsel %vm2021_vm2, %v9088_v9, 0.0  ;;  %v3612_v39 = vsub.f32 %v10110_v15, %v3544_v57  ;;  %10112 = vst [vmem:[#allocation9_spill] sm:$0xff] %v9101_v3 }
 0x49a   : > { %v9093_v12 = vpop.eup %6553  ;;  %6571 = vpow2.f32 %v3731_v14  ;;  %v3628_v10 = vsub.f32 %v8771_v29, %v3544_v57  ;;  %v3818_v59 = vadd.f32 %v3817_v0, %v3816_v41  ;;  %v3644_v30 = vsub.f32 %v9038_v1, %v3544_v57  ;;  %v3463_v41 = vpop.f32.mrf.mxu1 }
 0x49b   : > { %v9099_v2 = vpop.eup %6555  ;;  %v9105_v53 = vmul.f32 %v9093_v12, %v8992_v43  ;;  %6573 = vpow2.f32 %v3763_v38  ;;  %v3669_v15 = vmul.f32 1.442695, %v3596_v19  ;;  %v3701_v29 = vmul.f32 1.442695, %v3612_v39  ;;  %v9118_v57 = vpop.permute.xlu0 %4650 }
 0x49c   : > { %10111 = vst [vmem:[#allocation40_spill] sm:$0xff] %v9099_v2  ;;  %v9108_v42 = vpop.eup %6557  ;;  %v3849_v14 = vsel %vm2021_vm2, %v9099_v2, 0.0  ;;  %6575 = vpow2.f32 %v3673_v23  ;;  %v3820_v46 = vadd.f32 %v3819_v54, %v3818_v59  ;;  %v3733_v43 = vmul.f32 1.442695, %v3628_v10  ;;  %10115 = vst [vmem:[#allocation65_spill] sm:$0xff] %v9118_v57 }
 0x49d   : > { %10113 = vst [vmem:[#allocation38_spill] sm:$0xff] %v9108_v42  ;;  %v9112_v9 = vpop.eup %6559  ;;  %v3850_v3 = vsel %vm2021_vm2, %v9108_v42, 0.0  ;;  %6577 = vpow2.f32 %v3705_v24  ;;  %v3765_v23 = vmul.f32 1.442695, %v3644_v30  ;;  %v3579_v54 = vmax.f32 %v8730_v35, %v3578_v28  ;;  %v10116_v30 = vld [vmem:[#allocation37_spill] sm:$0xff]  ;;  %v10118_v28 = vld [vmem:[#allocation14_spill] sm:$0xff] }
 0x49e   : > { %10114 = vst [vmem:[#allocation39_spill] sm:$0xff] %v9112_v9  ;;  %v9116_v38 = vpop.eup %6561  ;;  %v3851_v1 = vadd.f32 %v3850_v3, %v3849_v14  ;;  %v3852_v0 = vsel %vm2021_vm2, %v9112_v9, 0.0  ;;  %6579 = vpow2.f32 %v3737_v13  ;;  %v3461_v39 = vadd.f32 %v3460_v36, %v8401_v40  ;;  %v9134_v13 = vpop.permute.xlu1 %4640  ;;  %v10117_v14 = vld [vmem:[#allocation42_spill] sm:$0xff] }
 0x49f   : > { %v9122_v19 = vpop.eup %6563  ;;  %6581 = vrcp.f32 %v3820_v46  ;;  %v9127_v24 = vadd.f32 %v6219_v31, %v8401_v40  ;;  %v9132_v3 = vadd.f32 %v3463_v41, %v8401_v40  ;;  %v3601_v46 = vsub.f32 %v10116_v30, %v3579_v54  ;;  %v9143_v9 = vpop.permute.xlu0 %4646 }
 0x4a0   : > { %v3853_v10 = vadd.f32 %v3852_v0, %v3851_v1  ;;  %v3854_v59 = vsel %vm2021_vm2, %v9122_v19, 0.0  ;;  %6583 = vpow2.f32 %v3769_v8  ;;  %v3617_v35 = vsub.f32 %v10117_v14, %v3579_v54  ;;  %10119 = vst [vmem:[#allocation37_spill] sm:$0xff] %v9143_v9  ;;  %v10121_v14 = vld [vmem:[#allocation44_spill] sm:$0xff] }
 0x4a1   : > { %6585 = vpow2.f32 %v3669_v15  ;;  %v3633_v36 = vsub.f32 %v10118_v28, %v3579_v54  ;;  %v3649_v31 = vsub.f32 %v9041_v62, %v3579_v54  ;;  %v3564_v1 = vsel %vm2021_vm2, %v3461_v39, -inf }
 0x4a2   : > { %v3855_v57 = vadd.f32 %v3854_v59, %v3853_v10  ;;  %6587 = vpow2.f32 %v3701_v29  ;;  %v3679_v8 = vmul.f32 1.442695, %v3601_v46  ;;  %v3711_v0 = vmul.f32 1.442695, %v3617_v35 }
 0x4a3   : > { %6589 = vpow2.f32 %v3733_v43  ;;  %v3743_v40 = vmul.f32 1.442695, %v3633_v36  ;;  %v3775_v15 = vmul.f32 1.442695, %v3649_v31  ;;  %v3565_v30 = vmax.f32 %v8755_v49, %v3564_v1 }
 0x4a4   : > { %v9141_v41 = vpop.eup %6565  ;;  %6591 = vrcp.f32 %v3855_v57  ;;  %v3585_v10 = vsel %vm2021_vm2, %v9127_v24, -inf  ;;  %v3571_v54 = vsel %vm2021_vm2, %v9132_v3, -inf  ;;  %v10120_v57 = vld [vmem:[#allocation41_spill] sm:$0xff] }
 0x4a5   : > { %v9148_v29 = vpop.eup %6567  ;;  %v9152_v62 = vmul.f32 %v9141_v41, %v9049_v56  ;;  %6593 = vpow2.f32 %v3765_v23  ;;  %v3586_v43 = vmax.f32 %v8776_v21, %v3585_v10  ;;  %v3599_v46 = vsub.f32 %v10120_v57, %v3565_v30  ;;  %v9165_v56 = vpop.permute.xlu1 %4652  ;;  %v10123_v23 = vld [vmem:[#allocation17_spill] sm:$0xff] }
 0x4a6   : > { %v9157_v59 = vpop.eup %6569  ;;  %v3835_v49 = vsel %vm2021_vm2, %v9148_v29, 0.0  ;;  %6595 = vpow2.f32 %v3679_v8  ;;  %v3615_v35 = vsub.f32 %v10121_v14, %v3565_v30  ;;  %10122 = vst [vmem:[#allocation42_spill] sm:$0xff] %v9165_v56  ;;  %v3631_v36 = vsub.f32 %v10123_v23, %v3565_v30  ;;  %v9180_v23 = vpop.permute.xlu0 %4654 }
 0x4a7   : > { %v9163_v28 = vpop.eup %6571  ;;  %v3836_v21 = vsel %vm2021_vm2, %v9157_v59, 0.0  ;;  %6597 = vpow2.f32 %v3711_v0  ;;  %v3647_v31 = vsub.f32 %v3461_v39, %v3565_v30  ;;  %v3675_v57 = vmul.f32 1.442695, %v3599_v46  ;;  %10127 = vst [vmem:[#allocation17_spill] sm:$0xff] %v9180_v23 }
 0x4a8   : > { %v9170_v1 = vpop.eup %6573  ;;  %v3837_v10 = vadd.f32 %v3836_v21, %v3835_v49  ;;  %v3838_v8 = vsel %vm2021_vm2, %v9163_v28, 0.0  ;;  %6599 = vpow2.f32 %v3743_v40  ;;  %v3707_v42 = vmul.f32 1.442695, %v3615_v35  ;;  %v10129_v21 = vld [vmem:[#allocation7_spill] sm:$0xff]  ;;  %v10130_v35 = vld [vmem:[#allocation45_spill] sm:$0xff] }
 0x4a9   : > { %10124 = vst [vmem:[#allocation14_spill] sm:$0xff] %v9170_v1  ;;  %v9174_v14 = vpop.eup %6575  ;;  %v3840_v56 = vsel %vm2021_vm2, %v9170_v1, 0.0  ;;  %6601 = vpow2.f32 %v3775_v15  ;;  %v3739_v2 = vmul.f32 1.442695, %v3631_v36  ;;  %v3771_v49 = vmul.f32 1.442695, %v3647_v31  ;;  %v9196_v31 = vpop.permute.xlu1 %4648 }
 0x4aa   : > { %10125 = vst [vmem:[#allocation41_spill] sm:$0xff] %v9174_v14  ;;  %v9178_v0 = vpop.eup %6577  ;;  %v3839_v39 = vadd.f32 %v3838_v8, %v3837_v10  ;;  %v3856_v30 = vsel %vm2021_vm2, %v9174_v14, 0.0  ;;  %6603 = vpow2.f32 %v3675_v57  ;;  %v3602_v15 = vsub.f32 %v10129_v21, %v3586_v43  ;;  %10131 = vst [vmem:[#allocation7_spill] sm:$0xff] %v9196_v31  ;;  %v10132_v57 = vld [vmem:[#allocation50_spill] sm:$0xff] }
 0x4ab   : > { %10126 = vst [vmem:[#allocation44_spill] sm:$0xff] %v9178_v0  ;;  %v9184_v40 = vpop.eup %6579  ;;  %v3857_v46 = vsel %vm2021_vm2, %v9178_v0, 0.0  ;;  %6605 = vpow2.f32 %v3707_v42  ;;  %v3618_v36 = vsub.f32 %v10130_v35, %v3586_v43  ;;  %v3634_v0 = vsub.f32 %v10132_v57, %v3586_v43 }
 0x4ac   : > { %10128 = vst [vmem:[#allocation66_spill] sm:$0xff] %v9184_v40  ;;  %v9190_v9 = vpop.eup %6581  ;;  %v3841_v1 = vadd.f32 %v3840_v56, %v3839_v39  ;;  %v3858_v23 = vadd.f32 %v3857_v46, %v3856_v30  ;;  %v3859_v10 = vsel %vm2021_vm2, %v9184_v40, 0.0  ;;  %6607 = vpow2.f32 %v3739_v2 }
 0x4ad   : > { %v9194_v8 = vpop.eup %6583  ;;  %6609 = vpow2.f32 %v3771_v49  ;;  %v3650_v42 = vsub.f32 %v9127_v24, %v3586_v43  ;;  %v3681_v21 = vmul.f32 1.442695, %v3602_v15  ;;  %v3713_v39 = vmul.f32 1.442695, %v3618_v36  ;;  %v9210_v24 = vpop.permute.xlu0 %4666 }
 0x4ae   : > { %v9200_v14 = vpop.eup %6585  ;;  %6611 = vrcp.f32 %v3841_v1  ;;  %v3860_v35 = vadd.f32 %v3859_v10, %v3858_v23  ;;  %v3861_v56 = vsel %vm2021_vm2, %v9194_v8, 0.0  ;;  %v3745_v49 = vmul.f32 1.442695, %v3634_v0 }
 0x4af   : > { %v9204_v30 = vpop.eup %6587  ;;  %v3842_v2 = vsel %vm2021_vm2, %v9200_v14, 0.0  ;;  %6613 = vpow2.f32 %v3681_v21  ;;  %v3777_v46 = vmul.f32 1.442695, %v3650_v42  ;;  %v3572_v23 = vmax.f32 %v8797_v7, %v3571_v54  ;;  %v10138_v7 = vld [vmem:[#allocation11_spill] sm:$0xff] }
 0x4b0   : > { %v9208_v57 = vpop.eup %6589  ;;  %v3862_v43 = vadd.f32 %v3861_v56, %v3860_v35  ;;  %v3843_v1 = vsel %vm2021_vm2, %v9204_v30, 0.0  ;;  %6615 = vpow2.f32 %v3713_v39  ;;  %v3939_v0 = vmul.f32 %v9026_v6, %v8914_v47  ;;  %v10137_v35 = vld [vmem:[#allocation8_spill] sm:$0xff]  ;;  %v10141_v47 = vld [vmem:[#allocation22_spill] sm:$0xff] }
 0x4b1   : > { %10133 = vst [vmem:[#allocation45_spill] sm:$0xff] %v9208_v57  ;;  %v9215_v15 = vpop.eup %6591  ;;  %v3844_v36 = vadd.f32 %v3843_v1, %v3842_v2  ;;  %v3845_v10 = vsel %vm2021_vm2, %v9208_v57, 0.0  ;;  %6617 = vpow2.f32 %v3745_v49  ;;  %v3600_v56 = vsub.f32 %v10137_v35, %v3572_v23  ;;  %v9231_v2 = vpop.permute.xlu1 %4656 }
 0x4b2   : > { %10134 = vst [vmem:[#allocation50_spill] sm:$0xff] %v9215_v15  ;;  %v9221_v42 = vpop.eup %6593  ;;  %v9225_v21 = vmul.f32 %v9215_v15, %v9122_v19  ;;  %6619 = vrcp.f32 %v3862_v43  ;;  %v3616_v54 = vsub.f32 %v10138_v7, %v3572_v23  ;;  %10140 = vst [vmem:[#allocation11_spill] sm:$0xff] %v9231_v2  ;;  %v3632_v40 = vsub.f32 %v10141_v47, %v3572_v23  ;;  %v4663_v2 = vpop.permute.xlu0 %4662 }
 0x4b3   : > { %10135 = vst [vmem:[#allocation67_spill] sm:$0xff] %v9221_v42  ;;  %v9229_v39 = vpop.eup %6595  ;;  %v3846_v1 = vadd.f32 %v3845_v10, %v3844_v36  ;;  %v3847_v49 = vsel %vm2021_vm2, %v9221_v42, 0.0  ;;  %6621 = vpow2.f32 %v3777_v46  ;;  %v3648_v43 = vsub.f32 %v9132_v3, %v3572_v23 }
 0x4b4   : > { %10136 = vst [vmem:[#allocation68_spill] sm:$0xff] %v9225_v21  ;;  %10139 = vst [vmem:[#allocation8_spill] sm:$0xff] %v9229_v39  ;;  %v9236_v31 = vpop.eup %6597  ;;  %v3877_v19 = vsel %vm2021_vm2, %v9229_v39, 0.0  ;;  %v3677_v35 = vmul.f32 1.442695, %v3600_v56  ;;  %v3955_v46 = vmul.f32 %v9026_v6, %v8924_v20 }
 0x4b5   : > { %10142 = vst [vmem:[#allocation22_spill] sm:$0xff] %v9236_v31  ;;  %v3709_v7 = vmul.f32 1.442695, %v3616_v54  ;;  %v9241_v21 = vpop.eup %6599  ;;  %v3848_v15 = vadd.f32 %v3847_v49, %v3846_v1  ;;  %v3878_v36 = vsel %vm2021_vm2, %v9236_v31, 0.0  ;;  %v3741_v10 = vmul.f32 1.442695, %v3632_v40 }
 0x4b6   : > { %10143 = vst [vmem:[#allocation69_spill] sm:$0xff] %v9241_v21  ;;  %v9247_v47 = vpop.eup %6601  ;;  %v3879_v42 = vadd.f32 %v3878_v36, %v3877_v19  ;;  %6623 = vpow2.f32 %v3677_v35  ;;  %v3773_v39 = vmul.f32 1.442695, %v3648_v43  ;;  %v3880_v3 = vsel %vm2021_vm2, %v9241_v21, 0.0  ;;  %v9261_v19 = vpop.permute.xlu1 %4668  ;;  %v10148_v21 = vld [vmem:[#allocation23_spill] sm:$0xff] }
 0x4b7   : > { %v9249_v57 = vpop.eup %6603  ;;  %6625 = vrcp.f32 %v3848_v15  ;;  %v4806_v23 = vmul.f32 %v4663_v2, %v3955_v46  ;;  %v6356_v56 = vpack.i.bf16 %v3955_v46, %v3939_v0  ;;  %v3882_v20 = vsel %vm2021_vm2, %v9247_v47, 0.0 }
 0x4b8   : > { %v9253_v54 = vpop.eup %6605  ;;  %v3881_v40 = vadd.f32 %v3880_v3, %v3879_v42  ;;  %v3863_v1 = vsel %vm2021_vm2, %v9249_v57, 0.0  ;;  %6627 = vpow2.f32 %v3709_v7  ;;  %v4790_v2 = vmul.f32 %v9018_v44, %v3939_v0 }
 0x4b9   : > { %v9259_v49 = vpop.eup %6607  ;;  %v3864_v15 = vsel %vm2021_vm2, %v9253_v54, 0.0  ;;  %6629 = vpow2.f32 %v3741_v10  ;;  %6357 = vxpose.xlu0.b32.start [1/16] (narrow) %v6356_v56, 32  ;;  %v3907_v42 = vmul.f32 %v9026_v6, %v8903_v50  ;;  %v9271_v7 = vsel %vm2021_vm2, %v4806_v23, 0.0  ;;  %v10146_v50 = vld [vmem:[#allocation28_spill] sm:$0xff] }
 0x4ba   : > { %10144 = vst [vmem:[#allocation70_spill] sm:$0xff] %v9259_v49  ;;  %v9268_v43 = vpop.eup %6609  ;;  %v3883_v35 = vadd.f32 %v3882_v20, %v3881_v40  ;;  %v3865_v36 = vadd.f32 %v3864_v15, %v3863_v1  ;;  %6631 = vpow2.f32 %v3773_v39  ;;  %v3866_v3 = vsel %vm2021_vm2, %v9259_v49, 0.0  ;;  %v4665_v1 = vpop.permute.xlu1 %4664 }
 0x4bb   : > { %10145 = vst [vmem:[#allocation71_spill] sm:$0xff] %v9268_v43  ;;  %v9273_v46 = vpop.eup %6611  ;;  %v3868_v10 = vsel %vm2021_vm2, %v9268_v43, 0.0  ;;  %v3923_v44 = vmul.f32 %v9026_v6, %v8907_v32  ;;  %v4758_v0 = vmul.f32 %v10146_v50, %v3907_v42  ;;  %v3940_v23 = vmul.f32 %v9073_v26, %v8962_v33 }
 0x4bc   : > { %v9282_v56 = vpop.eup %6613  ;;  %6633 = vrcp.f32 %v3883_v35  ;;  %v3867_v39 = vadd.f32 %v3866_v3, %v3865_v36  ;;  %v3956_v40 = vmul.f32 %v9073_v26, %v8968_v22 }
 0x4bd   : > { %10147 = vst [vmem:[#allocation28_spill] sm:$0xff] %v9282_v56  ;;  %v9288_v20 = vpop.eup %6615  ;;  %v3884_v15 = vsel %vm2021_vm2, %v9282_v56, 0.0  ;;  %v4774_v32 = vmul.f32 %v10148_v21, %v3923_v44  ;;  %v6304_v6 = vpack.i.bf16 %v3923_v44, %v3907_v42  ;;  %v4822_v50 = vsel %vm2021_vm2, %v4758_v0, 0.0 }
 0x4be   : > { %v9294_v31 = vpop.eup %6617  ;;  %v3869_v35 = vadd.f32 %v3868_v10, %v3867_v39  ;;  %v3885_v33 = vsel %vm2021_vm2, %v9288_v20, 0.0  ;;  %v4807_v36 = vmul.f32 %v4665_v1, %v3956_v40  ;;  %v6358_v3 = vpack.i.bf16 %v3956_v40, %v3940_v23 }
 0x4bf   : > { %v9298_v22 = vpop.eup %6619  ;;  %v3886_v43 = vadd.f32 %v3885_v33, %v3884_v15  ;;  %v3887_v49 = vsel %vm2021_vm2, %v9294_v31, 0.0  ;;  %v4825_v56 = vsel %vm2021_vm2, %v4790_v2, 0.0  ;;  %v4823_v21 = vsel %vm2021_vm2, %v4774_v32, 0.0  ;;  %6305 = vxpose.xlu1.b32.start [1/16] (narrow) %v6304_v6, 32  ;;  %v10149_v32 = vld [vmem:[#allocation27_spill] sm:$0xff] }
 0x4c0   : > { %v9304_v42 = vpop.eup %6621  ;;  %v9308_v10 = vmul.f32 %v9298_v22, %v9194_v8  ;;  %6635 = vrcp.f32 %v3869_v35  ;;  %v4824_v44 = vadd.f32 %v4823_v21, %v4822_v50  ;;  %v4791_v0 = vmul.f32 %v9071_v55, %v3940_v23  ;;  %6359 = vxpose.xlu0.b32.cont [2/16] (narrow) %v6358_v3, 32  ;;  %v10150_v21 = vld [vmem:[#allocation13_spill] sm:$0xff] }
 0x4c1   : > { %v3888_v39 = vadd.f32 %v3887_v49, %v3886_v43  ;;  %v3889_v40 = vsel %vm2021_vm2, %v9304_v42, 0.0  ;;  %v9314_v2 = vsel %vm2021_vm2, %v4807_v36, 0.0  ;;  %v3908_v1 = vmul.f32 %v9073_v26, %v8950_v45 }
 0x4c2   : > { %v3924_v15 = vmul.f32 %v9073_v26, %v8958_v48  ;;  %v3941_v8 = vmul.f32 %v9006_v17, %v8895_v63  ;;  %v3957_v55 = vmul.f32 %v9006_v17, %v8899_v58  ;;  %v3909_v49 = vmul.f32 %v9006_v17, %v8886_v27 }
 0x4c3   : > { %v9326_v43 = vpop.eup %6623  ;;  %v3890_v23 = vadd.f32 %v3889_v40, %v3888_v39  ;;  %v4759_v6 = vmul.f32 %v10149_v32, %v3908_v1  ;;  %v3925_v45 = vmul.f32 %v9006_v17, %v8890_v61  ;;  %v3942_v48 = vmul.f32 %v9054_v4, %v8939_v18 }
 0x4c4   : > { %v9333_v26 = vpop.eup %6625  ;;  %v3870_v63 = vsel %vm2021_vm2, %v9326_v43, 0.0  ;;  %v4775_v58 = vmul.f32 %v8851_v5, %v3924_v15  ;;  %v6306_v50 = vpack.i.bf16 %v3924_v15, %v3908_v1  ;;  %v4808_v27 = vmul.f32 %v9210_v24, %v3957_v55 }
 0x4c5   : > { %v9339_v35 = vpop.eup %6627  ;;  %6637 = vrcp.f32 %v3890_v23  ;;  %v4832_v33 = vsel %vm2021_vm2, %v4791_v0, 0.0  ;;  %v4829_v61 = vsel %vm2021_vm2, %v4759_v6, 0.0  ;;  %v6360_v17 = vpack.i.bf16 %v3957_v55, %v3941_v8  ;;  %v10151_v6 = vld [vmem:[#allocation26_spill] sm:$0xff] }
 0x4c6   : > { %v9343_v36 = vpop.eup %6629  ;;  %v3871_v18 = vsel %vm2021_vm2, %v9339_v35, 0.0  ;;  %v4830_v3 = vsel %vm2021_vm2, %v4775_v58, 0.0  ;;  %6307 = vxpose.xlu1.b32.cont [2/16] (narrow) %v6306_v50, 32  ;;  %v4792_v5 = vmul.f32 %v8987_v25, %v3941_v8  ;;  %v4776_v24 = vmul.f32 %v10150_v21, %v3925_v45 }
 0x4c7   : > { %v9350_v39 = vpop.eup %6631  ;;  %v3872_v40 = vadd.f32 %v3871_v18, %v3870_v63  ;;  %v3873_v0 = vsel %vm2021_vm2, %v9343_v36, 0.0  ;;  %v4831_v1 = vadd.f32 %v4830_v3, %v4829_v61  ;;  %v4841_v15 = vsel %vm2021_vm2, %v4808_v27, 0.0  ;;  %6361 = vxpose.xlu0.b32.cont [3/16] (narrow) %v6360_v17, 32  ;;  %v9373_v18 = vpop.permute.xlu0 %4674 }
 0x4c8   : > { %v3875_v55 = vsel %vm2021_vm2, %v9350_v39, 0.0  ;;  %v4837_v23 = vsel %vm2021_vm2, %v4776_v24, 0.0  ;;  %v6308_v32 = vpack.i.bf16 %v3925_v45, %v3909_v49  ;;  %v4760_v25 = vmul.f32 %v10151_v6, %v3909_v49 }
 0x4c9   : > { %v9359_v8 = vpop.eup %6633  ;;  %v3874_v58 = vadd.f32 %v3873_v0, %v3872_v40  ;;  %v3958_v63 = vmul.f32 %v9054_v4, %v8944_v37  ;;  %v4793_v50 = vmul.f32 %v9035_v16, %v3942_v48  ;;  %v3910_v27 = vmul.f32 %v9054_v4, %v8928_v52  ;;  %v10152_v40 = vld [vmem:[#allocation25_spill] sm:$0xff] }
 0x4ca   : > { %v9368_v61 = vmul.f32 %v9359_v8, %v9247_v47  ;;  %v4836_v17 = vsel %vm2021_vm2, %v4760_v25, 0.0  ;;  %6309 = vxpose.xlu1.b32.cont [3/16] (narrow) %v6308_v32, 32  ;;  %v3926_v49 = vmul.f32 %v9054_v4, %v8934_v11  ;;  %v4826_v45 = vadd.f32 %v4825_v56, %v4824_v44 }
 0x4cb   : > { %v3876_v3 = vadd.f32 %v3875_v55, %v3874_v58  ;;  %v4839_v37 = vsel %vm2021_vm2, %v4792_v5, 0.0  ;;  %v4838_v16 = vadd.f32 %v4837_v23, %v4836_v17  ;;  %v6362_v21 = vpack.i.bf16 %v3958_v63, %v3942_v48  ;;  %v9387_v48 = vpop.permute.xlu1 %4676  ;;  %v10153_v23 = vld [vmem:[#allocation15_spill] sm:$0xff]  ;;  %v10154_v58 = vld [vmem:[#allocation60_spill] sm:$0xff]  ;;  %v4671_v17 = vpop.permute.xlu0 %4670 }
 0x4cc   : > { %v4809_v52 = vmul.f32 %v9261_v19, %v3958_v63  ;;  %v4777_v24 = vmul.f32 %v8832_v34, %v3926_v49  ;;  %v6310_v47 = vpack.i.bf16 %v3926_v49, %v3910_v27  ;;  %v4761_v0 = vmul.f32 %v10152_v40, %v3910_v27  ;;  %v10155_v27 = vld [vmem:[#allocation31_spill] sm:$0xff] }
 0x4cd   : > { %v9379_v6 = vpop.eup %6635  ;;  %6639 = vrcp.f32 %v3876_v3  ;;  %v4840_v32 = vadd.f32 %v4839_v37, %v4838_v16  ;;  %v4846_v11 = vsel %vm2021_vm2, %v4793_v50, 0.0  ;;  %6363 = vxpose.xlu0.b32.cont [4/16] (narrow) %v6362_v21, 32  ;;  %v4828_v4 = vadd.f32 %v9271_v7, %v4826_v45  ;;  %v10157_v3 = vld [vmem:[#allocation43_spill] sm:$0xff] }
 0x4ce   : > { %v4844_v56 = vsel %vm2021_vm2, %v4777_v24, 0.0  ;;  %v4843_v44 = vsel %vm2021_vm2, %v4761_v0, 0.0  ;;  %6311 = vxpose.xlu1.b32.cont [4/16] (narrow) %v6310_v47, 32  ;;  %v4833_v19 = vadd.f32 %v4832_v33, %v4831_v1  ;;  %v3943_v34 = vmul.f32 %v9116_v38, %v9012_v60  ;;  %v10156_v1 = vld [vmem:[#allocation34_spill] sm:$0xff] }
 0x4cf   : > { %v4842_v5 = vadd.f32 %v4841_v15, %v4840_v32  ;;  %v4845_v55 = vadd.f32 %v4844_v56, %v4843_v44  ;;  %v3959_v25 = vmul.f32 %v9116_v38, %v10153_v23  ;;  %v3911_v63 = vmul.f32 %v9116_v38, %v10154_v58  ;;  %v10160_v44 = vld [vmem:[#allocation19_spill] sm:$0xff]  ;;  %v10161_v23 = vld [vmem:[#allocation32_spill] sm:$0xff] }
 0x4d0   : > { %v4835_v7 = vadd.f32 %v9314_v2, %v4833_v19  ;;  %v4794_v50 = vmul.f32 %v9082_v51, %v3943_v34  ;;  %v3927_v33 = vmul.f32 %v9116_v38, %v10155_v27  ;;  %v3944_v60 = vmul.f32 %v9190_v9, %v10156_v1  ;;  %v10158_v2 = vld [vmem:[#allocation20_spill] sm:$0xff]  ;;  %v4673_v19 = vpop.permute.xlu1 %4672 }
 0x4d1   : > { %v4848_v15 = vsel %vm2021_vm2, %v4809_v52, 0.0  ;;  %v4847_v49 = vadd.f32 %v4846_v11, %v4845_v55  ;;  %v6364_v45 = vpack.i.bf16 %v3959_v25, %v3943_v34  ;;  %v4762_v37 = vmul.f32 %v10157_v3, %v3911_v63  ;;  %v10159_v11 = vld [vmem:[#allocation35_spill] sm:$0xff]  ;;  %v10162_v58 = vld [vmem:[#allocation16_spill] sm:$0xff] }
 0x4d2   : > { %v9401_v16 = vpop.eup %6637  ;;  %v4934_v21 = vpack.c.bf16 %v4835_v7, %v4828_v4  ;;  %v4810_v24 = vmul.f32 %v4671_v17, %v3959_v25  ;;  %v4778_v47 = vmul.f32 %v10158_v2, %v3927_v33  ;;  %v6312_v51 = vpack.i.bf16 %v3927_v33, %v3911_v63  ;;  %v10163_v33 = vld [vmem:[#allocation47_spill] sm:$0xff] }
 0x4d3   : > { %v9406_v38 = vmul.f32 %v9401_v16, %v9304_v42  ;;  %v4849_v40 = vadd.f32 %v4848_v15, %v4847_v49  ;;  %v4853_v0 = vsel %vm2021_vm2, %v4794_v50, 0.0  ;;  %6365 = vxpose.xlu0.b32.cont [5/16] (narrow) %v6364_v45, 32  ;;  %v4850_v52 = vsel %vm2021_vm2, %v4762_v37, 0.0  ;;  %v10166_v37 = vld [vmem:[#allocation29_spill] sm:$0xff] }
 0x4d4   : > { %6224 = vmatprep.mubr.msk.bf16.mxu0 %vm2021_vm2, %v4934_v21  ;;  %v4851_v32 = vsel %vm2021_vm2, %v4778_v47, 0.0  ;;  %6313 = vxpose.xlu1.b32.cont [5/16] (narrow) %v6312_v51, 32  ;;  %v3960_v4 = vmul.f32 %v9190_v9, %v10159_v11  ;;  %v4795_v56 = vmul.f32 %v9134_v13, %v3944_v60  ;;  %v3912_v42 = vmul.f32 %v9190_v9, %v10160_v44  ;;  %v10164_v13 = vld [vmem:[#allocation53_spill] sm:$0xff]  ;;  %v10167_v21 = vld [vmem:[#allocation62_spill] sm:$0xff]  ;;  %v10168_v51 = vld [vmem:[#allocation59_spill] sm:$0xff] }
 0x4d5   : > { %v4935_v34 = vpack.c.bf16 %v4849_v40, %v4842_v5  ;;  %v4852_v55 = vadd.f32 %v4851_v32, %v4850_v52  ;;  %v3928_v25 = vmul.f32 %v9190_v9, %v10161_v23  ;;  %v3913_v63 = vmul.f32 %v9093_v12, %v10162_v58  ;;  %v10165_v5 = vld [vmem:[#allocation61_spill] sm:$0xff]  ;;  %v10171_v44 = vld [vmem:[#allocation46_spill] sm:$0xff] }
 0x4d6   : > { %v4855_v7 = vsel %vm2021_vm2, %v4810_v24, 0.0  ;;  %v4811_v50 = vmul.f32 %v4673_v19, %v3960_v4  ;;  %v6366_v27 = vpack.i.bf16 %v3960_v4, %v3944_v60  ;;  %v4763_v1 = vmul.f32 %v10163_v33, %v3912_v42  ;;  %v10170_v4 = vld [vmem:[#allocation36_spill] sm:$0xff] }
 0x4d7   : > { %6225 = vmatmul.mubr.msk.bf16.vlgmr.msra.gmra.mxu0 %vm2021_vm2, %v4935_v34  ;;  %v4779_v17 = vmul.f32 %v10164_v13, %v3928_v25  ;;  %v6314_v15 = vpack.i.bf16 %v3928_v25, %v3912_v42  ;;  %v4854_v49 = vadd.f32 %v4853_v0, %v4852_v55  ;;  %v9427_v45 = vmul.f32 %v9141_v41, %v10165_v5  ;;  %v10169_v0 = vld [vmem:[#allocation63_spill] sm:$0xff]  ;;  %v10172_v19 = vld [vmem:[#allocation24_spill] sm:$0xff] }
 0x4d8   : > { %v4860_v9 = vsel %vm2021_vm2, %v4795_v56, 0.0  ;;  %6367 = vxpose.xlu0.b32.cont [6/16] (narrow) %v6366_v27, 32  ;;  %v4857_v3 = vsel %vm2021_vm2, %v4763_v1, 0.0  ;;  %v3929_v60 = vmul.f32 %v9093_v12, %v10166_v37  ;;  %v3930_v24 = vmul.f32 %v9141_v41, %v10167_v21  ;;  %v10173_v55 = vld [vmem:[#allocation52_spill] sm:$0xff]  ;;  %v9463_v21 = vpop.permute.xlu1 %4684 }
 0x4d9   : > { %v4858_v2 = vsel %vm2021_vm2, %v4779_v17, 0.0  ;;  %6315 = vxpose.xlu1.b32.cont [6/16] (narrow) %v6314_v15, 32  ;;  %v4856_v47 = vadd.f32 %v4855_v7, %v4854_v49  ;;  %v3945_v40 = vmul.f32 %v9093_v12, %v10168_v51  ;;  %v3946_v52 = vmul.f32 %v9141_v41, %v10169_v0  ;;  %v10174_v25 = vld [vmem:[#allocation64_spill] sm:$0xff]  ;;  %v10175_v7 = vld [vmem:[#allocation9_spill] sm:$0xff] }
 0x4da   : > { %v9440_v32 = vpop.eup %6639  ;;  %v4859_v11 = vadd.f32 %v4858_v2, %v4857_v3  ;;  %v4764_v56 = vmul.f32 %v10170_v4, %v3913_v63  ;;  %v4765_v42 = vmul.f32 %v10171_v44, %v9427_v45  ;;  %v4780_v34 = vmul.f32 %v10172_v19, %v3929_v60  ;;  %v9458_v3 = vpop.permute.xlu0 %4682 }
 0x4db   : > { %v4781_v23 = vmul.f32 %v10173_v55, %v3930_v24  ;;  %v4796_v58 = vmul.f32 %v10174_v25, %v3945_v40  ;;  %v4797_v27 = vmul.f32 %v10175_v7, %v3946_v52  ;;  %v4812_v12 = vmul.f32 %v9373_v18, %v9105_v53  ;;  %v10181_v25 = vld [vmem:[#allocation54_spill] sm:$0xff]  ;;  %v10182_v7 = vld [vmem:[#allocation57_spill] sm:$0xff] }
 0x4dc   : > { %v4862_v41 = vsel %vm2021_vm2, %v4811_v50, 0.0  ;;  %v4861_v33 = vadd.f32 %v4860_v9, %v4859_v11  ;;  %v4864_v1 = vsel %vm2021_vm2, %v4764_v56, 0.0  ;;  %v4865_v13 = vsel %vm2021_vm2, %v4780_v34, 0.0 }
 0x4dd   : > { %v4813_v17 = vmul.f32 %v9387_v48, %v9152_v62  ;;  %v4866_v15 = vadd.f32 %v4865_v13, %v4864_v1  ;;  %v4867_v49 = vsel %vm2021_vm2, %v4796_v58, 0.0  ;;  %v4871_v5 = vsel %vm2021_vm2, %v4765_v42, 0.0 }
 0x4de   : > { %v4863_v37 = vadd.f32 %v4862_v41, %v4861_v33  ;;  %v4869_v18 = vsel %vm2021_vm2, %v4812_v12, 0.0  ;;  %v4872_v50 = vsel %vm2021_vm2, %v4781_v23, 0.0  ;;  %v4874_v9 = vsel %vm2021_vm2, %v4797_v27, 0.0  ;;  %v4681_v41 = vpop.permute.xlu1 %4680 }
 0x4df   : > { %v4868_v2 = vadd.f32 %v4867_v49, %v4866_v15  ;;  %v4873_v51 = vadd.f32 %v4872_v50, %v4871_v5  ;;  %v6368_v48 = vpack.i.bf16 %v9105_v53, %v3945_v40  ;;  %v6316_v0 = vpack.i.bf16 %v3929_v60, %v3913_v63  ;;  %v10176_v63 = vld [vmem:[#allocation45_spill] sm:$0xff]  ;;  %v10177_v60 = vld [vmem:[#allocation14_spill] sm:$0xff] }
 0x4e0   : > { %v4936_v11 = vpack.c.bf16 %v4863_v37, %v4856_v47  ;;  %v6370_v4 = vpack.i.bf16 %v9152_v62, %v3946_v52  ;;  %v6318_v56 = vpack.i.bf16 %v3930_v24, %v9427_v45  ;;  %v9470_v44 = vmul.f32 %v9273_v46, %v9148_v29  ;;  %v10178_v47 = vld [vmem:[#allocation67_spill] sm:$0xff]  ;;  %v4679_v52 = vpop.permute.xlu0 %4678 }
 0x4e1   : > { %v4870_v42 = vadd.f32 %v4869_v18, %v4868_v2  ;;  %v4875_v19 = vadd.f32 %v4874_v9, %v4873_v51  ;;  %v4876_v34 = vsel %vm2021_vm2, %v4813_v17, 0.0  ;;  %6369 = vxpose.xlu0.b32.cont [7/16] (narrow) %v6368_v48, 32  ;;  %6317 = vxpose.xlu1.b32.cont [7/16] (narrow) %v6316_v0, 32  ;;  %v9475_v55 = vmul.f32 %v9333_v26, %v9200_v14  ;;  %v10185_v0 = vld [vmem:[#allocation40_spill] sm:$0xff] }
 0x4e2   : > { %6228 = vmatprep.mubr.msk.bf16.mxu0 %vm2021_vm2, %v4936_v11  ;;  %v9480_v53 = vmul.f32 %v9273_v46, %v9157_v59  ;;  %v9484_v29 = vmul.f32 %v9333_v26, %v9204_v30  ;;  %v9488_v62 = vmul.f32 %v9273_v46, %v9163_v28  ;;  %v9492_v45 = vmul.f32 %v9333_v26, %v10176_v63  ;;  %v10179_v30 = vld [vmem:[#allocation12_spill] sm:$0xff]  ;;  %v10180_v28 = vld [vmem:[#allocation10_spill] sm:$0xff] }
 0x4e3   : > { %v4877_v14 = vadd.f32 %v4876_v34, %v4875_v19  ;;  %v9496_v24 = vmul.f32 %v9273_v46, %v10177_v60  ;;  %v9500_v59 = vmul.f32 %v9333_v26, %v10178_v47  ;;  %v4766_v40 = vmul.f32 %v10179_v30, %v9470_v44  ;;  %v10183_v46 = vld [vmem:[#allocation37_spill] sm:$0xff]  ;;  %v10184_v26 = vld [vmem:[#allocation7_spill] sm:$0xff]  ;;  %v10186_v11 = vld [vmem:[#allocation50_spill] sm:$0xff] }
 0x4e4   : > { %v4767_v23 = vmul.f32 %v10180_v28, %v9475_v55  ;;  %v4782_v58 = vmul.f32 %v10181_v25, %v9480_v53  ;;  %v4783_v27 = vmul.f32 %v10182_v7, %v9484_v29  ;;  %v4798_v12 = vmul.f32 %v10183_v46, %v9488_v62  ;;  %v10188_v34 = vld [vmem:[#allocation38_spill] sm:$0xff]  ;;  %v10190_v47 = vld [vmem:[#allocation39_spill] sm:$0xff] }
 0x4e5   : > { %v4937_v33 = vpack.c.bf16 %v4877_v14, %v4870_v42  ;;  %6371 = vxpose.xlu0.b32.cont [8/16] (narrow) %v6370_v4, 32  ;;  %6319 = vxpose.xlu1.b32.cont [8/16] (narrow) %v6318_v56, 32  ;;  %v4799_v1 = vmul.f32 %v10184_v26, %v9492_v45  ;;  %v4814_v13 = vmul.f32 %v4679_v52, %v9496_v24  ;;  %v4878_v17 = vsel %vm2021_vm2, %v4766_v40, 0.0  ;;  %v10187_v56 = vld [vmem:[#allocation41_spill] sm:$0xff]  ;;  %v10189_v14 = vld [vmem:[#allocation44_spill] sm:$0xff]  ;;  %v10191_v52 = vld [vmem:[#allocation66_spill] sm:$0xff] }
 0x4e6   : > { %v4815_v15 = vmul.f32 %v4681_v41, %v9500_v59  ;;  %v4879_v49 = vsel %vm2021_vm2, %v4782_v58, 0.0  ;;  %v4881_v5 = vsel %vm2021_vm2, %v4798_v12, 0.0  ;;  %v4885_v37 = vsel %vm2021_vm2, %v4767_v23, 0.0  ;;  %v10192_v23 = vld [vmem:[#allocation5_spill] sm:$0xff]  ;;  %v10194_v46 = vld [vmem:[#allocation51_spill] sm:$0xff] }
 0x4e7   : > { %6229 = vmatmul.mubr.msk.bf16.gmra.mxu0 %vm2021_vm2, %v4937_v33  ;;  %v4880_v18 = vadd.f32 %v4879_v49, %v4878_v17  ;;  %v4883_v50 = vsel %vm2021_vm2, %v4814_v13, 0.0  ;;  %v4886_v9 = vsel %vm2021_vm2, %v4783_v27, 0.0  ;;  %v4888_v2 = vsel %vm2021_vm2, %v4799_v1, 0.0  ;;  %v10193_v58 = vld [vmem:[#allocation49_spill] sm:$0xff]  ;;  %v10195_v41 = vld [vmem:[#allocation55_spill] sm:$0xff] }
 0x4e8   : > { %v4887_v51 = vadd.f32 %v4886_v9, %v4885_v37  ;;  %v4890_v48 = vsel %vm2021_vm2, %v4815_v15, 0.0  ;;  %v9527_v4 = vmul.f32 %v10186_v11, %v10185_v0  ;;  %v9531_v42 = vmul.f32 %v9298_v22, %v10187_v56  ;;  %v10196_v26 = vld [vmem:[#allocation65_spill] sm:$0xff]  ;;  %v10198_v15 = vld [vmem:[#allocation68_spill] sm:$0xff] }
 0x4e9   : > { %v4882_v19 = vadd.f32 %v4881_v5, %v4880_v18  ;;  %v9535_v63 = vmul.f32 %v10186_v11, %v10188_v34  ;;  %v9539_v60 = vmul.f32 %v9298_v22, %v10189_v14  ;;  %v9543_v30 = vmul.f32 %v10186_v11, %v10190_v47 }
 0x4ea   : > { %v4889_v40 = vadd.f32 %v4888_v2, %v4887_v51  ;;  %v9547_v28 = vmul.f32 %v9298_v22, %v10191_v52  ;;  %v4768_v25 = vmul.f32 %v10192_v23, %v9527_v4  ;;  %v4769_v7 = vmul.f32 %v10193_v58, %v9531_v42  ;;  %v10197_v22 = vld [vmem:[#allocation42_spill] sm:$0xff]  ;;  %v9569_v2 = vpop.permute.xlu1 %4660  ;;  %v9571_v51 = vpop.permute.xlu0 %4658 }
 0x4eb   : > { %v4884_v27 = vadd.f32 %v4883_v50, %v4882_v19  ;;  %v4784_v12 = vmul.f32 %v10194_v46, %v9535_v63  ;;  %v4785_v33 = vmul.f32 %v10195_v41, %v9539_v60  ;;  %v4800_v1 = vmul.f32 %v10196_v26, %v9543_v30  ;;  %v10202_v46 = vld [vmem:[#allocation21_spill] sm:$0xff] }
 0x4ec   : > { %v4891_v13 = vadd.f32 %v4890_v48, %v4889_v40  ;;  %v4801_v17 = vmul.f32 %v10197_v22, %v9547_v28  ;;  %v4816_v49 = vmul.f32 %v9458_v3, %v10198_v15  ;;  %v4817_v5 = vmul.f32 %v9463_v21, %v9308_v10 }
 0x4ed   : > { %v4892_v37 = vsel %vm2021_vm2, %v4768_v25, 0.0  ;;  %v4893_v18 = vsel %vm2021_vm2, %v4784_v12, 0.0  ;;  %v4895_v50 = vsel %vm2021_vm2, %v4800_v1, 0.0  ;;  %v4899_v9 = vsel %vm2021_vm2, %v4769_v7, 0.0 }
 0x4ee   : > { %v4938_v48 = vpack.c.bf16 %v4891_v13, %v4884_v27  ;;  %v4894_v0 = vadd.f32 %v4893_v18, %v4892_v37  ;;  %v4897_v11 = vsel %vm2021_vm2, %v4816_v49, 0.0  ;;  %v4900_v3 = vsel %vm2021_vm2, %v4785_v33, 0.0  ;;  %v4689_v7 = vpop.permute.xlu1 %4688  ;;  %v4687_v27 = vpop.permute.xlu0 %4686  ;;  %v10204_v33 = vld [vmem:[#allocation33_spill] sm:$0xff] }
 0x4ef   : > { %v4901_v56 = vadd.f32 %v4900_v3, %v4899_v9  ;;  %v4902_v21 = vsel %vm2021_vm2, %v4801_v17, 0.0  ;;  %v4904_v19 = vsel %vm2021_vm2, %v4817_v5, 0.0  ;;  %v6372_v34 = vpack.i.bf16 %v9496_v24, %v9488_v62 }
 0x4f0   : > { %6232 = vmatprep.mubr.msk.bf16.mxu0 %vm2021_vm2, %v4938_v48  ;;  %v4896_v14 = vadd.f32 %v4895_v50, %v4894_v0  ;;  %v6320_v47 = vpack.i.bf16 %v9480_v53, %v9470_v44  ;;  %v6374_v40 = vpack.i.bf16 %v9500_v59, %v9492_v45  ;;  %v6322_v52 = vpack.i.bf16 %v9484_v29, %v9475_v55  ;;  %v10199_v55 = vld [vmem:[#allocation70_spill] sm:$0xff]  ;;  %v10200_v45 = vld [vmem:[#allocation71_spill] sm:$0xff] }
 0x4f1   : > { %v4903_v23 = vadd.f32 %v4902_v21, %v4901_v56  ;;  %6373 = vxpose.xlu0.b32.cont [9/16] (narrow) %v6372_v34, 32  ;;  %v9588_v25 = vmul.f32 %v9379_v6, %v9249_v57  ;;  %v9592_v62 = vmul.f32 %v9440_v32, %v9326_v43  ;;  %v9596_v24 = vmul.f32 %v9379_v6, %v9253_v54  ;;  %v10207_v56 = vld [vmem:[#allocation8_spill] sm:$0xff] }
 0x4f2   : > { %v4898_v44 = vadd.f32 %v4897_v11, %v4896_v14  ;;  %6321 = vxpose.xlu1.b32.cont [9/16] (narrow) %v6320_v47, 32  ;;  %v9600_v53 = vmul.f32 %v9440_v32, %v9339_v35  ;;  %v9604_v29 = vmul.f32 %v9379_v6, %v10199_v55  ;;  %v9608_v57 = vmul.f32 %v9440_v32, %v9343_v36  ;;  %v10201_v35 = vld [vmem:[#allocation6_spill] sm:$0xff] }
 0x4f3   : > { %v4905_v43 = vadd.f32 %v4904_v19, %v4903_v23  ;;  %v9612_v59 = vmul.f32 %v9379_v6, %v10200_v45  ;;  %v9616_v54 = vmul.f32 %v9440_v32, %v9350_v39  ;;  %v4770_v58 = vmul.f32 %v10201_v35, %v9588_v25  ;;  %v10203_v36 = vld [vmem:[#allocation58_spill] sm:$0xff]  ;;  %v10205_v6 = vld [vmem:[#allocation17_spill] sm:$0xff]  ;;  %v10206_v39 = vld [vmem:[#allocation11_spill] sm:$0xff] }
 0x4f4   : > { %v4771_v12 = vmul.f32 %v10202_v46, %v9592_v62  ;;  %v4786_v41 = vmul.f32 %v10203_v36, %v9596_v24  ;;  %v4787_v26 = vmul.f32 %v10204_v33, %v9600_v53  ;;  %v4802_v1 = vmul.f32 %v10205_v6, %v9604_v29  ;;  %v10208_v19 = vld [vmem:[#allocation28_spill] sm:$0xff]  ;;  %v10209_v47 = vld [vmem:[#allocation22_spill] sm:$0xff]  ;;  %v10210_v23 = vld [vmem:[#allocation69_spill] sm:$0xff]  ;;  %v4691_v46 = vpop.permute.xlu0 %4690 }
 0x4f5   : > { %v4939_v13 = vpack.c.bf16 %v4905_v43, %v4898_v44  ;;  %6375 = vxpose.xlu0.b32.cont [10/16] (narrow) %v6374_v40, 32  ;;  %v4803_v32 = vmul.f32 %v10206_v39, %v9608_v57  ;;  %v4818_v22 = vmul.f32 %v4687_v27, %v9612_v59  ;;  %v4819_v17 = vmul.f32 %v4689_v7, %v9616_v54  ;;  %v10211_v45 = vld [vmem:[#allocation48_spill] sm:$0xff]  ;;  %v4693_v27 = vpop.permute.xlu1 %4692  ;;  %v10214_v33 = vld [vmem:[#allocation30_spill] sm:$0xff] }
 0x4f6   : > { %6323 = vxpose.xlu1.b32.cont [10/16] (narrow) %v6322_v52, 32  ;;  %v4906_v49 = vsel %vm2021_vm2, %v4770_v58, 0.0  ;;  %v4907_v5 = vsel %vm2021_vm2, %v4786_v41, 0.0  ;;  %v4909_v37 = vsel %vm2021_vm2, %v4802_v1, 0.0  ;;  %v4913_v18 = vsel %vm2021_vm2, %v4771_v12, 0.0  ;;  %v10212_v58 = vld [vmem:[#allocation18_spill] sm:$0xff] }
 0x4f7   : > { %6233 = vmatmul.mubr.msk.bf16.gmra.mxu0 %vm2021_vm2, %v4939_v13  ;;  %v4908_v50 = vadd.f32 %v4907_v5, %v4906_v49  ;;  %v4911_v9 = vsel %vm2021_vm2, %v4818_v22, 0.0  ;;  %v4914_v48 = vsel %vm2021_vm2, %v4787_v26, 0.0  ;;  %v4916_v0 = vsel %vm2021_vm2, %v4803_v32, 0.0  ;;  %v10213_v36 = vld [vmem:[#allocation56_spill] sm:$0xff] }
 0x4f8   : > { %v4915_v11 = vadd.f32 %v4914_v48, %v4913_v18  ;;  %v4918_v3 = vsel %vm2021_vm2, %v4819_v17, 0.0  ;;  %v3921_v21 = vmul.f32 %v9359_v8, %v10207_v56  ;;  %v3922_v34 = vmul.f32 %v9401_v16, %v10208_v19 }
 0x4f9   : > { %v4910_v14 = vadd.f32 %v4909_v37, %v4908_v50  ;;  %v3937_v40 = vmul.f32 %v9359_v8, %v10209_v47  ;;  %v3938_v52 = vmul.f32 %v9401_v16, %v9288_v20  ;;  %v3953_v44 = vmul.f32 %v9359_v8, %v10210_v23 }
 0x4fa   : > { %v4917_v55 = vadd.f32 %v4916_v0, %v4915_v11  ;;  %v3954_v43 = vmul.f32 %v9401_v16, %v9294_v31  ;;  %v4772_v35 = vmul.f32 %v10211_v45, %v3921_v21  ;;  %v4773_v7 = vmul.f32 %v10212_v58, %v3922_v34 }
 0x4fb   : > { %v4912_v12 = vadd.f32 %v4911_v9, %v4910_v14  ;;  %v4788_v41 = vmul.f32 %v10213_v36, %v3937_v40  ;;  %v4789_v26 = vmul.f32 %v10214_v33, %v3938_v52  ;;  %v4804_v20 = vmul.f32 %v9571_v51, %v3953_v44 }
 0x4fc   : > { %v4919_v6 = vadd.f32 %v4918_v3, %v4917_v55  ;;  %v4805_v8 = vmul.f32 %v9569_v2, %v3954_v43  ;;  %v4820_v1 = vmul.f32 %v4691_v46, %v9368_v61  ;;  %v4821_v31 = vmul.f32 %v4693_v27, %v9406_v38 }
 0x4fd   : > { %v4920_v16 = vsel %vm2021_vm2, %v4772_v35, 0.0  ;;  %v4921_v13 = vsel %vm2021_vm2, %v4788_v41, 0.0  ;;  %v4923_v39 = vsel %vm2021_vm2, %v4804_v20, 0.0  ;;  %v4927_v32 = vsel %vm2021_vm2, %v4773_v7, 0.0 }
 0x4fe   : > { %v4940_v22 = vpack.c.bf16 %v4919_v6, %v4912_v12  ;;  %v4922_v17 = vadd.f32 %v4921_v13, %v4920_v16  ;;  %v4925_v49 = vsel %vm2021_vm2, %v4820_v1, 0.0  ;;  %v4928_v51 = vsel %vm2021_vm2, %v4789_v26, 0.0  ;;  %v6643_v13 = vld [vmem:[%s6897_s23] sm:$0xff] }
 0x4ff   : > { %v4929_v5 = vadd.f32 %v4928_v51, %v4927_v32  ;;  %v4930_v2 = vsel %vm2021_vm2, %v4805_v8, 0.0  ;;  %v4932_v37 = vsel %vm2021_vm2, %v4821_v31, 0.0  ;;  %v6376_v18 = vpack.i.bf16 %v10198_v15, %v9543_v30  ;;  %v9696_v8 = vld [vmem:[%s9784_s9] ss:$0 sm:$0xff] }
 0x500   : > { %6236 = vmatprep.mubr.msk.bf16.mxu0 %vm2021_vm2, %v4940_v22  ;;  %v4924_v50 = vadd.f32 %v4923_v39, %v4922_v17  ;;  %v6324_v9 = vpack.i.bf16 %v9535_v63, %v9527_v4  ;;  %v6378_v48 = vpack.i.bf16 %v9308_v10, %v9547_v28  ;;  %v6326_v0 = vpack.i.bf16 %v9539_v60, %v9531_v42 }
 0x501   : > { %v4931_v11 = vadd.f32 %v4930_v2, %v4929_v5  ;;  %6377 = vxpose.xlu0.b32.cont [11/16] (narrow) %v6376_v18, 32  ;;  %v6380_v3 = vpack.i.bf16 %v9612_v59, %v9604_v29  ;;  %v6328_v30 = vpack.i.bf16 %v9596_v24, %v9588_v25  ;;  %v6382_v15 = vpack.i.bf16 %v9616_v54, %v9608_v57  ;;  %v6645_v5 = vld [vmem:[%s6897_s23 + $0x10] sm:$0xff] }
 0x502   : > { %v4926_v56 = vadd.f32 %v4925_v49, %v4924_v50  ;;  %6325 = vxpose.xlu1.b32.cont [11/16] (narrow) %v6324_v9, 32  ;;  %v6330_v4 = vpack.i.bf16 %v9600_v53, %v9592_v62  ;;  %v6384_v10 = vpack.i.bf16 %v9368_v61, %v3953_v44  ;;  %v6332_v63 = vpack.i.bf16 %v3937_v40, %v3921_v21  ;;  %v6644_v49 = vld [vmem:[%s6897_s23 + $0x8] sm:$0xff]  ;;  %v6646_v50 = vld [vmem:[%s6897_s23 + $0x18] sm:$0xff] }
 0x503   : > { %v4933_v42 = vadd.f32 %v4932_v37, %v4931_v11  ;;  %v6386_v60 = vpack.i.bf16 %v9406_v38, %v3954_v43  ;;  %v6334_v28 = vpack.i.bf16 %v3938_v52, %v3922_v34 }
 0x505   : > { %v4941_v19 = vpack.c.bf16 %v4933_v42, %v4926_v56  ;;  %6379 = vxpose.xlu0.b32.cont [12/16] (narrow) %v6378_v48, 32  ;;  %v6649_v42 = vld [vmem:[%s6897_s23 + $0x30] sm:$0xff] }
 0x506   : > { %6327 = vxpose.xlu1.b32.cont [12/16] (narrow) %v6326_v0, 32 }
 0x507   : > { %6237 = vmatmul.mubr.msk.bf16.gmra.mxu0 %vm2021_vm2, %v4941_v19 }
 0x509   : > { %6381 = vxpose.xlu0.b32.cont [13/16] (narrow) %v6380_v3, 32  ;;  %v6647_v3 = vld [vmem:[%s6897_s23 + $0x20] sm:$0xff] }
 0x50a   : > { %6329 = vxpose.xlu1.b32.cont [13/16] (narrow) %v6328_v30, 32 }
 0x50d   : > { %6383 = vxpose.xlu0.b32.cont [14/16] (narrow) %v6382_v15, 32 }
 0x50e   : > { %6331 = vxpose.xlu1.b32.cont [14/16] (narrow) %v6330_v4, 32 }
 0x511   : > { %6385 = vxpose.xlu0.b32.cont [15/16] (narrow) %v6384_v10, 32  ;;  %v6648_v10 = vld [vmem:[%s6897_s23 + $0x28] sm:$0xff] }
 0x512   : > { %6333 = vxpose.xlu1.b32.cont [15/16] (narrow) %v6332_v63, 32 }
 0x515   : > { %6387 = vxpose.xlu0.b32.end [16/16] (narrow) %v6386_v60, 32 }
 0x516   : > { %6335 = vxpose.xlu1.b32.end [16/16] (narrow) %v6334_v28, 32 }
 0x555   : > { %v6388_v25 = vpop.trf.xlu0 }
 0x556   : > { %v6336_v61 = vpop.trf.xlu1  ;;  %v6392_v38 = vunpack.i.h.bf16 %v6388_v25  ;;  %v6389_v53 = vunpack.i.l.bf16 %v6388_v25 }
 0x557   : > { %v6340_v62 = vunpack.i.h.bf16 %v6336_v61  ;;  %v6337_v24 = vunpack.i.l.bf16 %v6336_v61  ;;  %v6650_v61 = vld [vmem:[%s6897_s23 + $0x38] sm:$0xff] }
 0x559   : > { %v6393_v57 = vpop.trf.xlu0 }
 0x55a   : > { %v6341_v29 = vpop.trf.xlu1  ;;  %v6397_v21 = vunpack.i.h.bf16 %v6393_v57  ;;  %v6394_v34 = vunpack.i.l.bf16 %v6393_v57 }
 0x55b   : > { %v6345_v59 = vunpack.i.h.bf16 %v6341_v29  ;;  %v6342_v54 = vunpack.i.l.bf16 %v6341_v29 }
 0x55c   : > { %v5655_v40 = vpack.c.bf16 %v6394_v34, %v6389_v53  ;;  %v5665_v52 = vpack.c.bf16 %v6397_v21, %v6392_v38  ;;  %v6651_v53 = vld [vmem:[%s6897_s23 + $0x40] sm:$0xff]  ;;  %v6652_v21 = vld [vmem:[%s6897_s23 + $0x48] sm:$0xff] }
 0x55d   : > { %v5635_v14 = vpack.c.bf16 %v6342_v54, %v6337_v24  ;;  %v5645_v47 = vpack.c.bf16 %v6345_v59, %v6340_v62  ;;  %v6398_v44 = vpop.trf.xlu0 }
 0x55e   : > { %v6346_v23 = vpop.trf.xlu1  ;;  %5675 = vst [vmem:[%s507_s24 + $0x20] sm:$0xff] %v5655_v40   ;;  %5677 = vst [vmem:[%s507_s24 + $0x30] sm:$0xff] %v5665_v52   ;;  %v6402_v45 = vunpack.i.h.bf16 %v6398_v44  ;;  %v6399_v35 = vunpack.i.l.bf16 %v6398_v44 }
 0x55f   : > { %5636 = vst [vmem:[%s507_s24] sm:$0xff] %v5635_v14   ;;  %5673 = vst [vmem:[%s507_s24 + $0x10] sm:$0xff] %v5645_v47   ;;  %v6350_v55 = vunpack.i.h.bf16 %v6346_v23  ;;  %v6347_v43 = vunpack.i.l.bf16 %v6346_v23  ;;  %v6653_v14 = vld [vmem:[%s6897_s23 + $0x50] sm:$0xff]  ;;  %v6654_v23 = vld [vmem:[%s6897_s23 + $0x58] sm:$0xff] }
 0x561   : > { %v6403_v7 = vpop.trf.xlu0 }
 0x562   : > { %v6351_v58 = vpop.trf.xlu1  ;;  %v6407_v12 = vunpack.i.h.bf16 %v6403_v7  ;;  %v6404_v36 = vunpack.i.l.bf16 %v6403_v7 }
 0x563   : > { %v6355_v27 = vunpack.i.h.bf16 %v6351_v58  ;;  %v6352_v46 = vunpack.i.l.bf16 %v6351_v58 }
 0x564   : > { %v5660_v26 = vpack.c.bf16 %v6404_v36, %v6399_v35  ;;  %v5670_v20 = vpack.c.bf16 %v6407_v12, %v6402_v45  ;;  %v6655_v35 = vld [vmem:[%s6897_s23 + $0x60] sm:$0xff]  ;;  %v6656_v12 = vld [vmem:[%s6897_s23 + $0x68] sm:$0xff] }
 0x565   : > { %v5640_v41 = vpack.c.bf16 %v6352_v46, %v6347_v43  ;;  %v5650_v33 = vpack.c.bf16 %v6355_v27, %v6350_v55 }
 0x566   : > { %5676 = vst [vmem:[%s507_s24 + $0x28] sm:$0xff] %v5660_v26   ;;  %5678 = vst [vmem:[%s507_s24 + $0x38] sm:$0xff] %v5670_v20   ;;  %v6658_v20 = vld [vmem:[%s6897_s23 + $0x78] sm:$0xff] }
 0x567   : > { %5672 = vst [vmem:[%s507_s24 + $0x8] sm:$0xff] %v5640_v41   ;;  %5674 = vst [vmem:[%s507_s24 + $0x18] sm:$0xff] %v5650_v33   ;;  %v6657_v41 = vld [vmem:[%s6897_s23 + $0x70] sm:$0xff]  ;;  %s6659_s23 = scalar_lea.vmem %s9732_s12, 128 }
 0x568   : > { %p6660_p12 = scmp.ne.s32.totalorder %s9732_s12, %s6659_s23  ;;  %p6667_p2 = scmp.lt.s32.totalorder %s6665_s20, %s6659_s23 }
 0x56a   : > { %p6661_p13 = pnand %p6660_p12, %p6841_p4  ;;  %p6668_p3 = por %p6667_p2, %p6666_p1 }
 0x56c   : > { %p6662_p0 = pneg %p6661_p13 }
 0x56e   : > { %p6669_p5 = pnand %p6668_p3, %p6662_p0 }
 0x597   : > { %v6226_v6 = vpop.f32.mrf.mxu0 }
 0x598   : > { %v5032_v17 = vadd.f32 %v6226_v6, %v9696_v8 }
 0x599   : > { %v5023_v1 = vpop.f32.mrf.mxu0 }
 0x59a   : > { %v5024_v31 = vadd.f32 %v9696_v8, %v5023_v1  ;;  %v5088_v2 = vadd.f32 %v6645_v5, %v5032_v17 }
 0x59b   : > { %v6227_v16 = vpop.f32.mrf.mxu0 }
 0x59c   : > { %v5086_v39 = vadd.f32 %v6643_v13, %v5024_v31  ;;  %v5035_v37 = vadd.f32 %v6227_v16, %v9696_v8 }
 0x59d   : > { %v5026_v32 = vpop.f32.mrf.mxu0 }
 0x59e   : > { %v5027_v22 = vadd.f32 %v9696_v8, %v5026_v32  ;;  %5102 = vxpose.xlu1.b32.start [1/16] (narrow) %v5086_v39, 8  ;;  %v5089_v9 = vadd.f32 %v6646_v50, %v5035_v37 }
 0x5a0   : > { %v5087_v51 = vadd.f32 %v6644_v49, %v5027_v22 }
 0x5a2   : > { %5103 = vxpose.xlu1.b32.cont [2/16] (narrow) %v5087_v51, 8 }
 0x5a6   : > { %5104 = vxpose.xlu1.b32.cont [3/16] (narrow) %v5088_v2, 8 }
 0x5a7   : > { %v6230_v18 = vpop.f32.mrf.mxu0 }
 0x5a8   : > { %v5048_v4 = vadd.f32 %v6230_v18, %v9696_v8 }
 0x5a9   : > { %v5039_v48 = vpop.f32.mrf.mxu0 }
 0x5aa   : > { %v5040_v0 = vadd.f32 %v9696_v8, %v5039_v48  ;;  %5105 = vxpose.xlu1.b32.cont [4/16] (narrow) %v5089_v9, 8  ;;  %v5092_v60 = vadd.f32 %v6649_v42, %v5048_v4 }
 0x5ab   : > { %v6231_v11 = vpop.f32.mrf.mxu0 }
 0x5ac   : > { %v5090_v30 = vadd.f32 %v6647_v3, %v5040_v0  ;;  %v5051_v28 = vadd.f32 %v6231_v11, %v9696_v8 }
 0x5ad   : > { %v5042_v15 = vpop.f32.mrf.mxu0 }
 0x5ae   : > { %v5043_v56 = vadd.f32 %v9696_v8, %v5042_v15  ;;  %5106 = vxpose.xlu1.b32.cont [5/16] (narrow) %v5090_v30, 8  ;;  %v5093_v25 = vadd.f32 %v6650_v61, %v5051_v28 }
 0x5b0   : > { %v5091_v63 = vadd.f32 %v6648_v10, %v5043_v56 }
 0x5b2   : > { %5107 = vxpose.xlu1.b32.cont [6/16] (narrow) %v5091_v63, 8 }
 0x5b6   : > { %5108 = vxpose.xlu1.b32.cont [7/16] (narrow) %v5092_v60, 8 }
 0x5b7   : > { %v6234_v19 = vpop.f32.mrf.mxu0 }
 0x5b8   : > { %v5064_v54 = vadd.f32 %v6234_v19, %v9696_v8 }
 0x5b9   : > { %v5055_v62 = vpop.f32.mrf.mxu0 }
 0x5ba   : > { %v5056_v24 = vadd.f32 %v9696_v8, %v5055_v62  ;;  %5109 = vxpose.xlu1.b32.cont [8/16] (narrow) %v5093_v25, 8  ;;  %v5096_v47 = vadd.f32 %v6653_v14, %v5064_v54 }
 0x5bb   : > { %v6235_v38 = vpop.f32.mrf.mxu0 }
 0x5bc   : > { %v5094_v29 = vadd.f32 %v6651_v53, %v5056_v24  ;;  %v5067_v40 = vadd.f32 %v6235_v38, %v9696_v8 }
 0x5bd   : > { %v5058_v57 = vpop.f32.mrf.mxu0 }
 0x5be   : > { %v5059_v59 = vadd.f32 %v9696_v8, %v5058_v57  ;;  %5110 = vxpose.xlu1.b32.cont [9/16] (narrow) %v5094_v29, 8  ;;  %v5097_v44 = vadd.f32 %v6654_v23, %v5067_v40 }
 0x5c0   : > { %v5095_v34 = vadd.f32 %v6652_v21, %v5059_v59 }
 0x5c2   : > { %5111 = vxpose.xlu1.b32.cont [10/16] (narrow) %v5095_v34, 8 }
 0x5c6   : > { %5112 = vxpose.xlu1.b32.cont [11/16] (narrow) %v5096_v47, 8 }
 0x5c7   : > { %v6238_v52 = vpop.f32.mrf.mxu0 }
 0x5c8   : > { %v5080_v46 = vadd.f32 %v6238_v52, %v9696_v8 }
 0x5c9   : > { %v5071_v55 = vpop.f32.mrf.mxu0 }
 0x5ca   : > { %v5072_v43 = vadd.f32 %v9696_v8, %v5071_v55  ;;  %5113 = vxpose.xlu1.b32.cont [12/16] (narrow) %v5097_v44, 8  ;;  %v5100_v33 = vadd.f32 %v6657_v41, %v5080_v46 }
 0x5cb   : > { %v6239_v45 = vpop.f32.mrf.mxu0 }
 0x5cc   : > { %v5098_v58 = vadd.f32 %v6655_v35, %v5072_v43  ;;  %v5083_v26 = vadd.f32 %v6239_v45, %v9696_v8 }
 0x5cd   : > { %v5074_v7 = vpop.f32.mrf.mxu0 }
 0x5ce   : > { %v5075_v27 = vadd.f32 %v9696_v8, %v5074_v7  ;;  %5114 = vxpose.xlu1.b32.cont [13/16] (narrow) %v5098_v58, 8  ;;  %v5101_v6 = vadd.f32 %v6658_v20, %v5083_v26 }
 0x5d0   : > { %v5099_v36 = vadd.f32 %v6656_v12, %v5075_v27 }
 0x5d2   : > { %5115 = vxpose.xlu1.b32.cont [14/16] (narrow) %v5099_v36, 8 }
 0x5d6   : > { %5116 = vxpose.xlu1.b32.cont [15/16] (narrow) %v5100_v33, 8 }
 0x5da   : > { %5117 = vxpose.xlu1.b32.end [16/16] (narrow) %v5101_v6, 8 }
 0x61a   : > { %v5118_v8 = vpop.trf.xlu1 }
 0x61b   : > { %5134 = vst [vmem:[%s459_s13] sm:$0xff] %v5118_v8 }
 0x61c   : > { %6672 = shalt.err (!%p6669_p5)
}
 0x61d   : > { %s6673_s24 = scalar_lea.hbm %s5156_s28, 128  ;;  %s6677_s15 = scalar_lea.hbm %s9785_s10, 512 }
 0x61e   : > { %p6674_p6 = scmp.ne.s32.totalorder %s5156_s28, %s6673_s24  ;;  %p6678_p10 = scmp.lt.s32.totalorder %s5156_s28, %s9785_s10 }
 0x61f   : > { %p6679_p11 = scmp.lt.s32.totalorder %s6677_s15, %s6673_s24 }
 0x620   : > { %p6675_p7 = pnand %p6674_p6, %p6841_p4 }
 0x621   : > { %p6680_p12 = por %p6679_p11, %p6678_p10 }
 0x622   : > { %p6676_p9 = pneg %p6675_p7 }
 0x624   : > { %p6681_p13 = pnand %p6680_p12, %p6676_p9 }
 0x626   : > { %6684 = shalt.err (!%p6681_p13)
}
 0x627   : > { %6246 = dma.vmem_to_hbm [thread:$0]  (%p6841_p4), %s9732_s12, 128, %s5156_s28, %s5136_s0  }
 0x628 PF: > { %p6252_p0 = scmp.ge.s32.totalorder %s6735_s22, 2  ;;  %s5173_s1 = sand.u32 1, %s6715_s17  }
 0x629   : > { %s5174_s23 = scalar_lea.sflag [#allocation3], %s5173_s1 }
 0x62a   : > { %p6249_p1 = pnand %p6252_p0, %p6848_p8 }
 0x62c   : > { %p6250_p2 = pneg %p6249_p1 }
 0x62e   : > { %6710 = dma.done.wait (%p6250_p2), %s5174_s23, 128  }
 0x62f   : > { %6712 = vsyncadd (%p6250_p2), %s5174_s23, 4294967168  ;;  %s25_s22 = sadd.s32 1, %s6735_s22   ;;  %s10215_s17 = smov %s6719_s18 }
 0x630   : > { %p22_p3 = scmp.ge.s32.totalorder %s25_s22, 6   ;;  %s10216_s18 = smov %s6723_s19 }
 0x631   : > { %s10217_s19 = smov %s6854_s30  ;;  %s10218_s20 = smov %s6731_s21 }
 0x632   : > { %s10219_s21 = smov %s10221_s25  ;;  %24 = sbr.rel (!%p22_p3) target bundleno = 8 (0x8), region = 118 }
 0x637   :  { %5190 = vsyncpa [#allocation3], 1 }
 0x638   :  { %5192 = vsyncpa [#allocation3 + $0x1], 1 }

</bundles_post_ra>
